<compile_context>
chip_gen: v7x
topology: tpu7x:2x2x1
jax: 0.10.0
libtpu: 0.0.40
codegen_flags: <defaults>
</compile_context>

<pallas_src>
import functools

import jax
import jax.numpy as jnp
from jax import lax
from jax.experimental import pallas as pl
from jax.experimental.pallas import tpu as pltpu


def _layernorm(v, w, b, eps=1e-5):
    mu = jnp.mean(v, axis=-1, keepdims=True)
    var = jnp.mean(jnp.square(v - mu), axis=-1, keepdims=True)
    return (v - mu) * lax.rsqrt(var + eps) * w + b


def _gelu_tanh(h):
    # matches nn.GELU(approximate='tanh')
    return 0.5 * h * (1.0 + jnp.tanh(0.7978845608028654 *
                                     (h + 0.044715 * h * h * h)))


def block_kernel(num_heads, head_dim, batch_tile, seq_len, kv_tile, hm_tile,
                 attn_mode,
                 x_ref,
                 n1w_ref, n1b_ref,
                 qw_ref, kw_ref, vw_ref,
                 qnw_ref, qnb_ref, knw_ref, knb_ref,
                 projw_ref, projb_ref,
                 n2w_ref, n2b_ref,
                 fc1w_ref, fc1b_ref, fc2w_ref, fc2b_ref,
                 o_ref):
    H, hd, bt, L = num_heads, head_dim, batch_tile, seq_len
    D = H * hd
    rows = bt * L
    bf16 = jnp.bfloat16
    f32 = jnp.float32

    # Flatten (bt, L, D) -> (bt*L, D): LN / projections / MLP run on
    # lane-dense row tiles; only the attention score step is per-sequence.
    x = x_ref[...].astype(f32).reshape(rows, D)

    # ---------------- attention branch ----------------
    xn = _layernorm(x, n1w_ref[...], n1b_ref[...])
    xnb = xn.astype(bf16)
    # Three (D, D) projections (qkv weight split on the host -> no unaligned
    # lane slicing of a fused (rows, 3D) activation inside the kernel).
    q = jnp.dot(xnb, qw_ref[...], preferred_element_type=f32)
    k = jnp.dot(xnb, kw_ref[...], preferred_element_type=f32)
    v = jnp.dot(xnb, vw_ref[...], preferred_element_type=f32)

    if attn_mode == "merged":
        # Per-head LayerNorm; hd^-0.5 already folded into qn_w/qn_b.
        q4 = _layernorm(q.reshape(bt, L, H, hd), qnw_ref[...], qnb_ref[...])
        k4 = _layernorm(k.reshape(bt, L, H, hd), knw_ref[...], knb_ref[...])
        v4 = v.reshape(bt, L, H, hd)

        if bt == 1:
            qh = pltpu.einshape("lhd->hld", q4[0]).astype(bf16)   # (H, L, hd)
            kh = pltpu.einshape("lhd->hld", k4[0]).astype(bf16)
            vh = pltpu.einshape("lhd->hld", v4[0]).astype(bf16)
        else:
            qh = jnp.swapaxes(q4, 1, 2).reshape(bt * H, L, hd).astype(bf16)
            kh = jnp.swapaxes(k4, 1, 2).reshape(bt * H, L, hd).astype(bf16)
            vh = jnp.swapaxes(v4, 1, 2).reshape(bt * H, L, hd).astype(bf16)
        BH = bt * H

        num_kv = L // kv_tile
        if num_kv <= 1:
            # Small L: single-shot softmax (no tiling overhead).
            s = jnp.einsum("hld,hmd->hlm", qh, kh,
                           preferred_element_type=f32)          # (BH, L, L)
            s = s - jnp.max(s, axis=-1, keepdims=True)
            p = jnp.exp(s)
            p = p * pl.reciprocal(jnp.sum(p, axis=-1, keepdims=True),
                                  approx=True)
            o = jnp.einsum("hlm,hmd->hld", p.astype(bf16), vh,
                           preferred_element_type=f32)          # (BH, L, hd)
        else:
            # Flash-style online softmax over KV tiles: (BH, L, kv_tile)
            # scores only, never a full (BH, L, L) tensor.
            def kv_step(i, carry):
                m, l_acc, acc = carry
                kt = lax.dynamic_slice_in_dim(kh, i * kv_tile, kv_tile, axis=1)
                vt = lax.dynamic_slice_in_dim(vh, i * kv_tile, kv_tile, axis=1)
                s = jnp.einsum("hld,hmd->hlm", qh, kt,
                               preferred_element_type=f32)
                m_new = jnp.maximum(m, jnp.max(s, axis=-1, keepdims=True))
                a = jnp.exp(m - m_new)
                p = jnp.exp(s - m_new)
                l_new = a * l_acc + jnp.sum(p, axis=-1, keepdims=True)
                acc_new = a * acc + jnp.einsum(
                    "hlm,hmd->hld", p.astype(bf16), vt,
                    preferred_element_type=f32)
                return m_new, l_new, acc_new

            m0 = jnp.full((BH, L, 1), -jnp.inf, f32)
            l0 = jnp.zeros((BH, L, 1), f32)
            a0 = jnp.zeros((BH, L, hd), f32)
            m, l_acc, acc = lax.fori_loop(0, num_kv, kv_step, (m0, l0, a0))
            o = acc * pl.reciprocal(l_acc, approx=True)

        if bt == 1:
            attn = pltpu.einshape("hld->lhd", o).reshape(L, D)
        else:
            attn = jnp.swapaxes(o.reshape(bt, H, L, hd), 1, 2).reshape(rows, D)
    else:
        # Portability fallback: per-sequence / per-head 2-D matmuls (known
        # good lowering). Same math, lower MXU utilization.
        outs = []
        for b in range(bt):
            r = slice(b * L, (b + 1) * L)
            head_outs = []
            for h in range(H):
                c = slice(h * hd, (h + 1) * hd)
                qhh = _layernorm(q[r, c], qnw_ref[...], qnb_ref[...])
                khh = _layernorm(k[r, c], knw_ref[...], knb_ref[...])
                vhh = v[r, c]
                s = jnp.dot(qhh.astype(bf16), khh.astype(bf16).T,
                            preferred_element_type=f32)
                s = s - jnp.max(s, axis=-1, keepdims=True)
                p = jnp.exp(s)
                p = p * pl.reciprocal(jnp.sum(p, axis=-1, keepdims=True),
                                      approx=True)
                head_outs.append(jnp.dot(p.astype(bf16), vhh.astype(bf16),
                                         preferred_element_type=f32))
            outs.append(jnp.concatenate(head_outs, axis=-1))
        attn = jnp.concatenate(outs, axis=0) if bt > 1 else outs[0]

    attn_out = jnp.dot(attn.astype(bf16), projw_ref[...],
                       preferred_element_type=f32) + projb_ref[...]
    x1 = x + attn_out

    # ---------------- MLP branch ----------------
    xn2 = _layernorm(x1, n2w_ref[...], n2b_ref[...])
    xn2b = xn2.astype(bf16)
    Hm = fc1w_ref.shape[1]
    n_hm = Hm // hm_tile
    if n_hm <= 1:
        h1 = jnp.dot(xn2b, fc1w_ref[...],
                     preferred_element_type=f32) + fc1b_ref[...]
        h1 = _gelu_tanh(h1)
        h2 = jnp.dot(h1.astype(bf16), fc2w_ref[...],
                     preferred_element_type=f32) + fc2b_ref[...]
    else:
        # Chunk the hidden dim so the f32 hidden activation stays bounded
        # at (rows, hm_tile); static ref slices are free views.
        acc2 = jnp.zeros((rows, D), f32)
        for c in range(n_hm):
            sl = slice(c * hm_tile, (c + 1) * hm_tile)
            h1c = jnp.dot(xn2b, fc1w_ref[:, sl],
                          preferred_element_type=f32) + fc1b_ref[:, sl]
            h1c = _gelu_tanh(h1c)
            acc2 = acc2 + jnp.dot(h1c.astype(bf16), fc2w_ref[sl, :],
                                  preferred_element_type=f32)
        h2 = acc2 + fc2b_ref[...]

    o_ref[...] = (x1 + h2).reshape(bt, L, D).astype(o_ref.dtype)


_WEIGHT_ORDER = (
    ('n1_w', 'f32'), ('n1_b', 'f32'),
    ('q_w', 'bf16'), ('k_w', 'bf16'), ('v_w', 'bf16'),
    ('qn_w', 'f32'), ('qn_b', 'f32'), ('kn_w', 'f32'), ('kn_b', 'f32'),
    ('proj_w', 'bf16'), ('proj_b', 'f32'),
    ('n2_w', 'f32'), ('n2_b', 'f32'),
    ('fc1_w', 'bf16'), ('fc1_b', 'f32'),
    ('fc2_w', 'bf16'), ('fc2_b', 'f32'),
)


def _choose_batch_tile(N, L, target_rows=256):
    """Largest divisor of N with bt*L <= ~target_rows and grid length >= 2."""
    best = 1
    for d in range(1, N + 1):
        if N % d:
            continue
        if d * L > max(target_rows, L):
            continue
        if N >= 2 and N // d < 2:
            continue
        best = max(best, d)
    return best


def _choose_kv_tile(L, max_tile=256):
    if L <= max_tile:
        return L
    for t in (256, 128):
        if L % t == 0:
            return t
    return L


def _choose_hm_tile(Hm, max_tile=2048):
    if Hm <= max_tile:
        return Hm
    for t in (2048, 1024, 512, 256):
        if Hm % t == 0:
            return t
    return Hm


def block_forward(x, params, num_heads, *, batch_tile=None,
                  attn_mode="merged", single_buffer_weights=True):
    N, L, D = x.shape
    assert D % num_heads == 0
    head_dim = D // num_heads
    Hm = params['fc1_w'].shape[1]
    bt = batch_tile if batch_tile is not None else _choose_batch_tile(N, L)
    assert N % bt == 0
    kv_tile = _choose_kv_tile(L)
    hm_tile = _choose_hm_tile(Hm)

    # Fold the hd^-0.5 scale into the per-head q-LN weight/bias (host-side,
    # tiny (1, hd) arrays), so the kernel skips a (bt, L, H, hd) multiply.
    scale = head_dim ** (-0.5)
    prepped = dict(params)
    prepped['qn_w'] = params['qn_w'] * scale
    prepped['qn_b'] = params['qn_b'] * scale

    # bf16 weights for the MXU (halves resident weight VMEM); LN params and
    # biases stay f32 (added to f32 accumulators).
    weight_args = [
        prepped[name].astype(jnp.bfloat16 if kind == 'bf16' else jnp.float32)
        for name, kind in _WEIGHT_ORDER
    ]

    def weight_spec(shape):
        idx = lambda n, _nd=len(shape): (0,) * _nd
        if single_buffer_weights:
            # Grid-invariant weights never re-fetch -> no double buffering.
            return pl.BlockSpec(shape, idx, pipeline_mode=pl.Buffered(1))
        return pl.BlockSpec(shape, idx)

    in_specs = [pl.BlockSpec((bt, L, D), lambda n: (n, 0, 0))]
    in_specs += [weight_spec(tuple(w.shape)) for w in weight_args]
    out_spec = pl.BlockSpec((bt, L, D), lambda n: (n, 0, 0))

    kernel = functools.partial(block_kernel, num_heads, head_dim, bt, L,
                               kv_tile, hm_tile, attn_mode)

    # Advisory cost hint.
    flops = 2 * N * L * D * (4 * D + 2 * Hm) + 4 * N * L * L * D
    transcendentals = N * num_heads * L * L + N * L * Hm
    weight_bytes = sum(int(w.size) * w.dtype.itemsize for w in weight_args)
    act_bytes = 2 * N * L * D * x.dtype.itemsize
    cost = pl.CostEstimate(flops=int(flops),
                           transcendentals=int(transcendentals),
                           bytes_accessed=int(weight_bytes + act_bytes))

    # VMEM budget: resident weights (x1 if single-buffered), double-buffered
    # in/out activation tiles, f32 intermediates, score/prob KV tiles and the
    # MLP hidden chunk; capped generation-aware (physical - 8 MiB, <= 100 MiB).
    rows = bt * L
    io_bytes = 2 * 2 * rows * D * 4
    interm_bytes = (8 * rows * D * 4
                    + 2 * bt * num_heads * L * kv_tile * 4
                    + 2 * rows * hm_tile * 4)
    est = (weight_bytes * (1 if single_buffer_weights else 2)
           + io_bytes + interm_bytes + (8 << 20))
    phys = 64 << 20  # conservative fallback (v7x per-TC VMEM)
    try:
        info = pltpu.get_tpu_info()
        phys = int(getattr(info, 'vmem_capacity_bytes', phys)) or phys
    except Exception:
        pass
    cap = max(32 << 20, min(phys - (8 << 20), 100 << 20))
    vmem_limit = int(min(max(est, 32 << 20), cap))

    return pl.pallas_call(
        kernel,
        out_shape=jax.ShapeDtypeStruct((N, L, D), x.dtype),
        grid_spec=pltpu.PrefetchScalarGridSpec(
            num_scalar_prefetch=0,
            grid=(N // bt,),
            in_specs=in_specs,
            out_specs=out_spec,
        ),
        compiler_params=pltpu.CompilerParams(
            dimension_semantics=("parallel",),  # batch tiles are independent
            vmem_limit_bytes=vmem_limit,
        ),
        cost_estimate=cost,
    )(x, *weight_args)


def block_ref(x, params, num_heads):
    """Pure-JAX f32 reference mirroring the PyTorch forward (attn_mask=None)."""
    N, L, D = x.shape
    H = num_heads
    hd = D // H

    def ln(v, w, b, eps=1e-5):
        mu = v.mean(-1, keepdims=True)
        var = ((v - mu) ** 2).mean(-1, keepdims=True)
        return (v - mu) / jnp.sqrt(var + eps) * w + b

    xn = ln(x, params['n1_w'], params['n1_b'])
    q = (xn @ params['q_w']).reshape(N, L, H, hd).transpose(0, 2, 1, 3)
    k = (xn @ params['k_w']).reshape(N, L, H, hd).transpose(0, 2, 1, 3)
    v = (xn @ params['v_w']).reshape(N, L, H, hd).transpose(0, 2, 1, 3)
    q = ln(q, params['qn_w'], params['qn_b']) * (hd ** -0.5)
    k = ln(k, params['kn_w'], params['kn_b'])
    attn = jax.nn.softmax(q @ k.transpose(0, 1, 3, 2), axis=-1)
    o = (attn @ v).transpose(0, 2, 1, 3).reshape(N, L, D)
    o = o @ params['proj_w'] + params['proj_b']
    x1 = x + o
    xn2 = ln(x1, params['n2_w'], params['n2_b'])
    h1 = xn2 @ params['fc1_w'] + params['fc1_b']
    h1 = jax.nn.gelu(h1, approximate=True)
    h2 = h1 @ params['fc2_w'] + params['fc2_b']
    return x1 + h2


def init_params(key, hidden_size, num_heads, mlp_ratio=4.0):
    D = hidden_size
    hd = D // num_heads
    Hm = int(D * mlp_ratio)
    ks = jax.random.split(key, 17)
    f32 = jnp.float32

    def nrm(k, shape, s):
        return (s * jax.random.normal(k, shape)).astype(f32)

    return {
        'n1_w': 1.0 + nrm(ks[0], (1, D), 0.02), 'n1_b': nrm(ks[1], (1, D), 0.02),
        'n2_w': 1.0 + nrm(ks[2], (1, D), 0.02), 'n2_b': nrm(ks[3], (1, D), 0.02),
        'qn_w': 1.0 + nrm(ks[4], (1, hd), 0.02), 'qn_b': nrm(ks[5], (1, hd), 0.02),
        'kn_w': 1.0 + nrm(ks[6], (1, hd), 0.02), 'kn_b': nrm(ks[7], (1, hd), 0.02),
        # Linear weights pre-transposed to (in, out); qkv split into q/k/v.
        'q_w': nrm(ks[8], (D, D), 0.05),
        'k_w': nrm(ks[9], (D, D), 0.05),
        'v_w': nrm(ks[10], (D, D), 0.05),
        'proj_w': nrm(ks[11], (D, D), 0.05), 'proj_b': nrm(ks[12], (1, D), 0.02),
        'fc1_w': nrm(ks[13], (D, Hm), 0.05), 'fc1_b': nrm(ks[14], (1, Hm), 0.02),
        'fc2_w': nrm(ks[15], (Hm, D), 0.05), 'fc2_b': nrm(ks[16], (1, D), 0.02),
    }


if __name__ == "__main__":
    # Small shapes consistent with the module: batch=2, seq=8, hidden=32, heads=4.
    N, L, D, num_heads = 2, 8, 32, 4
    key = jax.random.PRNGKey(0)
    kx, kp = jax.random.split(key)
    x = jax.random.normal(kx, (N, L, D), dtype=jnp.float32)
    params = init_params(kp, D, num_heads, mlp_ratio=4.0)

    ref = block_ref(x, params, num_heads)

    # Preferred (fully optimized) configuration first; fall back to
    # progressively more conservative lowerings if this Pallas/Mosaic version
    # rejects a newer feature. The accepted result must also match the f32
    # reference (bf16 matmul inputs -> relaxed tolerance).
    attempts = (
        dict(attn_mode="merged", single_buffer_weights=True),
        dict(attn_mode="merged", single_buffer_weights=False),
        dict(attn_mode="loop", single_buffer_weights=False),
    )
    out, last_err = None, None
    for cfg in attempts:
        try:
            cand = block_forward(x, params, num_heads, **cfg)
            cand = jax.block_until_ready(cand)
        except Exception as e:  # lowering unsupported on this version/chip
            last_err = e
            continue
        if cand.shape == ref.shape and bool(jnp.all(jnp.abs(cand - ref) < 5e-2)):
            out = cand
            break
        last_err = AssertionError(
            "configuration %r did not match the reference" % (cfg,))
    if out is None:
        raise last_err

    assert out.shape == (N, L, D)
    print("KERNEL_OK")
</pallas_src>

<mosaic_0001>
module attributes {stable_mosaic.version = 11 : i64} {
  func.func @block_kernel(%arg0: i32, %arg1: memref<1x8x32xf32, #tpu.memory_space<vmem>>, %arg2: memref<1x32xf32, #tpu.memory_space<vmem>>, %arg3: memref<1x32xf32, #tpu.memory_space<vmem>>, %arg4: memref<32x32xbf16, #tpu.memory_space<vmem>>, %arg5: memref<32x32xbf16, #tpu.memory_space<vmem>>, %arg6: memref<32x32xbf16, #tpu.memory_space<vmem>>, %arg7: memref<1x8xf32, #tpu.memory_space<vmem>>, %arg8: memref<1x8xf32, #tpu.memory_space<vmem>>, %arg9: memref<1x8xf32, #tpu.memory_space<vmem>>, %arg10: memref<1x8xf32, #tpu.memory_space<vmem>>, %arg11: memref<32x32xbf16, #tpu.memory_space<vmem>>, %arg12: memref<1x32xf32, #tpu.memory_space<vmem>>, %arg13: memref<1x32xf32, #tpu.memory_space<vmem>>, %arg14: memref<1x32xf32, #tpu.memory_space<vmem>>, %arg15: memref<32x128xbf16, #tpu.memory_space<vmem>>, %arg16: memref<1x128xf32, #tpu.memory_space<vmem>>, %arg17: memref<128x32xbf16, #tpu.memory_space<vmem>>, %arg18: memref<1x32xf32, #tpu.memory_space<vmem>>, %arg19: memref<1x8x32xf32, #tpu.memory_space<vmem>>) attributes {dimension_semantics = [#tpu.dimension_semantics<parallel>], iteration_bounds = array<i64: 2>, scalar_prefetch = 0 : i64, scratch_operands = 0 : i64, tpu.core_type = #tpu.core_type<tc>, window_params = [{transform_indices = @transform_0, window_bounds = array<i64: 1, 8, 32>}, {pipeline_mode = #tpu.pipeline_mode<synchronous>, transform_indices = @transform_1, window_bounds = array<i64: 1, 32>}, {pipeline_mode = #tpu.pipeline_mode<synchronous>, transform_indices = @transform_2, window_bounds = array<i64: 1, 32>}, {pipeline_mode = #tpu.pipeline_mode<synchronous>, transform_indices = @transform_3, window_bounds = array<i64: 32, 32>}, {pipeline_mode = #tpu.pipeline_mode<synchronous>, transform_indices = @transform_4, window_bounds = array<i64: 32, 32>}, {pipeline_mode = #tpu.pipeline_mode<synchronous>, transform_indices = @transform_5, window_bounds = array<i64: 32, 32>}, {pipeline_mode = #tpu.pipeline_mode<synchronous>, transform_indices = @transform_6, window_bounds = array<i64: 1, 8>}, {pipeline_mode = #tpu.pipeline_mode<synchronous>, transform_indices = @transform_7, window_bounds = array<i64: 1, 8>}, {pipeline_mode = #tpu.pipeline_mode<synchronous>, transform_indices = @transform_8, window_bounds = array<i64: 1, 8>}, {pipeline_mode = #tpu.pipeline_mode<synchronous>, transform_indices = @transform_9, window_bounds = array<i64: 1, 8>}, {pipeline_mode = #tpu.pipeline_mode<synchronous>, transform_indices = @transform_10, window_bounds = array<i64: 32, 32>}, {pipeline_mode = #tpu.pipeline_mode<synchronous>, transform_indices = @transform_11, window_bounds = array<i64: 1, 32>}, {pipeline_mode = #tpu.pipeline_mode<synchronous>, transform_indices = @transform_12, window_bounds = array<i64: 1, 32>}, {pipeline_mode = #tpu.pipeline_mode<synchronous>, transform_indices = @transform_13, window_bounds = array<i64: 1, 32>}, {pipeline_mode = #tpu.pipeline_mode<synchronous>, transform_indices = @transform_14, window_bounds = array<i64: 32, 128>}, {pipeline_mode = #tpu.pipeline_mode<synchronous>, transform_indices = @transform_15, window_bounds = array<i64: 1, 128>}, {pipeline_mode = #tpu.pipeline_mode<synchronous>, transform_indices = @transform_16, window_bounds = array<i64: 128, 32>}, {pipeline_mode = #tpu.pipeline_mode<synchronous>, transform_indices = @transform_17, window_bounds = array<i64: 1, 32>}, {transform_indices = @transform_18, window_bounds = array<i64: 1, 8, 32>}]} {
    %c0 = arith.constant 0 : index
    %c0_0 = arith.constant 0 : index
    %c0_1 = arith.constant 0 : index
    %0 = vector.load %arg1[%c0, %c0_0, %c0_1] : memref<1x8x32xf32, #tpu.memory_space<vmem>>, vector<1x8x32xf32>
    %1 = vector.shape_cast %0 : vector<1x8x32xf32> to vector<8x32xf32>
    %c0_2 = arith.constant 0 : index
    %c0_3 = arith.constant 0 : index
    %2 = vector.load %arg2[%c0_2, %c0_3] : memref<1x32xf32, #tpu.memory_space<vmem>>, vector<1x32xf32>
    %c0_4 = arith.constant 0 : index
    %c0_5 = arith.constant 0 : index
    %3 = vector.load %arg3[%c0_4, %c0_5] : memref<1x32xf32, #tpu.memory_space<vmem>>, vector<1x32xf32>
    %cst = arith.constant dense<0.000000e+00> : vector<8xf32>
    %4 = vector.multi_reduction <add>, %1, %cst [1] : vector<8x32xf32> to vector<8xf32>
    %5 = vector.shape_cast %4 : vector<8xf32> to vector<8x1xf32>
    %cst_6 = arith.constant 3.200000e+01 : f32
    %6 = vector.broadcast %cst_6 : f32 to vector<8x1xf32>
    %7 = arith.divf %5, %6 : vector<8x1xf32>
    %8 = vector.broadcast %7 : vector<8x1xf32> to vector<8x32xf32>
    %9 = arith.subf %1, %8 : vector<8x32xf32>
    %10 = arith.mulf %9, %9 : vector<8x32xf32>
    %cst_7 = arith.constant dense<0.000000e+00> : vector<8xf32>
    %11 = vector.multi_reduction <add>, %10, %cst_7 [1] : vector<8x32xf32> to vector<8xf32>
    %12 = vector.shape_cast %11 : vector<8xf32> to vector<8x1xf32>
    %cst_8 = arith.constant 3.200000e+01 : f32
    %13 = vector.broadcast %cst_8 : f32 to vector<8x1xf32>
    %14 = arith.divf %12, %13 : vector<8x1xf32>
    %15 = vector.broadcast %7 : vector<8x1xf32> to vector<8x32xf32>
    %16 = arith.subf %1, %15 : vector<8x32xf32>
    %cst_9 = arith.constant 9.99999974E-6 : f32
    %17 = vector.broadcast %cst_9 : f32 to vector<8x1xf32>
    %18 = arith.addf %14, %17 : vector<8x1xf32>
    %19 = math.rsqrt %18 : vector<8x1xf32>
    %20 = vector.broadcast %19 : vector<8x1xf32> to vector<8x32xf32>
    %21 = arith.mulf %16, %20 : vector<8x32xf32>
    %22 = vector.broadcast %2 : vector<1x32xf32> to vector<8x32xf32>
    %23 = arith.mulf %21, %22 : vector<8x32xf32>
    %24 = vector.broadcast %3 : vector<1x32xf32> to vector<8x32xf32>
    %25 = arith.addf %23, %24 : vector<8x32xf32>
    %26 = arith.truncf %25 : vector<8x32xf32> to vector<8x32xbf16>
    %c0_10 = arith.constant 0 : index
    %c0_11 = arith.constant 0 : index
    %27 = vector.load %arg4[%c0_10, %c0_11] : memref<32x32xbf16, #tpu.memory_space<vmem>>, vector<32x32xbf16>
    %cst_12 = arith.constant dense<0.000000e+00> : vector<8x32xf32>
    %28 = tpu.matmul %26, %27, %cst_12 {dimension_numbers = #tpu.dot_dimension_numbers<[1], [0], [0], [1], [0, 0, 1, 1], [], []>} : vector<8x32xbf16>, vector<32x32xbf16>, vector<8x32xf32> -> vector<8x32xf32>
    %c0_13 = arith.constant 0 : index
    %c0_14 = arith.constant 0 : index
    %29 = vector.load %arg5[%c0_13, %c0_14] : memref<32x32xbf16, #tpu.memory_space<vmem>>, vector<32x32xbf16>
    %cst_15 = arith.constant dense<0.000000e+00> : vector<8x32xf32>
    %30 = tpu.matmul %26, %29, %cst_15 {dimension_numbers = #tpu.dot_dimension_numbers<[1], [0], [0], [1], [0, 0, 1, 1], [], []>} : vector<8x32xbf16>, vector<32x32xbf16>, vector<8x32xf32> -> vector<8x32xf32>
    %c0_16 = arith.constant 0 : index
    %c0_17 = arith.constant 0 : index
    %31 = vector.load %arg6[%c0_16, %c0_17] : memref<32x32xbf16, #tpu.memory_space<vmem>>, vector<32x32xbf16>
    %cst_18 = arith.constant dense<0.000000e+00> : vector<8x32xf32>
    %32 = tpu.matmul %26, %31, %cst_18 {dimension_numbers = #tpu.dot_dimension_numbers<[1], [0], [0], [1], [0, 0, 1, 1], [], []>} : vector<8x32xbf16>, vector<32x32xbf16>, vector<8x32xf32> -> vector<8x32xf32>
    %33 = vector.shape_cast %28 : vector<8x32xf32> to vector<1x8x4x8xf32>
    %c0_19 = arith.constant 0 : index
    %c0_20 = arith.constant 0 : index
    %34 = vector.load %arg7[%c0_19, %c0_20] : memref<1x8xf32, #tpu.memory_space<vmem>>, vector<1x8xf32>
    %c0_21 = arith.constant 0 : index
    %c0_22 = arith.constant 0 : index
    %35 = vector.load %arg8[%c0_21, %c0_22] : memref<1x8xf32, #tpu.memory_space<vmem>>, vector<1x8xf32>
    %cst_23 = arith.constant dense<0.000000e+00> : vector<1x8x4xf32>
    %36 = vector.multi_reduction <add>, %33, %cst_23 [3] : vector<1x8x4x8xf32> to vector<1x8x4xf32>
    %37 = vector.shape_cast %36 : vector<1x8x4xf32> to vector<1x8x4x1xf32>
    %cst_24 = arith.constant 8.000000e+00 : f32
    %38 = vector.broadcast %cst_24 : f32 to vector<1x8x4x1xf32>
    %39 = arith.divf %37, %38 : vector<1x8x4x1xf32>
    %40 = vector.broadcast %39 : vector<1x8x4x1xf32> to vector<1x8x4x8xf32>
    %41 = arith.subf %33, %40 : vector<1x8x4x8xf32>
    %42 = arith.mulf %41, %41 : vector<1x8x4x8xf32>
    %cst_25 = arith.constant dense<0.000000e+00> : vector<1x8x4xf32>
    %43 = vector.multi_reduction <add>, %42, %cst_25 [3] : vector<1x8x4x8xf32> to vector<1x8x4xf32>
    %44 = vector.shape_cast %43 : vector<1x8x4xf32> to vector<1x8x4x1xf32>
    %cst_26 = arith.constant 8.000000e+00 : f32
    %45 = vector.broadcast %cst_26 : f32 to vector<1x8x4x1xf32>
    %46 = arith.divf %44, %45 : vector<1x8x4x1xf32>
    %47 = vector.broadcast %39 : vector<1x8x4x1xf32> to vector<1x8x4x8xf32>
    %48 = arith.subf %33, %47 : vector<1x8x4x8xf32>
    %cst_27 = arith.constant 9.99999974E-6 : f32
    %49 = vector.broadcast %cst_27 : f32 to vector<1x8x4x1xf32>
    %50 = arith.addf %46, %49 : vector<1x8x4x1xf32>
    %51 = math.rsqrt %50 : vector<1x8x4x1xf32>
    %52 = vector.broadcast %51 : vector<1x8x4x1xf32> to vector<1x8x4x8xf32>
    %53 = arith.mulf %48, %52 : vector<1x8x4x8xf32>
    %54 = vector.shape_cast %34 : vector<1x8xf32> to vector<1x1x1x8xf32>
    %55 = vector.broadcast %54 : vector<1x1x1x8xf32> to vector<1x8x4x8xf32>
    %56 = arith.mulf %53, %55 : vector<1x8x4x8xf32>
    %57 = vector.shape_cast %35 : vector<1x8xf32> to vector<1x1x1x8xf32>
    %58 = vector.broadcast %57 : vector<1x1x1x8xf32> to vector<1x8x4x8xf32>
    %59 = arith.addf %56, %58 : vector<1x8x4x8xf32>
    %60 = vector.shape_cast %30 : vector<8x32xf32> to vector<1x8x4x8xf32>
    %c0_28 = arith.constant 0 : index
    %c0_29 = arith.constant 0 : index
    %61 = vector.load %arg9[%c0_28, %c0_29] : memref<1x8xf32, #tpu.memory_space<vmem>>, vector<1x8xf32>
    %c0_30 = arith.constant 0 : index
    %c0_31 = arith.constant 0 : index
    %62 = vector.load %arg10[%c0_30, %c0_31] : memref<1x8xf32, #tpu.memory_space<vmem>>, vector<1x8xf32>
    %cst_32 = arith.constant dense<0.000000e+00> : vector<1x8x4xf32>
    %63 = vector.multi_reduction <add>, %60, %cst_32 [3] : vector<1x8x4x8xf32> to vector<1x8x4xf32>
    %64 = vector.shape_cast %63 : vector<1x8x4xf32> to vector<1x8x4x1xf32>
    %cst_33 = arith.constant 8.000000e+00 : f32
    %65 = vector.broadcast %cst_33 : f32 to vector<1x8x4x1xf32>
    %66 = arith.divf %64, %65 : vector<1x8x4x1xf32>
    %67 = vector.broadcast %66 : vector<1x8x4x1xf32> to vector<1x8x4x8xf32>
    %68 = arith.subf %60, %67 : vector<1x8x4x8xf32>
    %69 = arith.mulf %68, %68 : vector<1x8x4x8xf32>
    %cst_34 = arith.constant dense<0.000000e+00> : vector<1x8x4xf32>
    %70 = vector.multi_reduction <add>, %69, %cst_34 [3] : vector<1x8x4x8xf32> to vector<1x8x4xf32>
    %71 = vector.shape_cast %70 : vector<1x8x4xf32> to vector<1x8x4x1xf32>
    %cst_35 = arith.constant 8.000000e+00 : f32
    %72 = vector.broadcast %cst_35 : f32 to vector<1x8x4x1xf32>
    %73 = arith.divf %71, %72 : vector<1x8x4x1xf32>
    %74 = vector.broadcast %66 : vector<1x8x4x1xf32> to vector<1x8x4x8xf32>
    %75 = arith.subf %60, %74 : vector<1x8x4x8xf32>
    %cst_36 = arith.constant 9.99999974E-6 : f32
    %76 = vector.broadcast %cst_36 : f32 to vector<1x8x4x1xf32>
    %77 = arith.addf %73, %76 : vector<1x8x4x1xf32>
    %78 = math.rsqrt %77 : vector<1x8x4x1xf32>
    %79 = vector.broadcast %78 : vector<1x8x4x1xf32> to vector<1x8x4x8xf32>
    %80 = arith.mulf %75, %79 : vector<1x8x4x8xf32>
    %81 = vector.shape_cast %61 : vector<1x8xf32> to vector<1x1x1x8xf32>
    %82 = vector.broadcast %81 : vector<1x1x1x8xf32> to vector<1x8x4x8xf32>
    %83 = arith.mulf %80, %82 : vector<1x8x4x8xf32>
    %84 = vector.shape_cast %62 : vector<1x8xf32> to vector<1x1x1x8xf32>
    %85 = vector.broadcast %84 : vector<1x1x1x8xf32> to vector<1x8x4x8xf32>
    %86 = arith.addf %83, %85 : vector<1x8x4x8xf32>
    %87 = vector.shape_cast %32 : vector<8x32xf32> to vector<1x8x4x8xf32>
    %88 = vector.shape_cast %59 : vector<1x8x4x8xf32> to vector<8x4x8xf32>
    %89 = tpu.transpose %88, [1, 0, 2] : vector<8x4x8xf32> -> vector<4x8x8xf32>
    %90 = arith.truncf %89 : vector<4x8x8xf32> to vector<4x8x8xbf16>
    %91 = vector.shape_cast %86 : vector<1x8x4x8xf32> to vector<8x4x8xf32>
    %92 = tpu.transpose %91, [1, 0, 2] : vector<8x4x8xf32> -> vector<4x8x8xf32>
    %93 = arith.truncf %92 : vector<4x8x8xf32> to vector<4x8x8xbf16>
    %94 = vector.shape_cast %87 : vector<1x8x4x8xf32> to vector<8x4x8xf32>
    %95 = tpu.transpose %94, [1, 0, 2] : vector<8x4x8xf32> -> vector<4x8x8xf32>
    %96 = arith.truncf %95 : vector<4x8x8xf32> to vector<4x8x8xbf16>
    "tpu.trace_start"() <{level = 10 : i32, message = "hld,hmd->hlm"}> : () -> ()
    %cst_37 = arith.constant dense<0.000000e+00> : vector<4x8x8xf32>
    %97 = tpu.matmul %90, %93, %cst_37 {dimension_numbers = #tpu.dot_dimension_numbers<[2], [2], [1], [1], [0, 0, 0, 1, 1, 1], [0], [0]>} : vector<4x8x8xbf16>, vector<4x8x8xbf16>, vector<4x8x8xf32> -> vector<4x8x8xf32>
    "tpu.trace_stop"() : () -> ()
    %cst_38 = arith.constant dense<0xFF800000> : vector<4x8xf32>
    %98 = vector.multi_reduction <maximumf>, %97, %cst_38 [2] : vector<4x8x8xf32> to vector<4x8xf32>
    %99 = vector.shape_cast %98 : vector<4x8xf32> to vector<4x8x1xf32>
    %100 = vector.broadcast %99 : vector<4x8x1xf32> to vector<4x8x8xf32>
    %101 = arith.subf %97, %100 : vector<4x8x8xf32>
    %102 = math.exp %101 : vector<4x8x8xf32>
    %cst_39 = arith.constant dense<0.000000e+00> : vector<4x8xf32>
    %103 = vector.multi_reduction <add>, %102, %cst_39 [2] : vector<4x8x8xf32> to vector<4x8xf32>
    %104 = vector.shape_cast %103 : vector<4x8xf32> to vector<4x8x1xf32>
    %105 = tpu.reciprocal %104 {approx = true} : vector<4x8x1xf32> -> vector<4x8x1xf32>
    %106 = vector.broadcast %105 : vector<4x8x1xf32> to vector<4x8x8xf32>
    %107 = arith.mulf %102, %106 : vector<4x8x8xf32>
    %108 = arith.truncf %107 : vector<4x8x8xf32> to vector<4x8x8xbf16>
    "tpu.trace_start"() <{level = 10 : i32, message = "hlm,hmd->hld"}> : () -> ()
    %cst_40 = arith.constant dense<0.000000e+00> : vector<4x8x8xf32>
    %109 = tpu.matmul %108, %96, %cst_40 {dimension_numbers = #tpu.dot_dimension_numbers<[2], [1], [1], [2], [0, 0, 0, 1, 1, 2], [0], [0]>} : vector<4x8x8xbf16>, vector<4x8x8xbf16>, vector<4x8x8xf32> -> vector<4x8x8xf32>
    "tpu.trace_stop"() : () -> ()
    %110 = tpu.transpose %109, [1, 0, 2] : vector<4x8x8xf32> -> vector<8x4x8xf32>
    %111 = vector.shape_cast %110 : vector<8x4x8xf32> to vector<8x32xf32>
    %112 = arith.truncf %111 : vector<8x32xf32> to vector<8x32xbf16>
    %c0_41 = arith.constant 0 : index
    %c0_42 = arith.constant 0 : index
    %113 = vector.load %arg11[%c0_41, %c0_42] : memref<32x32xbf16, #tpu.memory_space<vmem>>, vector<32x32xbf16>
    %cst_43 = arith.constant dense<0.000000e+00> : vector<8x32xf32>
    %114 = tpu.matmul %112, %113, %cst_43 {dimension_numbers = #tpu.dot_dimension_numbers<[1], [0], [0], [1], [0, 0, 1, 1], [], []>} : vector<8x32xbf16>, vector<32x32xbf16>, vector<8x32xf32> -> vector<8x32xf32>
    %c0_44 = arith.constant 0 : index
    %c0_45 = arith.constant 0 : index
    %115 = vector.load %arg12[%c0_44, %c0_45] : memref<1x32xf32, #tpu.memory_space<vmem>>, vector<1x32xf32>
    %116 = vector.broadcast %115 : vector<1x32xf32> to vector<8x32xf32>
    %117 = arith.addf %114, %116 : vector<8x32xf32>
    %118 = arith.addf %1, %117 : vector<8x32xf32>
    %c0_46 = arith.constant 0 : index
    %c0_47 = arith.constant 0 : index
    %119 = vector.load %arg13[%c0_46, %c0_47] : memref<1x32xf32, #tpu.memory_space<vmem>>, vector<1x32xf32>
    %c0_48 = arith.constant 0 : index
    %c0_49 = arith.constant 0 : index
    %120 = vector.load %arg14[%c0_48, %c0_49] : memref<1x32xf32, #tpu.memory_space<vmem>>, vector<1x32xf32>
    %cst_50 = arith.constant dense<0.000000e+00> : vector<8xf32>
    %121 = vector.multi_reduction <add>, %118, %cst_50 [1] : vector<8x32xf32> to vector<8xf32>
    %122 = vector.shape_cast %121 : vector<8xf32> to vector<8x1xf32>
    %cst_51 = arith.constant 3.200000e+01 : f32
    %123 = vector.broadcast %cst_51 : f32 to vector<8x1xf32>
    %124 = arith.divf %122, %123 : vector<8x1xf32>
    %125 = vector.broadcast %124 : vector<8x1xf32> to vector<8x32xf32>
    %126 = arith.subf %118, %125 : vector<8x32xf32>
    %127 = arith.mulf %126, %126 : vector<8x32xf32>
    %cst_52 = arith.constant dense<0.000000e+00> : vector<8xf32>
    %128 = vector.multi_reduction <add>, %127, %cst_52 [1] : vector<8x32xf32> to vector<8xf32>
    %129 = vector.shape_cast %128 : vector<8xf32> to vector<8x1xf32>
    %cst_53 = arith.constant 3.200000e+01 : f32
    %130 = vector.broadcast %cst_53 : f32 to vector<8x1xf32>
    %131 = arith.divf %129, %130 : vector<8x1xf32>
    %132 = vector.broadcast %124 : vector<8x1xf32> to vector<8x32xf32>
    %133 = arith.subf %118, %132 : vector<8x32xf32>
    %cst_54 = arith.constant 9.99999974E-6 : f32
    %134 = vector.broadcast %cst_54 : f32 to vector<8x1xf32>
    %135 = arith.addf %131, %134 : vector<8x1xf32>
    %136 = math.rsqrt %135 : vector<8x1xf32>
    %137 = vector.broadcast %136 : vector<8x1xf32> to vector<8x32xf32>
    %138 = arith.mulf %133, %137 : vector<8x32xf32>
    %139 = vector.broadcast %119 : vector<1x32xf32> to vector<8x32xf32>
    %140 = arith.mulf %138, %139 : vector<8x32xf32>
    %141 = vector.broadcast %120 : vector<1x32xf32> to vector<8x32xf32>
    %142 = arith.addf %140, %141 : vector<8x32xf32>
    %143 = arith.truncf %142 : vector<8x32xf32> to vector<8x32xbf16>
    %c0_55 = arith.constant 0 : index
    %c0_56 = arith.constant 0 : index
    %144 = vector.load %arg15[%c0_55, %c0_56] : memref<32x128xbf16, #tpu.memory_space<vmem>>, vector<32x128xbf16>
    %cst_57 = arith.constant dense<0.000000e+00> : vector<8x128xf32>
    %145 = tpu.matmul %143, %144, %cst_57 {dimension_numbers = #tpu.dot_dimension_numbers<[1], [0], [0], [1], [0, 0, 1, 1], [], []>} : vector<8x32xbf16>, vector<32x128xbf16>, vector<8x128xf32> -> vector<8x128xf32>
    %c0_58 = arith.constant 0 : index
    %c0_59 = arith.constant 0 : index
    %146 = vector.load %arg16[%c0_58, %c0_59] : memref<1x128xf32, #tpu.memory_space<vmem>>, vector<1x128xf32>
    %147 = vector.broadcast %146 : vector<1x128xf32> to vector<8x128xf32>
    %148 = arith.addf %145, %147 : vector<8x128xf32>
    %cst_60 = arith.constant 5.000000e-01 : f32
    %149 = vector.broadcast %cst_60 : f32 to vector<8x128xf32>
    %150 = arith.mulf %149, %148 : vector<8x128xf32>
    %cst_61 = arith.constant 4.471500e-02 : f32
    %151 = vector.broadcast %cst_61 : f32 to vector<8x128xf32>
    %152 = arith.mulf %151, %148 : vector<8x128xf32>
    %153 = arith.mulf %152, %148 : vector<8x128xf32>
    %154 = arith.mulf %153, %148 : vector<8x128xf32>
    %155 = arith.addf %148, %154 : vector<8x128xf32>
    %cst_62 = arith.constant 0.797884583 : f32
    %156 = vector.broadcast %cst_62 : f32 to vector<8x128xf32>
    %157 = arith.mulf %156, %155 : vector<8x128xf32>
    %158 = math.tanh %157 : vector<8x128xf32>
    %cst_63 = arith.constant 1.000000e+00 : f32
    %159 = vector.broadcast %cst_63 : f32 to vector<8x128xf32>
    %160 = arith.addf %159, %158 : vector<8x128xf32>
    %161 = arith.mulf %150, %160 : vector<8x128xf32>
    %162 = arith.truncf %161 : vector<8x128xf32> to vector<8x128xbf16>
    %c0_64 = arith.constant 0 : index
    %c0_65 = arith.constant 0 : index
    %163 = vector.load %arg17[%c0_64, %c0_65] : memref<128x32xbf16, #tpu.memory_space<vmem>>, vector<128x32xbf16>
    %cst_66 = arith.constant dense<0.000000e+00> : vector<8x32xf32>
    %164 = tpu.matmul %162, %163, %cst_66 {dimension_numbers = #tpu.dot_dimension_numbers<[1], [0], [0], [1], [0, 0, 1, 1], [], []>} : vector<8x128xbf16>, vector<128x32xbf16>, vector<8x32xf32> -> vector<8x32xf32>
    %c0_67 = arith.constant 0 : index
    %c0_68 = arith.constant 0 : index
    %165 = vector.load %arg18[%c0_67, %c0_68] : memref<1x32xf32, #tpu.memory_space<vmem>>, vector<1x32xf32>
    %166 = vector.broadcast %165 : vector<1x32xf32> to vector<8x32xf32>
    %167 = arith.addf %164, %166 : vector<8x32xf32>
    %168 = arith.addf %118, %167 : vector<8x32xf32>
    %169 = vector.shape_cast %168 : vector<8x32xf32> to vector<1x8x32xf32>
    %c0_69 = arith.constant 0 : index
    %c0_70 = arith.constant 0 : index
    %c0_71 = arith.constant 0 : index
    %170 = vector.load %arg19[%c0_69, %c0_70, %c0_71] : memref<1x8x32xf32, #tpu.memory_space<vmem>>, vector<1x8x32xf32>
    tpu.vector_store %arg19[%c0_69, %c0_70, %c0_71], %169 {strides = array<i32>} : memref<1x8x32xf32, #tpu.memory_space<vmem>>, vector<1x8x32xf32>,
    return
  }
  func.func @transform_0(%arg0: i32) -> (i32, i32, i32) {
    %c0_i32 = arith.constant 0 : i32
    %c0_i32_0 = arith.constant 0 : i32
    %c0_i32_1 = arith.constant 0 : i32
    return %arg0, %c0_i32, %c0_i32_0 : i32, i32, i32
  }
  func.func @transform_1(%arg0: i32) -> (i32, i32) {
    %c0_i32 = arith.constant 0 : i32
    %c0_i32_0 = arith.constant 0 : i32
    %c0_i32_1 = arith.constant 0 : i32
    return %c0_i32, %c0_i32_0 : i32, i32
  }
  func.func @transform_2(%arg0: i32) -> (i32, i32) {
    %c0_i32 = arith.constant 0 : i32
    %c0_i32_0 = arith.constant 0 : i32
    %c0_i32_1 = arith.constant 0 : i32
    return %c0_i32, %c0_i32_0 : i32, i32
  }
  func.func @transform_3(%arg0: i32) -> (i32, i32) {
    %c0_i32 = arith.constant 0 : i32
    %c0_i32_0 = arith.constant 0 : i32
    %c0_i32_1 = arith.constant 0 : i32
    return %c0_i32, %c0_i32_0 : i32, i32
  }
  func.func @transform_4(%arg0: i32) -> (i32, i32) {
    %c0_i32 = arith.constant 0 : i32
    %c0_i32_0 = arith.constant 0 : i32
    %c0_i32_1 = arith.constant 0 : i32
    return %c0_i32, %c0_i32_0 : i32, i32
  }
  func.func @transform_5(%arg0: i32) -> (i32, i32) {
    %c0_i32 = arith.constant 0 : i32
    %c0_i32_0 = arith.constant 0 : i32
    %c0_i32_1 = arith.constant 0 : i32
    return %c0_i32, %c0_i32_0 : i32, i32
  }
  func.func @transform_6(%arg0: i32) -> (i32, i32) {
    %c0_i32 = arith.constant 0 : i32
    %c0_i32_0 = arith.constant 0 : i32
    %c0_i32_1 = arith.constant 0 : i32
    return %c0_i32, %c0_i32_0 : i32, i32
  }
  func.func @transform_7(%arg0: i32) -> (i32, i32) {
    %c0_i32 = arith.constant 0 : i32
    %c0_i32_0 = arith.constant 0 : i32
    %c0_i32_1 = arith.constant 0 : i32
    return %c0_i32, %c0_i32_0 : i32, i32
  }
  func.func @transform_8(%arg0: i32) -> (i32, i32) {
    %c0_i32 = arith.constant 0 : i32
    %c0_i32_0 = arith.constant 0 : i32
    %c0_i32_1 = arith.constant 0 : i32
    return %c0_i32, %c0_i32_0 : i32, i32
  }
  func.func @transform_9(%arg0: i32) -> (i32, i32) {
    %c0_i32 = arith.constant 0 : i32
    %c0_i32_0 = arith.constant 0 : i32
    %c0_i32_1 = arith.constant 0 : i32
    return %c0_i32, %c0_i32_0 : i32, i32
  }
  func.func @transform_10(%arg0: i32) -> (i32, i32) {
    %c0_i32 = arith.constant 0 : i32
    %c0_i32_0 = arith.constant 0 : i32
    %c0_i32_1 = arith.constant 0 : i32
    return %c0_i32, %c0_i32_0 : i32, i32
  }
  func.func @transform_11(%arg0: i32) -> (i32, i32) {
    %c0_i32 = arith.constant 0 : i32
    %c0_i32_0 = arith.constant 0 : i32
    %c0_i32_1 = arith.constant 0 : i32
    return %c0_i32, %c0_i32_0 : i32, i32
  }
  func.func @transform_12(%arg0: i32) -> (i32, i32) {
    %c0_i32 = arith.constant 0 : i32
    %c0_i32_0 = arith.constant 0 : i32
    %c0_i32_1 = arith.constant 0 : i32
    return %c0_i32, %c0_i32_0 : i32, i32
  }
  func.func @transform_13(%arg0: i32) -> (i32, i32) {
    %c0_i32 = arith.constant 0 : i32
    %c0_i32_0 = arith.constant 0 : i32
    %c0_i32_1 = arith.constant 0 : i32
    return %c0_i32, %c0_i32_0 : i32, i32
  }
  func.func @transform_14(%arg0: i32) -> (i32, i32) {
    %c0_i32 = arith.constant 0 : i32
    %c0_i32_0 = arith.constant 0 : i32
    %c0_i32_1 = arith.constant 0 : i32
    return %c0_i32, %c0_i32_0 : i32, i32
  }
  func.func @transform_15(%arg0: i32) -> (i32, i32) {
    %c0_i32 = arith.constant 0 : i32
    %c0_i32_0 = arith.constant 0 : i32
    %c0_i32_1 = arith.constant 0 : i32
    return %c0_i32, %c0_i32_0 : i32, i32
  }
  func.func @transform_16(%arg0: i32) -> (i32, i32) {
    %c0_i32 = arith.constant 0 : i32
    %c0_i32_0 = arith.constant 0 : i32
    %c0_i32_1 = arith.constant 0 : i32
    return %c0_i32, %c0_i32_0 : i32, i32
  }
  func.func @transform_17(%arg0: i32) -> (i32, i32) {
    %c0_i32 = arith.constant 0 : i32
    %c0_i32_0 = arith.constant 0 : i32
    %c0_i32_1 = arith.constant 0 : i32
    return %c0_i32, %c0_i32_0 : i32, i32
  }
  func.func @transform_18(%arg0: i32) -> (i32, i32, i32) {
    %c0_i32 = arith.constant 0 : i32
    %c0_i32_0 = arith.constant 0 : i32
    %c0_i32_1 = arith.constant 0 : i32
    return %arg0, %c0_i32, %c0_i32_0 : i32, i32, i32
  }
}

module attributes {stable_mosaic.version = 11 : i64} {
  func.func @block_kernel(%arg0: i32, %arg1: memref<1x8x32xf32, #tpu.memory_space<vmem>>, %arg2: memref<1x32xf32, #tpu.memory_space<vmem>>, %arg3: memref<1x32xf32, #tpu.memory_space<vmem>>, %arg4: memref<32x32xbf16, #tpu.memory_space<vmem>>, %arg5: memref<32x32xbf16, #tpu.memory_space<vmem>>, %arg6: memref<32x32xbf16, #tpu.memory_space<vmem>>, %arg7: memref<1x8xf32, #tpu.memory_space<vmem>>, %arg8: memref<1x8xf32, #tpu.memory_space<vmem>>, %arg9: memref<1x8xf32, #tpu.memory_space<vmem>>, %arg10: memref<1x8xf32, #tpu.memory_space<vmem>>, %arg11: memref<32x32xbf16, #tpu.memory_space<vmem>>, %arg12: memref<1x32xf32, #tpu.memory_space<vmem>>, %arg13: memref<1x32xf32, #tpu.memory_space<vmem>>, %arg14: memref<1x32xf32, #tpu.memory_space<vmem>>, %arg15: memref<32x128xbf16, #tpu.memory_space<vmem>>, %arg16: memref<1x128xf32, #tpu.memory_space<vmem>>, %arg17: memref<128x32xbf16, #tpu.memory_space<vmem>>, %arg18: memref<1x32xf32, #tpu.memory_space<vmem>>, %arg19: memref<1x8x32xf32, #tpu.memory_space<vmem>>) attributes {dimension_semantics = [#tpu.dimension_semantics<parallel>], iteration_bounds = array<i64: 2>, scalar_prefetch = 0 : i64, scratch_operands = 0 : i64, tpu.core_type = #tpu.core_type<tc>, window_params = [{transform_indices = @transform_0, window_bounds = array<i64: 1, 8, 32>}, {pipeline_mode = #tpu.pipeline_mode<synchronous>, transform_indices = @transform_1, window_bounds = array<i64: 1, 32>}, {pipeline_mode = #tpu.pipeline_mode<synchronous>, transform_indices = @transform_2, window_bounds = array<i64: 1, 32>}, {pipeline_mode = #tpu.pipeline_mode<synchronous>, transform_indices = @transform_3, window_bounds = array<i64: 32, 32>}, {pipeline_mode = #tpu.pipeline_mode<synchronous>, transform_indices = @transform_4, window_bounds = array<i64: 32, 32>}, {pipeline_mode = #tpu.pipeline_mode<synchronous>, transform_indices = @transform_5, window_bounds = array<i64: 32, 32>}, {pipeline_mode = #tpu.pipeline_mode<synchronous>, transform_indices = @transform_6, window_bounds = array<i64: 1, 8>}, {pipeline_mode = #tpu.pipeline_mode<synchronous>, transform_indices = @transform_7, window_bounds = array<i64: 1, 8>}, {pipeline_mode = #tpu.pipeline_mode<synchronous>, transform_indices = @transform_8, window_bounds = array<i64: 1, 8>}, {pipeline_mode = #tpu.pipeline_mode<synchronous>, transform_indices = @transform_9, window_bounds = array<i64: 1, 8>}, {pipeline_mode = #tpu.pipeline_mode<synchronous>, transform_indices = @transform_10, window_bounds = array<i64: 32, 32>}, {pipeline_mode = #tpu.pipeline_mode<synchronous>, transform_indices = @transform_11, window_bounds = array<i64: 1, 32>}, {pipeline_mode = #tpu.pipeline_mode<synchronous>, transform_indices = @transform_12, window_bounds = array<i64: 1, 32>}, {pipeline_mode = #tpu.pipeline_mode<synchronous>, transform_indices = @transform_13, window_bounds = array<i64: 1, 32>}, {pipeline_mode = #tpu.pipeline_mode<synchronous>, transform_indices = @transform_14, window_bounds = array<i64: 32, 128>}, {pipeline_mode = #tpu.pipeline_mode<synchronous>, transform_indices = @transform_15, window_bounds = array<i64: 1, 128>}, {pipeline_mode = #tpu.pipeline_mode<synchronous>, transform_indices = @transform_16, window_bounds = array<i64: 128, 32>}, {pipeline_mode = #tpu.pipeline_mode<synchronous>, transform_indices = @transform_17, window_bounds = array<i64: 1, 32>}, {transform_indices = @transform_18, window_bounds = array<i64: 1, 8, 32>}]} {
    %c0 = arith.constant 0 : index
    %c0_0 = arith.constant 0 : index
    %c0_1 = arith.constant 0 : index
    %0 = vector.load %arg1[%c0, %c0_0, %c0_1] : memref<1x8x32xf32, #tpu.memory_space<vmem>>, vector<1x8x32xf32>
    %1 = vector.shape_cast %0 : vector<1x8x32xf32> to vector<8x32xf32>
    %c0_2 = arith.constant 0 : index
    %c0_3 = arith.constant 0 : index
    %2 = vector.load %arg2[%c0_2, %c0_3] : memref<1x32xf32, #tpu.memory_space<vmem>>, vector<1x32xf32>
    %c0_4 = arith.constant 0 : index
    %c0_5 = arith.constant 0 : index
    %3 = vector.load %arg3[%c0_4, %c0_5] : memref<1x32xf32, #tpu.memory_space<vmem>>, vector<1x32xf32>
    %cst = arith.constant dense<0.000000e+00> : vector<8xf32>
    %4 = vector.multi_reduction <add>, %1, %cst [1] : vector<8x32xf32> to vector<8xf32>
    %5 = vector.shape_cast %4 : vector<8xf32> to vector<8x1xf32>
    %cst_6 = arith.constant 3.200000e+01 : f32
    %6 = vector.broadcast %cst_6 : f32 to vector<8x1xf32>
    %7 = arith.divf %5, %6 : vector<8x1xf32>
    %8 = vector.broadcast %7 : vector<8x1xf32> to vector<8x32xf32>
    %9 = arith.subf %1, %8 : vector<8x32xf32>
    %10 = arith.mulf %9, %9 : vector<8x32xf32>
    %cst_7 = arith.constant dense<0.000000e+00> : vector<8xf32>
    %11 = vector.multi_reduction <add>, %10, %cst_7 [1] : vector<8x32xf32> to vector<8xf32>
    %12 = vector.shape_cast %11 : vector<8xf32> to vector<8x1xf32>
    %cst_8 = arith.constant 3.200000e+01 : f32
    %13 = vector.broadcast %cst_8 : f32 to vector<8x1xf32>
    %14 = arith.divf %12, %13 : vector<8x1xf32>
    %15 = vector.broadcast %7 : vector<8x1xf32> to vector<8x32xf32>
    %16 = arith.subf %1, %15 : vector<8x32xf32>
    %cst_9 = arith.constant 9.99999974E-6 : f32
    %17 = vector.broadcast %cst_9 : f32 to vector<8x1xf32>
    %18 = arith.addf %14, %17 : vector<8x1xf32>
    %19 = math.rsqrt %18 : vector<8x1xf32>
    %20 = vector.broadcast %19 : vector<8x1xf32> to vector<8x32xf32>
    %21 = arith.mulf %16, %20 : vector<8x32xf32>
    %22 = vector.broadcast %2 : vector<1x32xf32> to vector<8x32xf32>
    %23 = arith.mulf %21, %22 : vector<8x32xf32>
    %24 = vector.broadcast %3 : vector<1x32xf32> to vector<8x32xf32>
    %25 = arith.addf %23, %24 : vector<8x32xf32>
    %26 = arith.truncf %25 : vector<8x32xf32> to vector<8x32xbf16>
    %c0_10 = arith.constant 0 : index
    %c0_11 = arith.constant 0 : index
    %27 = vector.load %arg4[%c0_10, %c0_11] : memref<32x32xbf16, #tpu.memory_space<vmem>>, vector<32x32xbf16>
    %cst_12 = arith.constant dense<0.000000e+00> : vector<8x32xf32>
    %28 = tpu.matmul %26, %27, %cst_12 {dimension_numbers = #tpu.dot_dimension_numbers<[1], [0], [0], [1], [0, 0, 1, 1], [], []>} : vector<8x32xbf16>, vector<32x32xbf16>, vector<8x32xf32> -> vector<8x32xf32>
    %c0_13 = arith.constant 0 : index
    %c0_14 = arith.constant 0 : index
    %29 = vector.load %arg5[%c0_13, %c0_14] : memref<32x32xbf16, #tpu.memory_space<vmem>>, vector<32x32xbf16>
    %cst_15 = arith.constant dense<0.000000e+00> : vector<8x32xf32>
    %30 = tpu.matmul %26, %29, %cst_15 {dimension_numbers = #tpu.dot_dimension_numbers<[1], [0], [0], [1], [0, 0, 1, 1], [], []>} : vector<8x32xbf16>, vector<32x32xbf16>, vector<8x32xf32> -> vector<8x32xf32>
    %c0_16 = arith.constant 0 : index
    %c0_17 = arith.constant 0 : index
    %31 = vector.load %arg6[%c0_16, %c0_17] : memref<32x32xbf16, #tpu.memory_space<vmem>>, vector<32x32xbf16>
    %cst_18 = arith.constant dense<0.000000e+00> : vector<8x32xf32>
    %32 = tpu.matmul %26, %31, %cst_18 {dimension_numbers = #tpu.dot_dimension_numbers<[1], [0], [0], [1], [0, 0, 1, 1], [], []>} : vector<8x32xbf16>, vector<32x32xbf16>, vector<8x32xf32> -> vector<8x32xf32>
    %33 = vector.shape_cast %28 : vector<8x32xf32> to vector<1x8x4x8xf32>
    %c0_19 = arith.constant 0 : index
    %c0_20 = arith.constant 0 : index
    %34 = vector.load %arg7[%c0_19, %c0_20] : memref<1x8xf32, #tpu.memory_space<vmem>>, vector<1x8xf32>
    %c0_21 = arith.constant 0 : index
    %c0_22 = arith.constant 0 : index
    %35 = vector.load %arg8[%c0_21, %c0_22] : memref<1x8xf32, #tpu.memory_space<vmem>>, vector<1x8xf32>
    %cst_23 = arith.constant dense<0.000000e+00> : vector<1x8x4xf32>
    %36 = vector.multi_reduction <add>, %33, %cst_23 [3] : vector<1x8x4x8xf32> to vector<1x8x4xf32>
    %37 = vector.shape_cast %36 : vector<1x8x4xf32> to vector<1x8x4x1xf32>
    %cst_24 = arith.constant 8.000000e+00 : f32
    %38 = vector.broadcast %cst_24 : f32 to vector<1x8x4x1xf32>
    %39 = arith.divf %37, %38 : vector<1x8x4x1xf32>
    %40 = vector.broadcast %39 : vector<1x8x4x1xf32> to vector<1x8x4x8xf32>
    %41 = arith.subf %33, %40 : vector<1x8x4x8xf32>
    %42 = arith.mulf %41, %41 : vector<1x8x4x8xf32>
    %cst_25 = arith.constant dense<0.000000e+00> : vector<1x8x4xf32>
    %43 = vector.multi_reduction <add>, %42, %cst_25 [3] : vector<1x8x4x8xf32> to vector<1x8x4xf32>
    %44 = vector.shape_cast %43 : vector<1x8x4xf32> to vector<1x8x4x1xf32>
    %cst_26 = arith.constant 8.000000e+00 : f32
    %45 = vector.broadcast %cst_26 : f32 to vector<1x8x4x1xf32>
    %46 = arith.divf %44, %45 : vector<1x8x4x1xf32>
    %47 = vector.broadcast %39 : vector<1x8x4x1xf32> to vector<1x8x4x8xf32>
    %48 = arith.subf %33, %47 : vector<1x8x4x8xf32>
    %cst_27 = arith.constant 9.99999974E-6 : f32
    %49 = vector.broadcast %cst_27 : f32 to vector<1x8x4x1xf32>
    %50 = arith.addf %46, %49 : vector<1x8x4x1xf32>
    %51 = math.rsqrt %50 : vector<1x8x4x1xf32>
    %52 = vector.broadcast %51 : vector<1x8x4x1xf32> to vector<1x8x4x8xf32>
    %53 = arith.mulf %48, %52 : vector<1x8x4x8xf32>
    %54 = vector.shape_cast %34 : vector<1x8xf32> to vector<1x1x1x8xf32>
    %55 = vector.broadcast %54 : vector<1x1x1x8xf32> to vector<1x8x4x8xf32>
    %56 = arith.mulf %53, %55 : vector<1x8x4x8xf32>
    %57 = vector.shape_cast %35 : vector<1x8xf32> to vector<1x1x1x8xf32>
    %58 = vector.broadcast %57 : vector<1x1x1x8xf32> to vector<1x8x4x8xf32>
    %59 = arith.addf %56, %58 : vector<1x8x4x8xf32>
    %60 = vector.shape_cast %30 : vector<8x32xf32> to vector<1x8x4x8xf32>
    %c0_28 = arith.constant 0 : index
    %c0_29 = arith.constant 0 : index
    %61 = vector.load %arg9[%c0_28, %c0_29] : memref<1x8xf32, #tpu.memory_space<vmem>>, vector<1x8xf32>
    %c0_30 = arith.constant 0 : index
    %c0_31 = arith.constant 0 : index
    %62 = vector.load %arg10[%c0_30, %c0_31] : memref<1x8xf32, #tpu.memory_space<vmem>>, vector<1x8xf32>
    %cst_32 = arith.constant dense<0.000000e+00> : vector<1x8x4xf32>
    %63 = vector.multi_reduction <add>, %60, %cst_32 [3] : vector<1x8x4x8xf32> to vector<1x8x4xf32>
    %64 = vector.shape_cast %63 : vector<1x8x4xf32> to vector<1x8x4x1xf32>
    %cst_33 = arith.constant 8.000000e+00 : f32
    %65 = vector.broadcast %cst_33 : f32 to vector<1x8x4x1xf32>
    %66 = arith.divf %64, %65 : vector<1x8x4x1xf32>
    %67 = vector.broadcast %66 : vector<1x8x4x1xf32> to vector<1x8x4x8xf32>
    %68 = arith.subf %60, %67 : vector<1x8x4x8xf32>
    %69 = arith.mulf %68, %68 : vector<1x8x4x8xf32>
    %cst_34 = arith.constant dense<0.000000e+00> : vector<1x8x4xf32>
    %70 = vector.multi_reduction <add>, %69, %cst_34 [3] : vector<1x8x4x8xf32> to vector<1x8x4xf32>
    %71 = vector.shape_cast %70 : vector<1x8x4xf32> to vector<1x8x4x1xf32>
    %cst_35 = arith.constant 8.000000e+00 : f32
    %72 = vector.broadcast %cst_35 : f32 to vector<1x8x4x1xf32>
    %73 = arith.divf %71, %72 : vector<1x8x4x1xf32>
    %74 = vector.broadcast %66 : vector<1x8x4x1xf32> to vector<1x8x4x8xf32>
    %75 = arith.subf %60, %74 : vector<1x8x4x8xf32>
    %cst_36 = arith.constant 9.99999974E-6 : f32
    %76 = vector.broadcast %cst_36 : f32 to vector<1x8x4x1xf32>
    %77 = arith.addf %73, %76 : vector<1x8x4x1xf32>
    %78 = math.rsqrt %77 : vector<1x8x4x1xf32>
    %79 = vector.broadcast %78 : vector<1x8x4x1xf32> to vector<1x8x4x8xf32>
    %80 = arith.mulf %75, %79 : vector<1x8x4x8xf32>
    %81 = vector.shape_cast %61 : vector<1x8xf32> to vector<1x1x1x8xf32>
    %82 = vector.broadcast %81 : vector<1x1x1x8xf32> to vector<1x8x4x8xf32>
    %83 = arith.mulf %80, %82 : vector<1x8x4x8xf32>
    %84 = vector.shape_cast %62 : vector<1x8xf32> to vector<1x1x1x8xf32>
    %85 = vector.broadcast %84 : vector<1x1x1x8xf32> to vector<1x8x4x8xf32>
    %86 = arith.addf %83, %85 : vector<1x8x4x8xf32>
    %87 = vector.shape_cast %32 : vector<8x32xf32> to vector<1x8x4x8xf32>
    %88 = vector.shape_cast %59 : vector<1x8x4x8xf32> to vector<8x4x8xf32>
    %89 = tpu.transpose %88, [1, 0, 2] : vector<8x4x8xf32> -> vector<4x8x8xf32>
    %90 = arith.truncf %89 : vector<4x8x8xf32> to vector<4x8x8xbf16>
    %91 = vector.shape_cast %86 : vector<1x8x4x8xf32> to vector<8x4x8xf32>
    %92 = tpu.transpose %91, [1, 0, 2] : vector<8x4x8xf32> -> vector<4x8x8xf32>
    %93 = arith.truncf %92 : vector<4x8x8xf32> to vector<4x8x8xbf16>
    %94 = vector.shape_cast %87 : vector<1x8x4x8xf32> to vector<8x4x8xf32>
    %95 = tpu.transpose %94, [1, 0, 2] : vector<8x4x8xf32> -> vector<4x8x8xf32>
    %96 = arith.truncf %95 : vector<4x8x8xf32> to vector<4x8x8xbf16>
    "tpu.trace_start"() <{level = 10 : i32, message = "hld,hmd->hlm"}> : () -> ()
    %cst_37 = arith.constant dense<0.000000e+00> : vector<4x8x8xf32>
    %97 = tpu.matmul %90, %93, %cst_37 {dimension_numbers = #tpu.dot_dimension_numbers<[2], [2], [1], [1], [0, 0, 0, 1, 1, 1], [0], [0]>} : vector<4x8x8xbf16>, vector<4x8x8xbf16>, vector<4x8x8xf32> -> vector<4x8x8xf32>
    "tpu.trace_stop"() : () -> ()
    %cst_38 = arith.constant dense<0xFF800000> : vector<4x8xf32>
    %98 = vector.multi_reduction <maximumf>, %97, %cst_38 [2] : vector<4x8x8xf32> to vector<4x8xf32>
    %99 = vector.shape_cast %98 : vector<4x8xf32> to vector<4x8x1xf32>
    %100 = vector.broadcast %99 : vector<4x8x1xf32> to vector<4x8x8xf32>
    %101 = arith.subf %97, %100 : vector<4x8x8xf32>
    %102 = math.exp %101 : vector<4x8x8xf32>
    %cst_39 = arith.constant dense<0.000000e+00> : vector<4x8xf32>
    %103 = vector.multi_reduction <add>, %102, %cst_39 [2] : vector<4x8x8xf32> to vector<4x8xf32>
    %104 = vector.shape_cast %103 : vector<4x8xf32> to vector<4x8x1xf32>
    %105 = tpu.reciprocal %104 {approx = true} : vector<4x8x1xf32> -> vector<4x8x1xf32>
    %106 = vector.broadcast %105 : vector<4x8x1xf32> to vector<4x8x8xf32>
    %107 = arith.mulf %102, %106 : vector<4x8x8xf32>
    %108 = arith.truncf %107 : vector<4x8x8xf32> to vector<4x8x8xbf16>
    "tpu.trace_start"() <{level = 10 : i32, message = "hlm,hmd->hld"}> : () -> ()
    %cst_40 = arith.constant dense<0.000000e+00> : vector<4x8x8xf32>
    %109 = tpu.matmul %108, %96, %cst_40 {dimension_numbers = #tpu.dot_dimension_numbers<[2], [1], [1], [2], [0, 0, 0, 1, 1, 2], [0], [0]>} : vector<4x8x8xbf16>, vector<4x8x8xbf16>, vector<4x8x8xf32> -> vector<4x8x8xf32>
    "tpu.trace_stop"() : () -> ()
    %110 = tpu.transpose %109, [1, 0, 2] : vector<4x8x8xf32> -> vector<8x4x8xf32>
    %111 = vector.shape_cast %110 : vector<8x4x8xf32> to vector<8x32xf32>
    %112 = arith.truncf %111 : vector<8x32xf32> to vector<8x32xbf16>
    %c0_41 = arith.constant 0 : index
    %c0_42 = arith.constant 0 : index
    %113 = vector.load %arg11[%c0_41, %c0_42] : memref<32x32xbf16, #tpu.memory_space<vmem>>, vector<32x32xbf16>
    %cst_43 = arith.constant dense<0.000000e+00> : vector<8x32xf32>
    %114 = tpu.matmul %112, %113, %cst_43 {dimension_numbers = #tpu.dot_dimension_numbers<[1], [0], [0], [1], [0, 0, 1, 1], [], []>} : vector<8x32xbf16>, vector<32x32xbf16>, vector<8x32xf32> -> vector<8x32xf32>
    %c0_44 = arith.constant 0 : index
    %c0_45 = arith.constant 0 : index
    %115 = vector.load %arg12[%c0_44, %c0_45] : memref<1x32xf32, #tpu.memory_space<vmem>>, vector<1x32xf32>
    %116 = vector.broadcast %115 : vector<1x32xf32> to vector<8x32xf32>
    %117 = arith.addf %114, %116 : vector<8x32xf32>
    %118 = arith.addf %1, %117 : vector<8x32xf32>
    %c0_46 = arith.constant 0 : index
    %c0_47 = arith.constant 0 : index
    %119 = vector.load %arg13[%c0_46, %c0_47] : memref<1x32xf32, #tpu.memory_space<vmem>>, vector<1x32xf32>
    %c0_48 = arith.constant 0 : index
    %c0_49 = arith.constant 0 : index
    %120 = vector.load %arg14[%c0_48, %c0_49] : memref<1x32xf32, #tpu.memory_space<vmem>>, vector<1x32xf32>
    %cst_50 = arith.constant dense<0.000000e+00> : vector<8xf32>
    %121 = vector.multi_reduction <add>, %118, %cst_50 [1] : vector<8x32xf32> to vector<8xf32>
    %122 = vector.shape_cast %121 : vector<8xf32> to vector<8x1xf32>
    %cst_51 = arith.constant 3.200000e+01 : f32
    %123 = vector.broadcast %cst_51 : f32 to vector<8x1xf32>
    %124 = arith.divf %122, %123 : vector<8x1xf32>
    %125 = vector.broadcast %124 : vector<8x1xf32> to vector<8x32xf32>
    %126 = arith.subf %118, %125 : vector<8x32xf32>
    %127 = arith.mulf %126, %126 : vector<8x32xf32>
    %cst_52 = arith.constant dense<0.000000e+00> : vector<8xf32>
    %128 = vector.multi_reduction <add>, %127, %cst_52 [1] : vector<8x32xf32> to vector<8xf32>
    %129 = vector.shape_cast %128 : vector<8xf32> to vector<8x1xf32>
    %cst_53 = arith.constant 3.200000e+01 : f32
    %130 = vector.broadcast %cst_53 : f32 to vector<8x1xf32>
    %131 = arith.divf %129, %130 : vector<8x1xf32>
    %132 = vector.broadcast %124 : vector<8x1xf32> to vector<8x32xf32>
    %133 = arith.subf %118, %132 : vector<8x32xf32>
    %cst_54 = arith.constant 9.99999974E-6 : f32
    %134 = vector.broadcast %cst_54 : f32 to vector<8x1xf32>
    %135 = arith.addf %131, %134 : vector<8x1xf32>
    %136 = math.rsqrt %135 : vector<8x1xf32>
    %137 = vector.broadcast %136 : vector<8x1xf32> to vector<8x32xf32>
    %138 = arith.mulf %133, %137 : vector<8x32xf32>
    %139 = vector.broadcast %119 : vector<1x32xf32> to vector<8x32xf32>
    %140 = arith.mulf %138, %139 : vector<8x32xf32>
    %141 = vector.broadcast %120 : vector<1x32xf32> to vector<8x32xf32>
    %142 = arith.addf %140, %141 : vector<8x32xf32>
    %143 = arith.truncf %142 : vector<8x32xf32> to vector<8x32xbf16>
    %c0_55 = arith.constant 0 : index
    %c0_56 = arith.constant 0 : index
    %144 = vector.load %arg15[%c0_55, %c0_56] : memref<32x128xbf16, #tpu.memory_space<vmem>>, vector<32x128xbf16>
    %cst_57 = arith.constant dense<0.000000e+00> : vector<8x128xf32>
    %145 = tpu.matmul %143, %144, %cst_57 {dimension_numbers = #tpu.dot_dimension_numbers<[1], [0], [0], [1], [0, 0, 1, 1], [], []>} : vector<8x32xbf16>, vector<32x128xbf16>, vector<8x128xf32> -> vector<8x128xf32>
    %c0_58 = arith.constant 0 : index
    %c0_59 = arith.constant 0 : index
    %146 = vector.load %arg16[%c0_58, %c0_59] : memref<1x128xf32, #tpu.memory_space<vmem>>, vector<1x128xf32>
    %147 = vector.broadcast %146 : vector<1x128xf32> to vector<8x128xf32>
    %148 = arith.addf %145, %147 : vector<8x128xf32>
    %cst_60 = arith.constant 5.000000e-01 : f32
    %149 = vector.broadcast %cst_60 : f32 to vector<8x128xf32>
    %150 = arith.mulf %149, %148 : vector<8x128xf32>
    %cst_61 = arith.constant 4.471500e-02 : f32
    %151 = vector.broadcast %cst_61 : f32 to vector<8x128xf32>
    %152 = arith.mulf %151, %148 : vector<8x128xf32>
    %153 = arith.mulf %152, %148 : vector<8x128xf32>
    %154 = arith.mulf %153, %148 : vector<8x128xf32>
    %155 = arith.addf %148, %154 : vector<8x128xf32>
    %cst_62 = arith.constant 0.797884583 : f32
    %156 = vector.broadcast %cst_62 : f32 to vector<8x128xf32>
    %157 = arith.mulf %156, %155 : vector<8x128xf32>
    %158 = math.tanh %157 : vector<8x128xf32>
    %cst_63 = arith.constant 1.000000e+00 : f32
    %159 = vector.broadcast %cst_63 : f32 to vector<8x128xf32>
    %160 = arith.addf %159, %158 : vector<8x128xf32>
    %161 = arith.mulf %150, %160 : vector<8x128xf32>
    %162 = arith.truncf %161 : vector<8x128xf32> to vector<8x128xbf16>
    %c0_64 = arith.constant 0 : index
    %c0_65 = arith.constant 0 : index
    %163 = vector.load %arg17[%c0_64, %c0_65] : memref<128x32xbf16, #tpu.memory_space<vmem>>, vector<128x32xbf16>
    %cst_66 = arith.constant dense<0.000000e+00> : vector<8x32xf32>
    %164 = tpu.matmul %162, %163, %cst_66 {dimension_numbers = #tpu.dot_dimension_numbers<[1], [0], [0], [1], [0, 0, 1, 1], [], []>} : vector<8x128xbf16>, vector<128x32xbf16>, vector<8x32xf32> -> vector<8x32xf32>
    %c0_67 = arith.constant 0 : index
    %c0_68 = arith.constant 0 : index
    %165 = vector.load %arg18[%c0_67, %c0_68] : memref<1x32xf32, #tpu.memory_space<vmem>>, vector<1x32xf32>
    %166 = vector.broadcast %165 : vector<1x32xf32> to vector<8x32xf32>
    %167 = arith.addf %164, %166 : vector<8x32xf32>
    %168 = arith.addf %118, %167 : vector<8x32xf32>
    %169 = vector.shape_cast %168 : vector<8x32xf32> to vector<1x8x32xf32>
    %c0_69 = arith.constant 0 : index
    %c0_70 = arith.constant 0 : index
    %c0_71 = arith.constant 0 : index
    %170 = vector.load %arg19[%c0_69, %c0_70, %c0_71] : memref<1x8x32xf32, #tpu.memory_space<vmem>>, vector<1x8x32xf32>
    tpu.vector_store %arg19[%c0_69, %c0_70, %c0_71], %169 {strides = array<i32>} : memref<1x8x32xf32, #tpu.memory_space<vmem>>, vector<1x8x32xf32>,
    return
  }
  func.func @transform_0(%arg0: i32) -> (i32, i32, i32) {
    %c0_i32 = arith.constant 0 : i32
    %c0_i32_0 = arith.constant 0 : i32
    %c0_i32_1 = arith.constant 0 : i32
    return %arg0, %c0_i32, %c0_i32_0 : i32, i32, i32
  }
  func.func @transform_1(%arg0: i32) -> (i32, i32) {
    %c0_i32 = arith.constant 0 : i32
    %c0_i32_0 = arith.constant 0 : i32
    %c0_i32_1 = arith.constant 0 : i32
    return %c0_i32, %c0_i32_0 : i32, i32
  }
  func.func @transform_2(%arg0: i32) -> (i32, i32) {
    %c0_i32 = arith.constant 0 : i32
    %c0_i32_0 = arith.constant 0 : i32
    %c0_i32_1 = arith.constant 0 : i32
    return %c0_i32, %c0_i32_0 : i32, i32
  }
  func.func @transform_3(%arg0: i32) -> (i32, i32) {
    %c0_i32 = arith.constant 0 : i32
    %c0_i32_0 = arith.constant 0 : i32
    %c0_i32_1 = arith.constant 0 : i32
    return %c0_i32, %c0_i32_0 : i32, i32
  }
  func.func @transform_4(%arg0: i32) -> (i32, i32) {
    %c0_i32 = arith.constant 0 : i32
    %c0_i32_0 = arith.constant 0 : i32
    %c0_i32_1 = arith.constant 0 : i32
    return %c0_i32, %c0_i32_0 : i32, i32
  }
  func.func @transform_5(%arg0: i32) -> (i32, i32) {
    %c0_i32 = arith.constant 0 : i32
    %c0_i32_0 = arith.constant 0 : i32
    %c0_i32_1 = arith.constant 0 : i32
    return %c0_i32, %c0_i32_0 : i32, i32
  }
  func.func @transform_6(%arg0: i32) -> (i32, i32) {
    %c0_i32 = arith.constant 0 : i32
    %c0_i32_0 = arith.constant 0 : i32
    %c0_i32_1 = arith.constant 0 : i32
    return %c0_i32, %c0_i32_0 : i32, i32
  }
  func.func @transform_7(%arg0: i32) -> (i32, i32) {
    %c0_i32 = arith.constant 0 : i32
    %c0_i32_0 = arith.constant 0 : i32
    %c0_i32_1 = arith.constant 0 : i32
    return %c0_i32, %c0_i32_0 : i32, i32
  }
  func.func @transform_8(%arg0: i32) -> (i32, i32) {
    %c0_i32 = arith.constant 0 : i32
    %c0_i32_0 = arith.constant 0 : i32
    %c0_i32_1 = arith.constant 0 : i32
    return %c0_i32, %c0_i32_0 : i32, i32
  }
  func.func @transform_9(%arg0: i32) -> (i32, i32) {
    %c0_i32 = arith.constant 0 : i32
    %c0_i32_0 = arith.constant 0 : i32
    %c0_i32_1 = arith.constant 0 : i32
    return %c0_i32, %c0_i32_0 : i32, i32
  }
  func.func @transform_10(%arg0: i32) -> (i32, i32) {
    %c0_i32 = arith.constant 0 : i32
    %c0_i32_0 = arith.constant 0 : i32
    %c0_i32_1 = arith.constant 0 : i32
    return %c0_i32, %c0_i32_0 : i32, i32
  }
  func.func @transform_11(%arg0: i32) -> (i32, i32) {
    %c0_i32 = arith.constant 0 : i32
    %c0_i32_0 = arith.constant 0 : i32
    %c0_i32_1 = arith.constant 0 : i32
    return %c0_i32, %c0_i32_0 : i32, i32
  }
  func.func @transform_12(%arg0: i32) -> (i32, i32) {
    %c0_i32 = arith.constant 0 : i32
    %c0_i32_0 = arith.constant 0 : i32
    %c0_i32_1 = arith.constant 0 : i32
    return %c0_i32, %c0_i32_0 : i32, i32
  }
  func.func @transform_13(%arg0: i32) -> (i32, i32) {
    %c0_i32 = arith.constant 0 : i32
    %c0_i32_0 = arith.constant 0 : i32
    %c0_i32_1 = arith.constant 0 : i32
    return %c0_i32, %c0_i32_0 : i32, i32
  }
  func.func @transform_14(%arg0: i32) -> (i32, i32) {
    %c0_i32 = arith.constant 0 : i32
    %c0_i32_0 = arith.constant 0 : i32
    %c0_i32_1 = arith.constant 0 : i32
    return %c0_i32, %c0_i32_0 : i32, i32
  }
  func.func @transform_15(%arg0: i32) -> (i32, i32) {
    %c0_i32 = arith.constant 0 : i32
    %c0_i32_0 = arith.constant 0 : i32
    %c0_i32_1 = arith.constant 0 : i32
    return %c0_i32, %c0_i32_0 : i32, i32
  }
  func.func @transform_16(%arg0: i32) -> (i32, i32) {
    %c0_i32 = arith.constant 0 : i32
    %c0_i32_0 = arith.constant 0 : i32
    %c0_i32_1 = arith.constant 0 : i32
    return %c0_i32, %c0_i32_0 : i32, i32
  }
  func.func @transform_17(%arg0: i32) -> (i32, i32) {
    %c0_i32 = arith.constant 0 : i32
    %c0_i32_0 = arith.constant 0 : i32
    %c0_i32_1 = arith.constant 0 : i32
    return %c0_i32, %c0_i32_0 : i32, i32
  }
  func.func @transform_18(%arg0: i32) -> (i32, i32, i32) {
    %c0_i32 = arith.constant 0 : i32
    %c0_i32_0 = arith.constant 0 : i32
    %c0_i32_1 = arith.constant 0 : i32
    return %arg0, %c0_i32, %c0_i32_0 : i32, i32, i32
  }
}

module attributes {stable_mosaic.version = 11 : i64} {
  func.func @block_kernel(%arg0: i32, %arg1: memref<1x8x32xf32, #tpu.memory_space<vmem>>, %arg2: memref<1x32xf32, #tpu.memory_space<vmem>>, %arg3: memref<1x32xf32, #tpu.memory_space<vmem>>, %arg4: memref<32x32xbf16, #tpu.memory_space<vmem>>, %arg5: memref<32x32xbf16, #tpu.memory_space<vmem>>, %arg6: memref<32x32xbf16, #tpu.memory_space<vmem>>, %arg7: memref<1x8xf32, #tpu.memory_space<vmem>>, %arg8: memref<1x8xf32, #tpu.memory_space<vmem>>, %arg9: memref<1x8xf32, #tpu.memory_space<vmem>>, %arg10: memref<1x8xf32, #tpu.memory_space<vmem>>, %arg11: memref<32x32xbf16, #tpu.memory_space<vmem>>, %arg12: memref<1x32xf32, #tpu.memory_space<vmem>>, %arg13: memref<1x32xf32, #tpu.memory_space<vmem>>, %arg14: memref<1x32xf32, #tpu.memory_space<vmem>>, %arg15: memref<32x128xbf16, #tpu.memory_space<vmem>>, %arg16: memref<1x128xf32, #tpu.memory_space<vmem>>, %arg17: memref<128x32xbf16, #tpu.memory_space<vmem>>, %arg18: memref<1x32xf32, #tpu.memory_space<vmem>>, %arg19: memref<1x8x32xf32, #tpu.memory_space<vmem>>) attributes {dimension_semantics = [#tpu.dimension_semantics<parallel>], iteration_bounds = array<i64: 2>, scalar_prefetch = 0 : i64, scratch_operands = 0 : i64, tpu.core_type = #tpu.core_type<tc>, window_params = [{transform_indices = @transform_0, window_bounds = array<i64: 1, 8, 32>}, {pipeline_mode = #tpu.pipeline_mode<synchronous>, transform_indices = @transform_1, window_bounds = array<i64: 1, 32>}, {pipeline_mode = #tpu.pipeline_mode<synchronous>, transform_indices = @transform_2, window_bounds = array<i64: 1, 32>}, {pipeline_mode = #tpu.pipeline_mode<synchronous>, transform_indices = @transform_3, window_bounds = array<i64: 32, 32>}, {pipeline_mode = #tpu.pipeline_mode<synchronous>, transform_indices = @transform_4, window_bounds = array<i64: 32, 32>}, {pipeline_mode = #tpu.pipeline_mode<synchronous>, transform_indices = @transform_5, window_bounds = array<i64: 32, 32>}, {pipeline_mode = #tpu.pipeline_mode<synchronous>, transform_indices = @transform_6, window_bounds = array<i64: 1, 8>}, {pipeline_mode = #tpu.pipeline_mode<synchronous>, transform_indices = @transform_7, window_bounds = array<i64: 1, 8>}, {pipeline_mode = #tpu.pipeline_mode<synchronous>, transform_indices = @transform_8, window_bounds = array<i64: 1, 8>}, {pipeline_mode = #tpu.pipeline_mode<synchronous>, transform_indices = @transform_9, window_bounds = array<i64: 1, 8>}, {pipeline_mode = #tpu.pipeline_mode<synchronous>, transform_indices = @transform_10, window_bounds = array<i64: 32, 32>}, {pipeline_mode = #tpu.pipeline_mode<synchronous>, transform_indices = @transform_11, window_bounds = array<i64: 1, 32>}, {pipeline_mode = #tpu.pipeline_mode<synchronous>, transform_indices = @transform_12, window_bounds = array<i64: 1, 32>}, {pipeline_mode = #tpu.pipeline_mode<synchronous>, transform_indices = @transform_13, window_bounds = array<i64: 1, 32>}, {pipeline_mode = #tpu.pipeline_mode<synchronous>, transform_indices = @transform_14, window_bounds = array<i64: 32, 128>}, {pipeline_mode = #tpu.pipeline_mode<synchronous>, transform_indices = @transform_15, window_bounds = array<i64: 1, 128>}, {pipeline_mode = #tpu.pipeline_mode<synchronous>, transform_indices = @transform_16, window_bounds = array<i64: 128, 32>}, {pipeline_mode = #tpu.pipeline_mode<synchronous>, transform_indices = @transform_17, window_bounds = array<i64: 1, 32>}, {transform_indices = @transform_18, window_bounds = array<i64: 1, 8, 32>}]} {
    %c0 = arith.constant 0 : index
    %c0_0 = arith.constant 0 : index
    %c0_1 = arith.constant 0 : index
    %0 = vector.load %arg1[%c0, %c0_0, %c0_1] : memref<1x8x32xf32, #tpu.memory_space<vmem>>, vector<1x8x32xf32>
    %1 = vector.shape_cast %0 : vector<1x8x32xf32> to vector<8x32xf32>
    %c0_2 = arith.constant 0 : index
    %c0_3 = arith.constant 0 : index
    %2 = vector.load %arg2[%c0_2, %c0_3] : memref<1x32xf32, #tpu.memory_space<vmem>>, vector<1x32xf32>
    %c0_4 = arith.constant 0 : index
    %c0_5 = arith.constant 0 : index
    %3 = vector.load %arg3[%c0_4, %c0_5] : memref<1x32xf32, #tpu.memory_space<vmem>>, vector<1x32xf32>
    %cst = arith.constant dense<0.000000e+00> : vector<8xf32>
    %4 = vector.multi_reduction <add>, %1, %cst [1] : vector<8x32xf32> to vector<8xf32>
    %5 = vector.shape_cast %4 : vector<8xf32> to vector<8x1xf32>
    %cst_6 = arith.constant 3.200000e+01 : f32
    %6 = vector.broadcast %cst_6 : f32 to vector<8x1xf32>
    %7 = arith.divf %5, %6 : vector<8x1xf32>
    %8 = vector.broadcast %7 : vector<8x1xf32> to vector<8x32xf32>
    %9 = arith.subf %1, %8 : vector<8x32xf32>
    %10 = arith.mulf %9, %9 : vector<8x32xf32>
    %cst_7 = arith.constant dense<0.000000e+00> : vector<8xf32>
    %11 = vector.multi_reduction <add>, %10, %cst_7 [1] : vector<8x32xf32> to vector<8xf32>
    %12 = vector.shape_cast %11 : vector<8xf32> to vector<8x1xf32>
    %cst_8 = arith.constant 3.200000e+01 : f32
    %13 = vector.broadcast %cst_8 : f32 to vector<8x1xf32>
    %14 = arith.divf %12, %13 : vector<8x1xf32>
    %15 = vector.broadcast %7 : vector<8x1xf32> to vector<8x32xf32>
    %16 = arith.subf %1, %15 : vector<8x32xf32>
    %cst_9 = arith.constant 9.99999974E-6 : f32
    %17 = vector.broadcast %cst_9 : f32 to vector<8x1xf32>
    %18 = arith.addf %14, %17 : vector<8x1xf32>
    %19 = math.rsqrt %18 : vector<8x1xf32>
    %20 = vector.broadcast %19 : vector<8x1xf32> to vector<8x32xf32>
    %21 = arith.mulf %16, %20 : vector<8x32xf32>
    %22 = vector.broadcast %2 : vector<1x32xf32> to vector<8x32xf32>
    %23 = arith.mulf %21, %22 : vector<8x32xf32>
    %24 = vector.broadcast %3 : vector<1x32xf32> to vector<8x32xf32>
    %25 = arith.addf %23, %24 : vector<8x32xf32>
    %26 = arith.truncf %25 : vector<8x32xf32> to vector<8x32xbf16>
    %c0_10 = arith.constant 0 : index
    %c0_11 = arith.constant 0 : index
    %27 = vector.load %arg4[%c0_10, %c0_11] : memref<32x32xbf16, #tpu.memory_space<vmem>>, vector<32x32xbf16>
    %cst_12 = arith.constant dense<0.000000e+00> : vector<8x32xf32>
    %28 = tpu.matmul %26, %27, %cst_12 {dimension_numbers = #tpu.dot_dimension_numbers<[1], [0], [0], [1], [0, 0, 1, 1], [], []>} : vector<8x32xbf16>, vector<32x32xbf16>, vector<8x32xf32> -> vector<8x32xf32>
    %c0_13 = arith.constant 0 : index
    %c0_14 = arith.constant 0 : index
    %29 = vector.load %arg5[%c0_13, %c0_14] : memref<32x32xbf16, #tpu.memory_space<vmem>>, vector<32x32xbf16>
    %cst_15 = arith.constant dense<0.000000e+00> : vector<8x32xf32>
    %30 = tpu.matmul %26, %29, %cst_15 {dimension_numbers = #tpu.dot_dimension_numbers<[1], [0], [0], [1], [0, 0, 1, 1], [], []>} : vector<8x32xbf16>, vector<32x32xbf16>, vector<8x32xf32> -> vector<8x32xf32>
    %c0_16 = arith.constant 0 : index
    %c0_17 = arith.constant 0 : index
    %31 = vector.load %arg6[%c0_16, %c0_17] : memref<32x32xbf16, #tpu.memory_space<vmem>>, vector<32x32xbf16>
    %cst_18 = arith.constant dense<0.000000e+00> : vector<8x32xf32>
    %32 = tpu.matmul %26, %31, %cst_18 {dimension_numbers = #tpu.dot_dimension_numbers<[1], [0], [0], [1], [0, 0, 1, 1], [], []>} : vector<8x32xbf16>, vector<32x32xbf16>, vector<8x32xf32> -> vector<8x32xf32>
    %33 = vector.extract_strided_slice %28 {offsets = [0, 0], sizes = [8, 8], strides = [1, 1]} : vector<8x32xf32> to vector<8x8xf32>
    %c0_19 = arith.constant 0 : index
    %c0_20 = arith.constant 0 : index
    %34 = vector.load %arg7[%c0_19, %c0_20] : memref<1x8xf32, #tpu.memory_space<vmem>>, vector<1x8xf32>
    %c0_21 = arith.constant 0 : index
    %c0_22 = arith.constant 0 : index
    %35 = vector.load %arg8[%c0_21, %c0_22] : memref<1x8xf32, #tpu.memory_space<vmem>>, vector<1x8xf32>
    %cst_23 = arith.constant dense<0.000000e+00> : vector<8xf32>
    %36 = vector.multi_reduction <add>, %33, %cst_23 [1] : vector<8x8xf32> to vector<8xf32>
    %37 = vector.shape_cast %36 : vector<8xf32> to vector<8x1xf32>
    %cst_24 = arith.constant 8.000000e+00 : f32
    %38 = vector.broadcast %cst_24 : f32 to vector<8x1xf32>
    %39 = arith.divf %37, %38 : vector<8x1xf32>
    %40 = vector.broadcast %39 : vector<8x1xf32> to vector<8x8xf32>
    %41 = arith.subf %33, %40 : vector<8x8xf32>
    %42 = arith.mulf %41, %41 : vector<8x8xf32>
    %cst_25 = arith.constant dense<0.000000e+00> : vector<8xf32>
    %43 = vector.multi_reduction <add>, %42, %cst_25 [1] : vector<8x8xf32> to vector<8xf32>
    %44 = vector.shape_cast %43 : vector<8xf32> to vector<8x1xf32>
    %cst_26 = arith.constant 8.000000e+00 : f32
    %45 = vector.broadcast %cst_26 : f32 to vector<8x1xf32>
    %46 = arith.divf %44, %45 : vector<8x1xf32>
    %47 = vector.broadcast %39 : vector<8x1xf32> to vector<8x8xf32>
    %48 = arith.subf %33, %47 : vector<8x8xf32>
    %cst_27 = arith.constant 9.99999974E-6 : f32
    %49 = vector.broadcast %cst_27 : f32 to vector<8x1xf32>
    %50 = arith.addf %46, %49 : vector<8x1xf32>
    %51 = math.rsqrt %50 : vector<8x1xf32>
    %52 = vector.broadcast %51 : vector<8x1xf32> to vector<8x8xf32>
    %53 = arith.mulf %48, %52 : vector<8x8xf32>
    %54 = vector.broadcast %34 : vector<1x8xf32> to vector<8x8xf32>
    %55 = arith.mulf %53, %54 : vector<8x8xf32>
    %56 = vector.broadcast %35 : vector<1x8xf32> to vector<8x8xf32>
    %57 = arith.addf %55, %56 : vector<8x8xf32>
    %58 = vector.extract_strided_slice %30 {offsets = [0, 0], sizes = [8, 8], strides = [1, 1]} : vector<8x32xf32> to vector<8x8xf32>
    %c0_28 = arith.constant 0 : index
    %c0_29 = arith.constant 0 : index
    %59 = vector.load %arg9[%c0_28, %c0_29] : memref<1x8xf32, #tpu.memory_space<vmem>>, vector<1x8xf32>
    %c0_30 = arith.constant 0 : index
    %c0_31 = arith.constant 0 : index
    %60 = vector.load %arg10[%c0_30, %c0_31] : memref<1x8xf32, #tpu.memory_space<vmem>>, vector<1x8xf32>
    %cst_32 = arith.constant dense<0.000000e+00> : vector<8xf32>
    %61 = vector.multi_reduction <add>, %58, %cst_32 [1] : vector<8x8xf32> to vector<8xf32>
    %62 = vector.shape_cast %61 : vector<8xf32> to vector<8x1xf32>
    %cst_33 = arith.constant 8.000000e+00 : f32
    %63 = vector.broadcast %cst_33 : f32 to vector<8x1xf32>
    %64 = arith.divf %62, %63 : vector<8x1xf32>
    %65 = vector.broadcast %64 : vector<8x1xf32> to vector<8x8xf32>
    %66 = arith.subf %58, %65 : vector<8x8xf32>
    %67 = arith.mulf %66, %66 : vector<8x8xf32>
    %cst_34 = arith.constant dense<0.000000e+00> : vector<8xf32>
    %68 = vector.multi_reduction <add>, %67, %cst_34 [1] : vector<8x8xf32> to vector<8xf32>
    %69 = vector.shape_cast %68 : vector<8xf32> to vector<8x1xf32>
    %cst_35 = arith.constant 8.000000e+00 : f32
    %70 = vector.broadcast %cst_35 : f32 to vector<8x1xf32>
    %71 = arith.divf %69, %70 : vector<8x1xf32>
    %72 = vector.broadcast %64 : vector<8x1xf32> to vector<8x8xf32>
    %73 = arith.subf %58, %72 : vector<8x8xf32>
    %cst_36 = arith.constant 9.99999974E-6 : f32
    %74 = vector.broadcast %cst_36 : f32 to vector<8x1xf32>
    %75 = arith.addf %71, %74 : vector<8x1xf32>
    %76 = math.rsqrt %75 : vector<8x1xf32>
    %77 = vector.broadcast %76 : vector<8x1xf32> to vector<8x8xf32>
    %78 = arith.mulf %73, %77 : vector<8x8xf32>
    %79 = vector.broadcast %59 : vector<1x8xf32> to vector<8x8xf32>
    %80 = arith.mulf %78, %79 : vector<8x8xf32>
    %81 = vector.broadcast %60 : vector<1x8xf32> to vector<8x8xf32>
    %82 = arith.addf %80, %81 : vector<8x8xf32>
    %83 = vector.extract_strided_slice %32 {offsets = [0, 0], sizes = [8, 8], strides = [1, 1]} : vector<8x32xf32> to vector<8x8xf32>
    %84 = arith.truncf %57 : vector<8x8xf32> to vector<8x8xbf16>
    %85 = arith.truncf %82 : vector<8x8xf32> to vector<8x8xbf16>
    %86 = tpu.transpose %85, [1, 0] : vector<8x8xbf16> -> vector<8x8xbf16>
    %cst_37 = arith.constant dense<0.000000e+00> : vector<8x8xf32>
    %87 = tpu.matmul %84, %86, %cst_37 {dimension_numbers = #tpu.dot_dimension_numbers<[1], [0], [0], [1], [0, 0, 1, 1], [], []>} : vector<8x8xbf16>, vector<8x8xbf16>, vector<8x8xf32> -> vector<8x8xf32>
    %cst_38 = arith.constant dense<0xFF800000> : vector<8xf32>
    %88 = vector.multi_reduction <maximumf>, %87, %cst_38 [1] : vector<8x8xf32> to vector<8xf32>
    %89 = vector.shape_cast %88 : vector<8xf32> to vector<8x1xf32>
    %90 = vector.broadcast %89 : vector<8x1xf32> to vector<8x8xf32>
    %91 = arith.subf %87, %90 : vector<8x8xf32>
    %92 = math.exp %91 : vector<8x8xf32>
    %cst_39 = arith.constant dense<0.000000e+00> : vector<8xf32>
    %93 = vector.multi_reduction <add>, %92, %cst_39 [1] : vector<8x8xf32> to vector<8xf32>
    %94 = vector.shape_cast %93 : vector<8xf32> to vector<8x1xf32>
    %95 = tpu.reciprocal %94 {approx = true} : vector<8x1xf32> -> vector<8x1xf32>
    %96 = vector.broadcast %95 : vector<8x1xf32> to vector<8x8xf32>
    %97 = arith.mulf %92, %96 : vector<8x8xf32>
    %98 = arith.truncf %97 : vector<8x8xf32> to vector<8x8xbf16>
    %99 = arith.truncf %83 : vector<8x8xf32> to vector<8x8xbf16>
    %cst_40 = arith.constant dense<0.000000e+00> : vector<8x8xf32>
    %100 = tpu.matmul %98, %99, %cst_40 {dimension_numbers = #tpu.dot_dimension_numbers<[1], [0], [0], [1], [0, 0, 1, 1], [], []>} : vector<8x8xbf16>, vector<8x8xbf16>, vector<8x8xf32> -> vector<8x8xf32>
    %101 = vector.extract_strided_slice %28 {offsets = [0, 8], sizes = [8, 8], strides = [1, 1]} : vector<8x32xf32> to vector<8x8xf32>
    %c0_41 = arith.constant 0 : index
    %c0_42 = arith.constant 0 : index
    %102 = vector.load %arg7[%c0_41, %c0_42] : memref<1x8xf32, #tpu.memory_space<vmem>>, vector<1x8xf32>
    %c0_43 = arith.constant 0 : index
    %c0_44 = arith.constant 0 : index
    %103 = vector.load %arg8[%c0_43, %c0_44] : memref<1x8xf32, #tpu.memory_space<vmem>>, vector<1x8xf32>
    %cst_45 = arith.constant dense<0.000000e+00> : vector<8xf32>
    %104 = vector.multi_reduction <add>, %101, %cst_45 [1] : vector<8x8xf32> to vector<8xf32>
    %105 = vector.shape_cast %104 : vector<8xf32> to vector<8x1xf32>
    %cst_46 = arith.constant 8.000000e+00 : f32
    %106 = vector.broadcast %cst_46 : f32 to vector<8x1xf32>
    %107 = arith.divf %105, %106 : vector<8x1xf32>
    %108 = vector.broadcast %107 : vector<8x1xf32> to vector<8x8xf32>
    %109 = arith.subf %101, %108 : vector<8x8xf32>
    %110 = arith.mulf %109, %109 : vector<8x8xf32>
    %cst_47 = arith.constant dense<0.000000e+00> : vector<8xf32>
    %111 = vector.multi_reduction <add>, %110, %cst_47 [1] : vector<8x8xf32> to vector<8xf32>
    %112 = vector.shape_cast %111 : vector<8xf32> to vector<8x1xf32>
    %cst_48 = arith.constant 8.000000e+00 : f32
    %113 = vector.broadcast %cst_48 : f32 to vector<8x1xf32>
    %114 = arith.divf %112, %113 : vector<8x1xf32>
    %115 = vector.broadcast %107 : vector<8x1xf32> to vector<8x8xf32>
    %116 = arith.subf %101, %115 : vector<8x8xf32>
    %cst_49 = arith.constant 9.99999974E-6 : f32
    %117 = vector.broadcast %cst_49 : f32 to vector<8x1xf32>
    %118 = arith.addf %114, %117 : vector<8x1xf32>
    %119 = math.rsqrt %118 : vector<8x1xf32>
    %120 = vector.broadcast %119 : vector<8x1xf32> to vector<8x8xf32>
    %121 = arith.mulf %116, %120 : vector<8x8xf32>
    %122 = vector.broadcast %102 : vector<1x8xf32> to vector<8x8xf32>
    %123 = arith.mulf %121, %122 : vector<8x8xf32>
    %124 = vector.broadcast %103 : vector<1x8xf32> to vector<8x8xf32>
    %125 = arith.addf %123, %124 : vector<8x8xf32>
    %126 = vector.extract_strided_slice %30 {offsets = [0, 8], sizes = [8, 8], strides = [1, 1]} : vector<8x32xf32> to vector<8x8xf32>
    %c0_50 = arith.constant 0 : index
    %c0_51 = arith.constant 0 : index
    %127 = vector.load %arg9[%c0_50, %c0_51] : memref<1x8xf32, #tpu.memory_space<vmem>>, vector<1x8xf32>
    %c0_52 = arith.constant 0 : index
    %c0_53 = arith.constant 0 : index
    %128 = vector.load %arg10[%c0_52, %c0_53] : memref<1x8xf32, #tpu.memory_space<vmem>>, vector<1x8xf32>
    %cst_54 = arith.constant dense<0.000000e+00> : vector<8xf32>
    %129 = vector.multi_reduction <add>, %126, %cst_54 [1] : vector<8x8xf32> to vector<8xf32>
    %130 = vector.shape_cast %129 : vector<8xf32> to vector<8x1xf32>
    %cst_55 = arith.constant 8.000000e+00 : f32
    %131 = vector.broadcast %cst_55 : f32 to vector<8x1xf32>
    %132 = arith.divf %130, %131 : vector<8x1xf32>
    %133 = vector.broadcast %132 : vector<8x1xf32> to vector<8x8xf32>
    %134 = arith.subf %126, %133 : vector<8x8xf32>
    %135 = arith.mulf %134, %134 : vector<8x8xf32>
    %cst_56 = arith.constant dense<0.000000e+00> : vector<8xf32>
    %136 = vector.multi_reduction <add>, %135, %cst_56 [1] : vector<8x8xf32> to vector<8xf32>
    %137 = vector.shape_cast %136 : vector<8xf32> to vector<8x1xf32>
    %cst_57 = arith.constant 8.000000e+00 : f32
    %138 = vector.broadcast %cst_57 : f32 to vector<8x1xf32>
    %139 = arith.divf %137, %138 : vector<8x1xf32>
    %140 = vector.broadcast %132 : vector<8x1xf32> to vector<8x8xf32>
    %141 = arith.subf %126, %140 : vector<8x8xf32>
    %cst_58 = arith.constant 9.99999974E-6 : f32
    %142 = vector.broadcast %cst_58 : f32 to vector<8x1xf32>
    %143 = arith.addf %139, %142 : vector<8x1xf32>
    %144 = math.rsqrt %143 : vector<8x1xf32>
    %145 = vector.broadcast %144 : vector<8x1xf32> to vector<8x8xf32>
    %146 = arith.mulf %141, %145 : vector<8x8xf32>
    %147 = vector.broadcast %127 : vector<1x8xf32> to vector<8x8xf32>
    %148 = arith.mulf %146, %147 : vector<8x8xf32>
    %149 = vector.broadcast %128 : vector<1x8xf32> to vector<8x8xf32>
    %150 = arith.addf %148, %149 : vector<8x8xf32>
    %151 = vector.extract_strided_slice %32 {offsets = [0, 8], sizes = [8, 8], strides = [1, 1]} : vector<8x32xf32> to vector<8x8xf32>
    %152 = arith.truncf %125 : vector<8x8xf32> to vector<8x8xbf16>
    %153 = arith.truncf %150 : vector<8x8xf32> to vector<8x8xbf16>
    %154 = tpu.transpose %153, [1, 0] : vector<8x8xbf16> -> vector<8x8xbf16>
    %cst_59 = arith.constant dense<0.000000e+00> : vector<8x8xf32>
    %155 = tpu.matmul %152, %154, %cst_59 {dimension_numbers = #tpu.dot_dimension_numbers<[1], [0], [0], [1], [0, 0, 1, 1], [], []>} : vector<8x8xbf16>, vector<8x8xbf16>, vector<8x8xf32> -> vector<8x8xf32>
    %cst_60 = arith.constant dense<0xFF800000> : vector<8xf32>
    %156 = vector.multi_reduction <maximumf>, %155, %cst_60 [1] : vector<8x8xf32> to vector<8xf32>
    %157 = vector.shape_cast %156 : vector<8xf32> to vector<8x1xf32>
    %158 = vector.broadcast %157 : vector<8x1xf32> to vector<8x8xf32>
    %159 = arith.subf %155, %158 : vector<8x8xf32>
    %160 = math.exp %159 : vector<8x8xf32>
    %cst_61 = arith.constant dense<0.000000e+00> : vector<8xf32>
    %161 = vector.multi_reduction <add>, %160, %cst_61 [1] : vector<8x8xf32> to vector<8xf32>
    %162 = vector.shape_cast %161 : vector<8xf32> to vector<8x1xf32>
    %163 = tpu.reciprocal %162 {approx = true} : vector<8x1xf32> -> vector<8x1xf32>
    %164 = vector.broadcast %163 : vector<8x1xf32> to vector<8x8xf32>
    %165 = arith.mulf %160, %164 : vector<8x8xf32>
    %166 = arith.truncf %165 : vector<8x8xf32> to vector<8x8xbf16>
    %167 = arith.truncf %151 : vector<8x8xf32> to vector<8x8xbf16>
    %cst_62 = arith.constant dense<0.000000e+00> : vector<8x8xf32>
    %168 = tpu.matmul %166, %167, %cst_62 {dimension_numbers = #tpu.dot_dimension_numbers<[1], [0], [0], [1], [0, 0, 1, 1], [], []>} : vector<8x8xbf16>, vector<8x8xbf16>, vector<8x8xf32> -> vector<8x8xf32>
    %169 = vector.extract_strided_slice %28 {offsets = [0, 16], sizes = [8, 8], strides = [1, 1]} : vector<8x32xf32> to vector<8x8xf32>
    %c0_63 = arith.constant 0 : index
    %c0_64 = arith.constant 0 : index
    %170 = vector.load %arg7[%c0_63, %c0_64] : memref<1x8xf32, #tpu.memory_space<vmem>>, vector<1x8xf32>
    %c0_65 = arith.constant 0 : index
    %c0_66 = arith.constant 0 : index
    %171 = vector.load %arg8[%c0_65, %c0_66] : memref<1x8xf32, #tpu.memory_space<vmem>>, vector<1x8xf32>
    %cst_67 = arith.constant dense<0.000000e+00> : vector<8xf32>
    %172 = vector.multi_reduction <add>, %169, %cst_67 [1] : vector<8x8xf32> to vector<8xf32>
    %173 = vector.shape_cast %172 : vector<8xf32> to vector<8x1xf32>
    %cst_68 = arith.constant 8.000000e+00 : f32
    %174 = vector.broadcast %cst_68 : f32 to vector<8x1xf32>
    %175 = arith.divf %173, %174 : vector<8x1xf32>
    %176 = vector.broadcast %175 : vector<8x1xf32> to vector<8x8xf32>
    %177 = arith.subf %169, %176 : vector<8x8xf32>
    %178 = arith.mulf %177, %177 : vector<8x8xf32>
    %cst_69 = arith.constant dense<0.000000e+00> : vector<8xf32>
    %179 = vector.multi_reduction <add>, %178, %cst_69 [1] : vector<8x8xf32> to vector<8xf32>
    %180 = vector.shape_cast %179 : vector<8xf32> to vector<8x1xf32>
    %cst_70 = arith.constant 8.000000e+00 : f32
    %181 = vector.broadcast %cst_70 : f32 to vector<8x1xf32>
    %182 = arith.divf %180, %181 : vector<8x1xf32>
    %183 = vector.broadcast %175 : vector<8x1xf32> to vector<8x8xf32>
    %184 = arith.subf %169, %183 : vector<8x8xf32>
    %cst_71 = arith.constant 9.99999974E-6 : f32
    %185 = vector.broadcast %cst_71 : f32 to vector<8x1xf32>
    %186 = arith.addf %182, %185 : vector<8x1xf32>
    %187 = math.rsqrt %186 : vector<8x1xf32>
    %188 = vector.broadcast %187 : vector<8x1xf32> to vector<8x8xf32>
    %189 = arith.mulf %184, %188 : vector<8x8xf32>
    %190 = vector.broadcast %170 : vector<1x8xf32> to vector<8x8xf32>
    %191 = arith.mulf %189, %190 : vector<8x8xf32>
    %192 = vector.broadcast %171 : vector<1x8xf32> to vector<8x8xf32>
    %193 = arith.addf %191, %192 : vector<8x8xf32>
    %194 = vector.extract_strided_slice %30 {offsets = [0, 16], sizes = [8, 8], strides = [1, 1]} : vector<8x32xf32> to vector<8x8xf32>
    %c0_72 = arith.constant 0 : index
    %c0_73 = arith.constant 0 : index
    %195 = vector.load %arg9[%c0_72, %c0_73] : memref<1x8xf32, #tpu.memory_space<vmem>>, vector<1x8xf32>
    %c0_74 = arith.constant 0 : index
    %c0_75 = arith.constant 0 : index
    %196 = vector.load %arg10[%c0_74, %c0_75] : memref<1x8xf32, #tpu.memory_space<vmem>>, vector<1x8xf32>
    %cst_76 = arith.constant dense<0.000000e+00> : vector<8xf32>
    %197 = vector.multi_reduction <add>, %194, %cst_76 [1] : vector<8x8xf32> to vector<8xf32>
    %198 = vector.shape_cast %197 : vector<8xf32> to vector<8x1xf32>
    %cst_77 = arith.constant 8.000000e+00 : f32
    %199 = vector.broadcast %cst_77 : f32 to vector<8x1xf32>
    %200 = arith.divf %198, %199 : vector<8x1xf32>
    %201 = vector.broadcast %200 : vector<8x1xf32> to vector<8x8xf32>
    %202 = arith.subf %194, %201 : vector<8x8xf32>
    %203 = arith.mulf %202, %202 : vector<8x8xf32>
    %cst_78 = arith.constant dense<0.000000e+00> : vector<8xf32>
    %204 = vector.multi_reduction <add>, %203, %cst_78 [1] : vector<8x8xf32> to vector<8xf32>
    %205 = vector.shape_cast %204 : vector<8xf32> to vector<8x1xf32>
    %cst_79 = arith.constant 8.000000e+00 : f32
    %206 = vector.broadcast %cst_79 : f32 to vector<8x1xf32>
    %207 = arith.divf %205, %206 : vector<8x1xf32>
    %208 = vector.broadcast %200 : vector<8x1xf32> to vector<8x8xf32>
    %209 = arith.subf %194, %208 : vector<8x8xf32>
    %cst_80 = arith.constant 9.99999974E-6 : f32
    %210 = vector.broadcast %cst_80 : f32 to vector<8x1xf32>
    %211 = arith.addf %207, %210 : vector<8x1xf32>
    %212 = math.rsqrt %211 : vector<8x1xf32>
    %213 = vector.broadcast %212 : vector<8x1xf32> to vector<8x8xf32>
    %214 = arith.mulf %209, %213 : vector<8x8xf32>
    %215 = vector.broadcast %195 : vector<1x8xf32> to vector<8x8xf32>
    %216 = arith.mulf %214, %215 : vector<8x8xf32>
    %217 = vector.broadcast %196 : vector<1x8xf32> to vector<8x8xf32>
    %218 = arith.addf %216, %217 : vector<8x8xf32>
    %219 = vector.extract_strided_slice %32 {offsets = [0, 16], sizes = [8, 8], strides = [1, 1]} : vector<8x32xf32> to vector<8x8xf32>
    %220 = arith.truncf %193 : vector<8x8xf32> to vector<8x8xbf16>
    %221 = arith.truncf %218 : vector<8x8xf32> to vector<8x8xbf16>
    %222 = tpu.transpose %221, [1, 0] : vector<8x8xbf16> -> vector<8x8xbf16>
    %cst_81 = arith.constant dense<0.000000e+00> : vector<8x8xf32>
    %223 = tpu.matmul %220, %222, %cst_81 {dimension_numbers = #tpu.dot_dimension_numbers<[1], [0], [0], [1], [0, 0, 1, 1], [], []>} : vector<8x8xbf16>, vector<8x8xbf16>, vector<8x8xf32> -> vector<8x8xf32>
    %cst_82 = arith.constant dense<0xFF800000> : vector<8xf32>
    %224 = vector.multi_reduction <maximumf>, %223, %cst_82 [1] : vector<8x8xf32> to vector<8xf32>
    %225 = vector.shape_cast %224 : vector<8xf32> to vector<8x1xf32>
    %226 = vector.broadcast %225 : vector<8x1xf32> to vector<8x8xf32>
    %227 = arith.subf %223, %226 : vector<8x8xf32>
    %228 = math.exp %227 : vector<8x8xf32>
    %cst_83 = arith.constant dense<0.000000e+00> : vector<8xf32>
    %229 = vector.multi_reduction <add>, %228, %cst_83 [1] : vector<8x8xf32> to vector<8xf32>
    %230 = vector.shape_cast %229 : vector<8xf32> to vector<8x1xf32>
    %231 = tpu.reciprocal %230 {approx = true} : vector<8x1xf32> -> vector<8x1xf32>
    %232 = vector.broadcast %231 : vector<8x1xf32> to vector<8x8xf32>
    %233 = arith.mulf %228, %232 : vector<8x8xf32>
    %234 = arith.truncf %233 : vector<8x8xf32> to vector<8x8xbf16>
    %235 = arith.truncf %219 : vector<8x8xf32> to vector<8x8xbf16>
    %cst_84 = arith.constant dense<0.000000e+00> : vector<8x8xf32>
    %236 = tpu.matmul %234, %235, %cst_84 {dimension_numbers = #tpu.dot_dimension_numbers<[1], [0], [0], [1], [0, 0, 1, 1], [], []>} : vector<8x8xbf16>, vector<8x8xbf16>, vector<8x8xf32> -> vector<8x8xf32>
    %237 = vector.extract_strided_slice %28 {offsets = [0, 24], sizes = [8, 8], strides = [1, 1]} : vector<8x32xf32> to vector<8x8xf32>
    %c0_85 = arith.constant 0 : index
    %c0_86 = arith.constant 0 : index
    %238 = vector.load %arg7[%c0_85, %c0_86] : memref<1x8xf32, #tpu.memory_space<vmem>>, vector<1x8xf32>
    %c0_87 = arith.constant 0 : index
    %c0_88 = arith.constant 0 : index
    %239 = vector.load %arg8[%c0_87, %c0_88] : memref<1x8xf32, #tpu.memory_space<vmem>>, vector<1x8xf32>
    %cst_89 = arith.constant dense<0.000000e+00> : vector<8xf32>
    %240 = vector.multi_reduction <add>, %237, %cst_89 [1] : vector<8x8xf32> to vector<8xf32>
    %241 = vector.shape_cast %240 : vector<8xf32> to vector<8x1xf32>
    %cst_90 = arith.constant 8.000000e+00 : f32
    %242 = vector.broadcast %cst_90 : f32 to vector<8x1xf32>
    %243 = arith.divf %241, %242 : vector<8x1xf32>
    %244 = vector.broadcast %243 : vector<8x1xf32> to vector<8x8xf32>
    %245 = arith.subf %237, %244 : vector<8x8xf32>
    %246 = arith.mulf %245, %245 : vector<8x8xf32>
    %cst_91 = arith.constant dense<0.000000e+00> : vector<8xf32>
    %247 = vector.multi_reduction <add>, %246, %cst_91 [1] : vector<8x8xf32> to vector<8xf32>
    %248 = vector.shape_cast %247 : vector<8xf32> to vector<8x1xf32>
    %cst_92 = arith.constant 8.000000e+00 : f32
    %249 = vector.broadcast %cst_92 : f32 to vector<8x1xf32>
    %250 = arith.divf %248, %249 : vector<8x1xf32>
    %251 = vector.broadcast %243 : vector<8x1xf32> to vector<8x8xf32>
    %252 = arith.subf %237, %251 : vector<8x8xf32>
    %cst_93 = arith.constant 9.99999974E-6 : f32
    %253 = vector.broadcast %cst_93 : f32 to vector<8x1xf32>
    %254 = arith.addf %250, %253 : vector<8x1xf32>
    %255 = math.rsqrt %254 : vector<8x1xf32>
    %256 = vector.broadcast %255 : vector<8x1xf32> to vector<8x8xf32>
    %257 = arith.mulf %252, %256 : vector<8x8xf32>
    %258 = vector.broadcast %238 : vector<1x8xf32> to vector<8x8xf32>
    %259 = arith.mulf %257, %258 : vector<8x8xf32>
    %260 = vector.broadcast %239 : vector<1x8xf32> to vector<8x8xf32>
    %261 = arith.addf %259, %260 : vector<8x8xf32>
    %262 = vector.extract_strided_slice %30 {offsets = [0, 24], sizes = [8, 8], strides = [1, 1]} : vector<8x32xf32> to vector<8x8xf32>
    %c0_94 = arith.constant 0 : index
    %c0_95 = arith.constant 0 : index
    %263 = vector.load %arg9[%c0_94, %c0_95] : memref<1x8xf32, #tpu.memory_space<vmem>>, vector<1x8xf32>
    %c0_96 = arith.constant 0 : index
    %c0_97 = arith.constant 0 : index
    %264 = vector.load %arg10[%c0_96, %c0_97] : memref<1x8xf32, #tpu.memory_space<vmem>>, vector<1x8xf32>
    %cst_98 = arith.constant dense<0.000000e+00> : vector<8xf32>
    %265 = vector.multi_reduction <add>, %262, %cst_98 [1] : vector<8x8xf32> to vector<8xf32>
    %266 = vector.shape_cast %265 : vector<8xf32> to vector<8x1xf32>
    %cst_99 = arith.constant 8.000000e+00 : f32
    %267 = vector.broadcast %cst_99 : f32 to vector<8x1xf32>
    %268 = arith.divf %266, %267 : vector<8x1xf32>
    %269 = vector.broadcast %268 : vector<8x1xf32> to vector<8x8xf32>
    %270 = arith.subf %262, %269 : vector<8x8xf32>
    %271 = arith.mulf %270, %270 : vector<8x8xf32>
    %cst_100 = arith.constant dense<0.000000e+00> : vector<8xf32>
    %272 = vector.multi_reduction <add>, %271, %cst_100 [1] : vector<8x8xf32> to vector<8xf32>
    %273 = vector.shape_cast %272 : vector<8xf32> to vector<8x1xf32>
    %cst_101 = arith.constant 8.000000e+00 : f32
    %274 = vector.broadcast %cst_101 : f32 to vector<8x1xf32>
    %275 = arith.divf %273, %274 : vector<8x1xf32>
    %276 = vector.broadcast %268 : vector<8x1xf32> to vector<8x8xf32>
    %277 = arith.subf %262, %276 : vector<8x8xf32>
    %cst_102 = arith.constant 9.99999974E-6 : f32
    %278 = vector.broadcast %cst_102 : f32 to vector<8x1xf32>
    %279 = arith.addf %275, %278 : vector<8x1xf32>
    %280 = math.rsqrt %279 : vector<8x1xf32>
    %281 = vector.broadcast %280 : vector<8x1xf32> to vector<8x8xf32>
    %282 = arith.mulf %277, %281 : vector<8x8xf32>
    %283 = vector.broadcast %263 : vector<1x8xf32> to vector<8x8xf32>
    %284 = arith.mulf %282, %283 : vector<8x8xf32>
    %285 = vector.broadcast %264 : vector<1x8xf32> to vector<8x8xf32>
    %286 = arith.addf %284, %285 : vector<8x8xf32>
    %287 = vector.extract_strided_slice %32 {offsets = [0, 24], sizes = [8, 8], strides = [1, 1]} : vector<8x32xf32> to vector<8x8xf32>
    %288 = arith.truncf %261 : vector<8x8xf32> to vector<8x8xbf16>
    %289 = arith.truncf %286 : vector<8x8xf32> to vector<8x8xbf16>
    %290 = tpu.transpose %289, [1, 0] : vector<8x8xbf16> -> vector<8x8xbf16>
    %cst_103 = arith.constant dense<0.000000e+00> : vector<8x8xf32>
    %291 = tpu.matmul %288, %290, %cst_103 {dimension_numbers = #tpu.dot_dimension_numbers<[1], [0], [0], [1], [0, 0, 1, 1], [], []>} : vector<8x8xbf16>, vector<8x8xbf16>, vector<8x8xf32> -> vector<8x8xf32>
    %cst_104 = arith.constant dense<0xFF800000> : vector<8xf32>
    %292 = vector.multi_reduction <maximumf>, %291, %cst_104 [1] : vector<8x8xf32> to vector<8xf32>
    %293 = vector.shape_cast %292 : vector<8xf32> to vector<8x1xf32>
    %294 = vector.broadcast %293 : vector<8x1xf32> to vector<8x8xf32>
    %295 = arith.subf %291, %294 : vector<8x8xf32>
    %296 = math.exp %295 : vector<8x8xf32>
    %cst_105 = arith.constant dense<0.000000e+00> : vector<8xf32>
    %297 = vector.multi_reduction <add>, %296, %cst_105 [1] : vector<8x8xf32> to vector<8xf32>
    %298 = vector.shape_cast %297 : vector<8xf32> to vector<8x1xf32>
    %299 = tpu.reciprocal %298 {approx = true} : vector<8x1xf32> -> vector<8x1xf32>
    %300 = vector.broadcast %299 : vector<8x1xf32> to vector<8x8xf32>
    %301 = arith.mulf %296, %300 : vector<8x8xf32>
    %302 = arith.truncf %301 : vector<8x8xf32> to vector<8x8xbf16>
    %303 = arith.truncf %287 : vector<8x8xf32> to vector<8x8xbf16>
    %cst_106 = arith.constant dense<0.000000e+00> : vector<8x8xf32>
    %304 = tpu.matmul %302, %303, %cst_106 {dimension_numbers = #tpu.dot_dimension_numbers<[1], [0], [0], [1], [0, 0, 1, 1], [], []>} : vector<8x8xbf16>, vector<8x8xbf16>, vector<8x8xf32> -> vector<8x8xf32>
    %305 = tpu.concatenate %100, %168, %236, %304 in 1 : vector<8x8xf32>, vector<8x8xf32>, vector<8x8xf32>, vector<8x8xf32> -> vector<8x32xf32>
    %306 = arith.truncf %305 : vector<8x32xf32> to vector<8x32xbf16>
    %c0_107 = arith.constant 0 : index
    %c0_108 = arith.constant 0 : index
    %307 = vector.load %arg11[%c0_107, %c0_108] : memref<32x32xbf16, #tpu.memory_space<vmem>>, vector<32x32xbf16>
    %cst_109 = arith.constant dense<0.000000e+00> : vector<8x32xf32>
    %308 = tpu.matmul %306, %307, %cst_109 {dimension_numbers = #tpu.dot_dimension_numbers<[1], [0], [0], [1], [0, 0, 1, 1], [], []>} : vector<8x32xbf16>, vector<32x32xbf16>, vector<8x32xf32> -> vector<8x32xf32>
    %c0_110 = arith.constant 0 : index
    %c0_111 = arith.constant 0 : index
    %309 = vector.load %arg12[%c0_110, %c0_111] : memref<1x32xf32, #tpu.memory_space<vmem>>, vector<1x32xf32>
    %310 = vector.broadcast %309 : vector<1x32xf32> to vector<8x32xf32>
    %311 = arith.addf %308, %310 : vector<8x32xf32>
    %312 = arith.addf %1, %311 : vector<8x32xf32>
    %c0_112 = arith.constant 0 : index
    %c0_113 = arith.constant 0 : index
    %313 = vector.load %arg13[%c0_112, %c0_113] : memref<1x32xf32, #tpu.memory_space<vmem>>, vector<1x32xf32>
    %c0_114 = arith.constant 0 : index
    %c0_115 = arith.constant 0 : index
    %314 = vector.load %arg14[%c0_114, %c0_115] : memref<1x32xf32, #tpu.memory_space<vmem>>, vector<1x32xf32>
    %cst_116 = arith.constant dense<0.000000e+00> : vector<8xf32>
    %315 = vector.multi_reduction <add>, %312, %cst_116 [1] : vector<8x32xf32> to vector<8xf32>
    %316 = vector.shape_cast %315 : vector<8xf32> to vector<8x1xf32>
    %cst_117 = arith.constant 3.200000e+01 : f32
    %317 = vector.broadcast %cst_117 : f32 to vector<8x1xf32>
    %318 = arith.divf %316, %317 : vector<8x1xf32>
    %319 = vector.broadcast %318 : vector<8x1xf32> to vector<8x32xf32>
    %320 = arith.subf %312, %319 : vector<8x32xf32>
    %321 = arith.mulf %320, %320 : vector<8x32xf32>
    %cst_118 = arith.constant dense<0.000000e+00> : vector<8xf32>
    %322 = vector.multi_reduction <add>, %321, %cst_118 [1] : vector<8x32xf32> to vector<8xf32>
    %323 = vector.shape_cast %322 : vector<8xf32> to vector<8x1xf32>
    %cst_119 = arith.constant 3.200000e+01 : f32
    %324 = vector.broadcast %cst_119 : f32 to vector<8x1xf32>
    %325 = arith.divf %323, %324 : vector<8x1xf32>
    %326 = vector.broadcast %318 : vector<8x1xf32> to vector<8x32xf32>
    %327 = arith.subf %312, %326 : vector<8x32xf32>
    %cst_120 = arith.constant 9.99999974E-6 : f32
    %328 = vector.broadcast %cst_120 : f32 to vector<8x1xf32>
    %329 = arith.addf %325, %328 : vector<8x1xf32>
    %330 = math.rsqrt %329 : vector<8x1xf32>
    %331 = vector.broadcast %330 : vector<8x1xf32> to vector<8x32xf32>
    %332 = arith.mulf %327, %331 : vector<8x32xf32>
    %333 = vector.broadcast %313 : vector<1x32xf32> to vector<8x32xf32>
    %334 = arith.mulf %332, %333 : vector<8x32xf32>
    %335 = vector.broadcast %314 : vector<1x32xf32> to vector<8x32xf32>
    %336 = arith.addf %334, %335 : vector<8x32xf32>
    %337 = arith.truncf %336 : vector<8x32xf32> to vector<8x32xbf16>
    %c0_121 = arith.constant 0 : index
    %c0_122 = arith.constant 0 : index
    %338 = vector.load %arg15[%c0_121, %c0_122] : memref<32x128xbf16, #tpu.memory_space<vmem>>, vector<32x128xbf16>
    %cst_123 = arith.constant dense<0.000000e+00> : vector<8x128xf32>
    %339 = tpu.matmul %337, %338, %cst_123 {dimension_numbers = #tpu.dot_dimension_numbers<[1], [0], [0], [1], [0, 0, 1, 1], [], []>} : vector<8x32xbf16>, vector<32x128xbf16>, vector<8x128xf32> -> vector<8x128xf32>
    %c0_124 = arith.constant 0 : index
    %c0_125 = arith.constant 0 : index
    %340 = vector.load %arg16[%c0_124, %c0_125] : memref<1x128xf32, #tpu.memory_space<vmem>>, vector<1x128xf32>
    %341 = vector.broadcast %340 : vector<1x128xf32> to vector<8x128xf32>
    %342 = arith.addf %339, %341 : vector<8x128xf32>
    %cst_126 = arith.constant 5.000000e-01 : f32
    %343 = vector.broadcast %cst_126 : f32 to vector<8x128xf32>
    %344 = arith.mulf %343, %342 : vector<8x128xf32>
    %cst_127 = arith.constant 4.471500e-02 : f32
    %345 = vector.broadcast %cst_127 : f32 to vector<8x128xf32>
    %346 = arith.mulf %345, %342 : vector<8x128xf32>
    %347 = arith.mulf %346, %342 : vector<8x128xf32>
    %348 = arith.mulf %347, %342 : vector<8x128xf32>
    %349 = arith.addf %342, %348 : vector<8x128xf32>
    %cst_128 = arith.constant 0.797884583 : f32
    %350 = vector.broadcast %cst_128 : f32 to vector<8x128xf32>
    %351 = arith.mulf %350, %349 : vector<8x128xf32>
    %352 = math.tanh %351 : vector<8x128xf32>
    %cst_129 = arith.constant 1.000000e+00 : f32
    %353 = vector.broadcast %cst_129 : f32 to vector<8x128xf32>
    %354 = arith.addf %353, %352 : vector<8x128xf32>
    %355 = arith.mulf %344, %354 : vector<8x128xf32>
    %356 = arith.truncf %355 : vector<8x128xf32> to vector<8x128xbf16>
    %c0_130 = arith.constant 0 : index
    %c0_131 = arith.constant 0 : index
    %357 = vector.load %arg17[%c0_130, %c0_131] : memref<128x32xbf16, #tpu.memory_space<vmem>>, vector<128x32xbf16>
    %cst_132 = arith.constant dense<0.000000e+00> : vector<8x32xf32>
    %358 = tpu.matmul %356, %357, %cst_132 {dimension_numbers = #tpu.dot_dimension_numbers<[1], [0], [0], [1], [0, 0, 1, 1], [], []>} : vector<8x128xbf16>, vector<128x32xbf16>, vector<8x32xf32> -> vector<8x32xf32>
    %c0_133 = arith.constant 0 : index
    %c0_134 = arith.constant 0 : index
    %359 = vector.load %arg18[%c0_133, %c0_134] : memref<1x32xf32, #tpu.memory_space<vmem>>, vector<1x32xf32>
    %360 = vector.broadcast %359 : vector<1x32xf32> to vector<8x32xf32>
    %361 = arith.addf %358, %360 : vector<8x32xf32>
    %362 = arith.addf %312, %361 : vector<8x32xf32>
    %363 = vector.shape_cast %362 : vector<8x32xf32> to vector<1x8x32xf32>
    %c0_135 = arith.constant 0 : index
    %c0_136 = arith.constant 0 : index
    %c0_137 = arith.constant 0 : index
    %364 = vector.load %arg19[%c0_135, %c0_136, %c0_137] : memref<1x8x32xf32, #tpu.memory_space<vmem>>, vector<1x8x32xf32>
    tpu.vector_store %arg19[%c0_135, %c0_136, %c0_137], %363 {strides = array<i32>} : memref<1x8x32xf32, #tpu.memory_space<vmem>>, vector<1x8x32xf32>,
    return
  }
  func.func @transform_0(%arg0: i32) -> (i32, i32, i32) {
    %c0_i32 = arith.constant 0 : i32
    %c0_i32_0 = arith.constant 0 : i32
    %c0_i32_1 = arith.constant 0 : i32
    return %arg0, %c0_i32, %c0_i32_0 : i32, i32, i32
  }
  func.func @transform_1(%arg0: i32) -> (i32, i32) {
    %c0_i32 = arith.constant 0 : i32
    %c0_i32_0 = arith.constant 0 : i32
    %c0_i32_1 = arith.constant 0 : i32
    return %c0_i32, %c0_i32_0 : i32, i32
  }
  func.func @transform_2(%arg0: i32) -> (i32, i32) {
    %c0_i32 = arith.constant 0 : i32
    %c0_i32_0 = arith.constant 0 : i32
    %c0_i32_1 = arith.constant 0 : i32
    return %c0_i32, %c0_i32_0 : i32, i32
  }
  func.func @transform_3(%arg0: i32) -> (i32, i32) {
    %c0_i32 = arith.constant 0 : i32
    %c0_i32_0 = arith.constant 0 : i32
    %c0_i32_1 = arith.constant 0 : i32
    return %c0_i32, %c0_i32_0 : i32, i32
  }
  func.func @transform_4(%arg0: i32) -> (i32, i32) {
    %c0_i32 = arith.constant 0 : i32
    %c0_i32_0 = arith.constant 0 : i32
    %c0_i32_1 = arith.constant 0 : i32
    return %c0_i32, %c0_i32_0 : i32, i32
  }
  func.func @transform_5(%arg0: i32) -> (i32, i32) {
    %c0_i32 = arith.constant 0 : i32
    %c0_i32_0 = arith.constant 0 : i32
    %c0_i32_1 = arith.constant 0 : i32
    return %c0_i32, %c0_i32_0 : i32, i32
  }
  func.func @transform_6(%arg0: i32) -> (i32, i32) {
    %c0_i32 = arith.constant 0 : i32
    %c0_i32_0 = arith.constant 0 : i32
    %c0_i32_1 = arith.constant 0 : i32
    return %c0_i32, %c0_i32_0 : i32, i32
  }
  func.func @transform_7(%arg0: i32) -> (i32, i32) {
    %c0_i32 = arith.constant 0 : i32
    %c0_i32_0 = arith.constant 0 : i32
    %c0_i32_1 = arith.constant 0 : i32
    return %c0_i32, %c0_i32_0 : i32, i32
  }
  func.func @transform_8(%arg0: i32) -> (i32, i32) {
    %c0_i32 = arith.constant 0 : i32
    %c0_i32_0 = arith.constant 0 : i32
    %c0_i32_1 = arith.constant 0 : i32
    return %c0_i32, %c0_i32_0 : i32, i32
  }
  func.func @transform_9(%arg0: i32) -> (i32, i32) {
    %c0_i32 = arith.constant 0 : i32
    %c0_i32_0 = arith.constant 0 : i32
    %c0_i32_1 = arith.constant 0 : i32
    return %c0_i32, %c0_i32_0 : i32, i32
  }
  func.func @transform_10(%arg0: i32) -> (i32, i32) {
    %c0_i32 = arith.constant 0 : i32
    %c0_i32_0 = arith.constant 0 : i32
    %c0_i32_1 = arith.constant 0 : i32
    return %c0_i32, %c0_i32_0 : i32, i32
  }
  func.func @transform_11(%arg0: i32) -> (i32, i32) {
    %c0_i32 = arith.constant 0 : i32
    %c0_i32_0 = arith.constant 0 : i32
    %c0_i32_1 = arith.constant 0 : i32
    return %c0_i32, %c0_i32_0 : i32, i32
  }
  func.func @transform_12(%arg0: i32) -> (i32, i32) {
    %c0_i32 = arith.constant 0 : i32
    %c0_i32_0 = arith.constant 0 : i32
    %c0_i32_1 = arith.constant 0 : i32
    return %c0_i32, %c0_i32_0 : i32, i32
  }
  func.func @transform_13(%arg0: i32) -> (i32, i32) {
    %c0_i32 = arith.constant 0 : i32
    %c0_i32_0 = arith.constant 0 : i32
    %c0_i32_1 = arith.constant 0 : i32
    return %c0_i32, %c0_i32_0 : i32, i32
  }
  func.func @transform_14(%arg0: i32) -> (i32, i32) {
    %c0_i32 = arith.constant 0 : i32
    %c0_i32_0 = arith.constant 0 : i32
    %c0_i32_1 = arith.constant 0 : i32
    return %c0_i32, %c0_i32_0 : i32, i32
  }
  func.func @transform_15(%arg0: i32) -> (i32, i32) {
    %c0_i32 = arith.constant 0 : i32
    %c0_i32_0 = arith.constant 0 : i32
    %c0_i32_1 = arith.constant 0 : i32
    return %c0_i32, %c0_i32_0 : i32, i32
  }
  func.func @transform_16(%arg0: i32) -> (i32, i32) {
    %c0_i32 = arith.constant 0 : i32
    %c0_i32_0 = arith.constant 0 : i32
    %c0_i32_1 = arith.constant 0 : i32
    return %c0_i32, %c0_i32_0 : i32, i32
  }
  func.func @transform_17(%arg0: i32) -> (i32, i32) {
    %c0_i32 = arith.constant 0 : i32
    %c0_i32_0 = arith.constant 0 : i32
    %c0_i32_1 = arith.constant 0 : i32
    return %c0_i32, %c0_i32_0 : i32, i32
  }
  func.func @transform_18(%arg0: i32) -> (i32, i32, i32) {
    %c0_i32 = arith.constant 0 : i32
    %c0_i32_0 = arith.constant 0 : i32
    %c0_i32_1 = arith.constant 0 : i32
    return %arg0, %c0_i32, %c0_i32_0 : i32, i32, i32
  }
}

</mosaic_0001>

<bundles_post_ra>
// kernel: tpu_custom_call.1
= control target key start
LH: loop header
LB: loop body
LE: loop exit
PB: predicated region body
PF: predicated region fallthrough
CT: control target
= control target key end

     0   :  { %s3881_s0 = inlined_call_operand.vmem [shape: f32[2,8,32], index: 0, kind: input, shape index: {}]   ;;  %s3882_s1 = inlined_call_operand.vmem [shape: f32[1,32], index: 1, kind: input, shape index: {}]   ;;  %s3883_s2 = inlined_call_operand.vmem [shape: f32[1,32], index: 2, kind: input, shape index: {}]   ;;  %s3884_s3 = inlined_call_operand.vmem [shape: bf16[32,32], index: 3, kind: input, shape index: {}]   ;;  %s3885_s4 = inlined_call_operand.vmem [shape: bf16[32,32], index: 4, kind: input, shape index: {}]   ;;  %s3886_s5 = inlined_call_operand.vmem [shape: bf16[32,32], index: 5, kind: input, shape index: {}]   ;;  %s3887_s6 = inlined_call_operand.hbm [shape: f32[1,8], index: 6, kind: input, shape index: {}]   ;;  %s3888_s7 = inlined_call_operand.hbm [shape: f32[1,8], index: 7, kind: input, shape index: {}]   ;;  %s3889_s8 = inlined_call_operand.hbm [shape: f32[1,8], index: 8, kind: input, shape index: {}]   ;;  %s3890_s9 = inlined_call_operand.hbm [shape: f32[1,8], index: 9, kind: input, shape index: {}]   ;;  %s3891_s10 = inlined_call_operand.vmem [shape: bf16[32,32], index: 10, kind: input, shape index: {}]   ;;  %s3892_s11 = inlined_call_operand.vmem [shape: f32[1,32], index: 11, kind: input, shape index: {}]   ;;  %s3893_s12 = inlined_call_operand.vmem [shape: f32[1,32], index: 12, kind: input, shape index: {}]   ;;  %s3894_s13 = inlined_call_operand.vmem [shape: f32[1,32], index: 13, kind: input, shape index: {}]   ;;  %s3895_s14 = inlined_call_operand.vmem [shape: bf16[32,128], index: 14, kind: input, shape index: {}]   ;;  %s3896_s15 = inlined_call_operand.vmem [shape: f32[1,128], index: 15, kind: input, shape index: {}]   ;;  %s3897_s16 = inlined_call_operand.vmem [shape: bf16[128,32], index: 16, kind: input, shape index: {}]   ;;  %s3898_s17 = inlined_call_operand.vmem [shape: f32[1,32], index: 17, kind: input, shape index: {}]   ;;  %s3899_s18 = inlined_call_operand.hbm [shape: f32[2,8,32], index: 18, kind: output, shape index: {}]  }
   0x1   :  { %3912 = sst [smem:[#allocation22_spill]] %s3881_s0 }
   0x2   :  { %3913 = sst [smem:[#allocation23_spill]] %s3882_s1 }
   0x3   :  { %3914 = sst [smem:[#allocation24_spill]] %s3883_s2 }
   0x4   :  { %3915 = sst [smem:[#allocation25_spill]] %s3898_s17 }
   0x5   :  { %3916 = sst [smem:[#allocation26_spill]] %s3899_s18 }
   0x6   :  { %23 = vsyncpa [#allocation3], 0 }
   0x7   :  { %24 = vsyncpa [#allocation6], 0 }
   0x8   :  { %25 = vsyncpa [#allocation9], 0 }
   0x9   :  { %26 = vsyncpa [#allocation4], 0 }
   0xa   :  { %28 = vsyncpa [#allocation4 + $0x1], 0  ;;  %s3192_s27 = smov 0   ;;  %s3194_s28 = smov 0  }
   0xb   :  { %s3196_s29 = smov 0   ;;  %s3198_s30 = smov 0  }
   0xc LB: > { %3917 = sst [smem:[#allocation15_spill]] %s3068_s27  ;;  %s3213_s0 = sadd.s32 4294967295, %s3080_s30   ;;  %s3080_s30 = sphi %s3198_s30, %s3947_s30   ;;  %s3076_s29 = sphi %s3196_s29, %s3949_s29   ;;  %s3072_s28 = sphi %s3194_s28, %s3951_s28   ;;  %s3068_s27 = sphi %s3192_s27, %s3950_s27  }
   0xd   : > { %3918 = sst [smem:[#allocation16_spill]] %s3076_s29  ;;  %s2519_s19 = sadd.s32 4294967294, %s3080_s30  }
   0xe   : > { %3919 = sst [smem:[#allocation17_spill]] %s3080_s30  ;;  %s3217_s1 = sadd.s32 1, %s3080_s30  }
   0xf   : > { %3920 = sst [smem:[#allocation18_spill]] %s3217_s1  ;;  %s424_s20 = sadd.s32 1, %s3076_s29 }
  0x10   : > { %s421_s21 = ssub.s32 %s3080_s30, %s3217_s1  ;;  %p434_p0 = scmp.ne.s32.totalorder %s3076_s29, %s3072_s28 }
  0x11   : > { %p422_p1 = scmp.eq.s32.totalorder %s421_s21, 0  ;;  %p435_p2 = scmp.eq.s32.totalorder %s3213_s0, 1 }
  0x12   : > { %p440_p3 = scmp.ne.s32.totalorder %s3072_s28, %s3068_s27  ;;  %p441_p4 = scmp.eq.s32.totalorder %s2519_s19, 1 }
  0x13   : > { %s3228_s22 = scalar_select %p422_p1, %s3076_s29, %s424_s20  }
  0x14   : > { %p3230_p5 = por %p435_p2, %p434_p0  ;;  %p3234_p6 = por %p441_p4, %p440_p3 }
  0x15   : > { %3921 = sst [smem:[#allocation19_spill]] %s3228_s22  ;;  %p2520_p7 = scmp.ge.s32.totalorder %s3080_s30, 1 }
  0x16   : > { %s3922_s2 = scalar_select %p3230_p5, 1, 0 }
  0x17   : > { %s3924_s23 = scalar_select %p3234_p6, 1, 0 }
  0x18   : > { %3923 = sst [smem:[#allocation20_spill]] %s3922_s2  ;;  %p448_p8 = scmp.lt.s32.totalorder %s3080_s30, 3 }
  0x19   : > { %3925 = sst [smem:[#allocation21_spill]] %s3924_s23  ;;  %p3907_p9 = scmp.eq.s32.totalorder %s3213_s0, 0 }
  0x1a   : > { %p3241_p10 = pnand %p2520_p7, %p448_p8  ;;  %s3082_s25 = smov [#allocation5]  }
  0x1b   : > { %s487_s26 = sshll.u32 %s3082_s25, 4  ;;  %s3083_s19 = smov [#allocation2]   ;;  %s488_s26 = int_to_ptr.vmem [resolvable:$true] %s487_s26 }
  0x1c   : > { %s3926_s24 = scalar_select %p3241_p10, 1, 0 }
  0x1d   : > { %p2749_p11 = pneg %p3241_p10  ;;  %s476_s20 = sshll.u32 %s3083_s19, 4  ;;  %s3253_s20 = int_to_ptr.vmem [resolvable:$true] %s476_s20 }
  0x1e   : > { %s3084_s22 = smov [#allocation7]   ;;  %s2894_s25 = scalar_lea.hbm %s3888_s7, 16 }
  0x1f   : > { %p3249_p12 = pnand %p3907_p9, %p2749_p11  ;;  %s498_s29 = sshll.u32 %s3084_s22, 4  ;;  %s3255_s29 = int_to_ptr.vmem [resolvable:$true] %s498_s29 }
  0x20   : > { %p2895_p13 = scmp.ne.s32.totalorder %s3888_s7, %s2894_s25  ;;  %p2901_p3 = scmp.lt.u32.totalorder %s2894_s25, %s3888_s7 }
  0x21   : > { %p3265_p0 = pneg %p3249_p12 }
  0x23   : > { %p2897_p1 = pnand %p3265_p0, %p2895_p13 }
  0x25   : > { %p2898_p2 = pneg %p2897_p1 }
  0x27   : > { %p2903_p4 = pnand %p2901_p3, %p2898_p2 }
  0x29   : > { %2906 = shalt.err (!%p2903_p4)
}
  0x2a   : > { %s2907_s1 = scalar_lea.vmem %s488_s26, 16  ;;  %s2914_s27 = scalar_lea.vmem %s488_s26, 32 }
  0x2b   : > { %p2908_p7 = scmp.ne.s32.totalorder %s488_s26, %s2907_s1  ;;  %p2915_p9 = scmp.lt.s32.totalorder %s488_s26, %s488_s26 }
  0x2c   : > { %p2916_p6 = scmp.lt.s32.totalorder %s2914_s27, %s2907_s1 }
  0x2d   : > { %p2910_p8 = pnand %p2908_p7, %p3265_p0 }
  0x2e   : > { %p2917_p5 = por %p2916_p6, %p2915_p9 }
  0x2f   : > { %p2911_p11 = pneg %p2910_p8 }
  0x31   : > { %p2918_p10 = pnand %p2917_p5, %p2911_p11 }
  0x33   : > { %2921 = shalt.err (!%p2918_p10)
}
  0x34   : > { %2755 = dma.hbm_to_vmem [thread:$0]  (!%p3249_p12), %s3888_s7, 16, %s488_s26, [#allocation6]  }
  0x35   : > { %s2922_s22 = scalar_lea.hbm %s3887_s6, 16 }
  0x36   : > { %p2923_p13 = scmp.ne.s32.totalorder %s3887_s6, %s2922_s22  ;;  %p2929_p5 = scmp.lt.u32.totalorder %s2922_s22, %s3887_s6 }
  0x38   : > { %p2925_p1 = pnand %p2923_p13, %p3265_p0 }
  0x3a   : > { %p2926_p6 = pneg %p2925_p1 }
  0x3c   : > { %p2931_p9 = pnand %p2929_p5, %p2926_p6 }
  0x3e   : > { %2934 = shalt.err (!%p2931_p9)
}
  0x3f   : > { %s2935_s26 = scalar_lea.vmem %s3253_s20, 16  ;;  %s2942_s17 = scalar_lea.vmem %s3253_s20, 32 }
  0x40   : > { %p2936_p10 = scmp.ne.s32.totalorder %s3253_s20, %s2935_s26  ;;  %p2943_p4 = scmp.lt.s32.totalorder %s3253_s20, %s3253_s20 }
  0x41   : > { %p2944_p7 = scmp.lt.s32.totalorder %s2942_s17, %s2935_s26 }
  0x42   : > { %p2938_p2 = pnand %p2936_p10, %p3265_p0 }
  0x43   : > { %p2945_p8 = por %p2944_p7, %p2943_p4 }
  0x44   : > { %p2939_p3 = pneg %p2938_p2 }
  0x46   : > { %p2946_p11 = pnand %p2945_p8, %p2939_p3 }
  0x48   : > { %2949 = shalt.err (!%p2946_p11)
}
  0x49   : > { %2752 = dma.hbm_to_vmem [thread:$0]  (!%p3249_p12), %s3887_s6, 16, %s3253_s20, [#allocation3]  }
  0x4a   : > { %s2950_s25 = scalar_lea.hbm %s3889_s8, 16 }
  0x4b   : > { %p2951_p13 = scmp.ne.s32.totalorder %s3889_s8, %s2950_s25  ;;  %p2957_p5 = scmp.lt.u32.totalorder %s2950_s25, %s3889_s8 }
  0x4d   : > { %p2953_p1 = pnand %p2951_p13, %p3265_p0 }
  0x4f   : > { %p2954_p6 = pneg %p2953_p1 }
  0x51   : > { %p2959_p9 = pnand %p2957_p5, %p2954_p6 }
  0x53   : > { %2962 = shalt.err (!%p2959_p9)
}
  0x54   : > { %s2963_s20 = scalar_lea.vmem %s3255_s29, 16  ;;  %s2970_s17 = scalar_lea.vmem %s3255_s29, 32 }
  0x55   : > { %p2964_p10 = scmp.ne.s32.totalorder %s3255_s29, %s2963_s20  ;;  %p2971_p4 = scmp.lt.s32.totalorder %s3255_s29, %s3255_s29 }
  0x56   : > { %p2972_p7 = scmp.lt.s32.totalorder %s2970_s17, %s2963_s20 }
  0x57   : > { %p2966_p2 = pnand %p2964_p10, %p3265_p0 }
  0x58   : > { %p2973_p8 = por %p2972_p7, %p2971_p4 }
  0x59   : > { %p2967_p3 = pneg %p2966_p2 }
  0x5b   : > { %p2974_p11 = pnand %p2973_p8, %p2967_p3 }
  0x5d   : > { %2977 = shalt.err (!%p2974_p11)
}
  0x5e   : > { %2758 = dma.hbm_to_vmem [thread:$0]  (!%p3249_p12), %s3889_s8, 16, %s3255_s29, [#allocation6]  }
  0x5f   : > { %s3085_s23 = smov [#allocation8]   ;;  %s2978_s1 = scalar_lea.hbm %s3890_s9, 16 }
  0x60   : > { %s509_s18 = sshll.u32 %s3085_s23, 4  ;;  %p2979_p13 = scmp.ne.s32.totalorder %s3890_s9, %s2978_s1  ;;  %s510_s18 = int_to_ptr.vmem [resolvable:$true] %s509_s18 }
  0x61   : > { %p2985_p5 = scmp.lt.u32.totalorder %s2978_s1, %s3890_s9 }
  0x62   : > { %p2981_p1 = pnand %p2979_p13, %p3265_p0 }
  0x64   : > { %p2982_p6 = pneg %p2981_p1 }
  0x66   : > { %p2987_p9 = pnand %p2985_p5, %p2982_p6 }
  0x68   : > { %2990 = shalt.err (!%p2987_p9)
}
  0x69   : > { %s2991_s29 = scalar_lea.vmem %s510_s18, 16  ;;  %s2998_s2 = scalar_lea.vmem %s510_s18, 32 }
  0x6a   : > { %p2992_p10 = scmp.ne.s32.totalorder %s510_s18, %s2991_s29  ;;  %p2999_p4 = scmp.lt.s32.totalorder %s510_s18, %s510_s18 }
  0x6b   : > { %p3000_p7 = scmp.lt.s32.totalorder %s2998_s2, %s2991_s29 }
  0x6c   : > { %p2994_p2 = pnand %p2992_p10, %p3265_p0 }
  0x6d   : > { %p3001_p8 = por %p3000_p7, %p2999_p4 }
  0x6e   : > { %p2995_p3 = pneg %p2994_p2 }
  0x70   : > { %p3002_p11 = pnand %p3001_p8, %p2995_p3 }
  0x72   : > { %3005 = shalt.err (!%p3002_p11)
}
  0x73   : > { %2761 = dma.hbm_to_vmem [thread:$0]  (!%p3249_p12), %s3890_s9, 16, %s510_s18, [#allocation9]  }
  0x74   : > { %p3929_p13 = scmp.ne.s32.totalorder %s3926_s24, 0 }
  0x75   : > { %p3930_p1 = scmp.eq.s32.totalorder (!%p3929_p13), %s3213_s0, 0 }
  0x76   : > { %553 = sbr.rel (%p3929_p13) target bundleno = 3112 (0xc28), region = 92 }
  0x7d   : > { %3051 = dma.done.wait (%p3930_p1), [#allocation3], 16   ;;  %p3931_p0 = pmov %p3930_p1 }
  0x7f   : > { %3053 = vsyncadd (%p3931_p0), [#allocation3], 4294967280  ;;  %p3932_p6 = pmov %p3931_p0 }
  0x80   : > { %p3933_p5 = pmov %p3931_p0 }
  0x81   : > { %3055 = dma.done.wait (%p3932_p6), [#allocation6], 32  }
  0x82   : > { %3057 = vsyncadd (%p3933_p5), [#allocation6], 4294967264  ;;  %p3934_p9 = pmov %p3931_p0 }
  0x83   : > { %p3935_p12 = pmov %p3931_p0 }
  0x84   : > { %3059 = dma.done.wait (%p3934_p9), [#allocation9], 16  }
  0x85   : > { %3061 = vsyncadd (%p3935_p12), [#allocation9], 4294967280  ;;  %p618_p10 = scmp.lt.s32.totalorder %s3213_s0, 1  ;;  %s3936_s25 = sld [smem:[#allocation22_spill]]  ;;  %vm626_vm0 = vcmask 261120   ;;  %v2821_v7 = vld [vmem:[%s3884_s3] sm:$0xff]   ;;  %v842_v41 = vlaneseq }
  0x86   : > { %v3086_v8 = vmov 0.0   ;;  %vm3087_vm1 = vmmov 0   ;;  %v2822_v9 = vld [vmem:[%s3884_s3 + $0x8] sm:$0xff]   ;;  %s3937_s2 = sld [smem:[#allocation23_spill]]  ;;  %v2823_v19 = vld [vmem:[%s3885_s4] sm:$0xff]   ;;  %s3088_s17 = smov 104  }
  0x87   : > { %s619_s24 = scalar_select %p618_p10, %s3213_s0, 1  ;;  %2623 = vmatprep.subr.bf16.mxu0 %v3086_v8  ;;  %2627 = vmatprep.mubr.msk.bf16.mxu0 %vm3087_vm1, %v3086_v8  ;;  %v2824_v21 = vld [vmem:[%s3885_s4 + $0x8] sm:$0xff]   ;;  %v2825_v22 = vld [vmem:[%s3886_s5] sm:$0xff]   ;;  %v3091_v39 = vmov 1983009808   ;;  %v843_v46 = vshrl.u32 %v842_v41, 7 }
  0x88   : > { %2624 = vmatpush3.bf16.msra.mxu0 %v2821_v7  ;;  %2647 = vmatprep.subr.bf16.mxu1 %v3086_v8  ;;  %v2826_v23 = vld [vmem:[%s3886_s5 + $0x8] sm:$0xff]   ;;  %s3089_s29 = smov 120   ;;  %v840_v40 = vunpack.c.l.s4 %v3091_v39  ;;  %v3092_v43 = vmov 1934713408   ;;  %vm907_vm2 = vcmask 60416   ;;  %vm1547_vm3 = vcmask 64512  }
  0x89   : > { %s2532_s21 = sshll.u32 %s619_s24, 3  ;;  %2625 = vmatprep.subr.bf16.mxu0 %v3086_v8  ;;  %2649 = vmatprep.mubr.msk.bf16.mxu1 %vm3087_vm1, %v3086_v8  ;;  %s3938_s24 = sld [smem:[#allocation24_spill]]  ;;  %v872_v44 = vunpack.c.l.s4 %v3092_v43  ;;  %vm1783_vm4 = vcmask 1043456   ;;  %vm2114_vm5 = vcmask 130048   ;;  %vm2116_vm6 = vcmask 195584  }
  0x8a   : > { %v841_v45 = vunpack.c.0.s8 %v840_v40  ;;  %s3093_s19 = smov 16   ;;  %s3094_s18 = smov 8  }
  0x8b   : > { %s3366_s22 = scalar_lea.vmem %s3936_s25, %s2532_s21  ;;  %v873_v50 = vunpack.c.0.s8 %v872_v44  ;;  %s3095_s25 = smov 24  }
  0x8c   : > { %v623_v0 = vld [vmem:[%s3366_s22] sm:$0xff]  ;;  %2626 = vmatpush3.bf16.msra.mxu0 %v2822_v9  ;;  %v3430_v51 = vsub.s32 %v841_v45, %v843_v46  ;;  %s3939_s26 = sld [smem:[#allocation25_spill]]  ;;  %s3940_s20 = sld [smem:[#allocation20_spill]] }
  0x8d   : > { %v627_v1 = vsel %vm626_vm0, %v623_v0, 0.0  ;;  %2631 = vmatprep.subr.bf16.mxu0 %v3086_v8  ;;  %v2533_v14 = vld [vmem:[%s3937_s2] ss:$0 sm:$0xff]  ;;  %s3090_s2 = smov 112   ;;  %v3434_v58 = vsub.s32 %v873_v50, %v843_v46  ;;  %s3941_s23 = sld [smem:[#allocation26_spill]] }
  0x8e   : > { %628 = vadd.xlane.f32.xlu0 %v627_v1 }
  0x8f   : > { %v2534_v16 = vld [vmem:[%s3938_s24] ss:$0 sm:$0xff] }
  0x92   : > { %p3942_p3 = scmp.ne.s32.totalorder %s3940_s20, 0 }
 0x11b   : > { %v629_v2 = vpop.xlane.xlu0 %628 }
 0x11c   : > { %v631_v3 = vmul.f32 0.03125, %v629_v2 }
 0x11e   : > { %v632_v4 = vsub.f32 %v623_v0, %v631_v3 }
 0x120   : > { %v633_v5 = vmul.f32 %v632_v4, %v632_v4 }
 0x122   : > { %v634_v6 = vsel %vm626_vm0, %v633_v5, 0.0 }
 0x123   : > { %635 = vadd.xlane.f32.xlu0 %v634_v6 }
 0x1b0   : > { %v636_v10 = vpop.xlane.xlu0 %635 }
 0x1b1   : > { %v637_v11 = vmul.f32 0.03125, %v636_v10 }
 0x1b3   : > { %v638_v12 = vadd.f32 1e-05, %v637_v11 }
 0x1b5   : > { %2839 = vrsqrt.f32 %v638_v12 }
 0x1bf   : > { %v2840_v13 = vpop.eup %2839 }
 0x1c0   : > { %v640_v15 = vmul.f32 %v2840_v13, %v632_v4 }
 0x1c2   : > { %v647_v17 = vmul.f32 %v2533_v14, %v640_v15 }
 0x1c4   : > { %v654_v18 = vadd.f32 %v2534_v16, %v647_v17 }
 0x1c6   : > { %v655_v20 = vpack.c.bf16 %v654_v18, %v654_v18 }
 0x1c8   : > { %2628 = vmatmul.mubr.msk.bf16.vlgmr.msra.gmra.mrb[0].mxu0 %vm626_vm0, %v655_v20 }
 0x1c9   : > { %2632 = vmatpush3.bf16.msra.mxu0 %v2823_v19  ;;  %2635 = vmatprep.mubr.msk.bf16.mxu0 %vm3087_vm1, %v3086_v8 }
 0x1ca   : > { %2633 = vmatprep.subr.bf16.mxu0 %v3086_v8 }
 0x1cd   : > { %2634 = vmatpush3.bf16.msra.mxu0 %v2824_v21 }
 0x1ce   : > { %2639 = vmatprep.subr.bf16.mxu0 %v3086_v8 }
 0x1d0   : > { %2636 = vmatmul.mubr.msk.bf16.vlgmr.msra.gmra.mrb[4].mxu0 %vm626_vm0, %v655_v20 }
 0x1d1   : > { %2640 = vmatpush3.bf16.msra.mxu0 %v2825_v22  ;;  %2643 = vmatprep.mubr.msk.bf16.mxu0 %vm3087_vm1, %v3086_v8 }
 0x1d2   : > { %2641 = vmatprep.subr.bf16.mxu0 %v3086_v8 }
 0x1d5   : > { %2642 = vmatpush3.bf16.msra.mxu0 %v2826_v23 }
 0x1d6   : > { %2653 = vmatprep.subr.bf16.mxu0 %v3086_v8 }
 0x1d8   : > { %2644 = vmatmul.mubr.msk.bf16.vlgmr.msra.gmra.mrb[8].mxu0 %vm626_vm0, %v655_v20 }
 0x1d9   : > { %2655 = vmatprep.mubr.msk.bf16.mxu0 %vm3087_vm1, %v3086_v8 }
 0x29b   : > { %v3416_v24 = vpop.f32.mrb[0].mxu0 }
 0x29c   : > { %v2629_v25 = vpop.f32.mrb[1].mxu0 }
 0x29d   : > { %v712_v26 = vpop.f32.mrb[2].mxu0 }
 0x29e   : > { %v2630_v27 = vpop.f32.mrb[3].mxu0 }
 0x2a3   : > { %v765_v28 = vpop.f32.mrb[4].mxu0 }
 0x2a4   : > { %1048 = vrot.lane.b32.xlu0 %v765_v28, %s3088_s17  ;;  %1042 = vrot.lane.b32.xlu1 %v765_v28, %s3089_s29  ;;  %v2637_v29 = vpop.f32.mrb[5].mxu0 }
 0x2a5   : > { %v768_v30 = vpop.f32.mrb[6].mxu0 }
 0x2a6   : > { %v2638_v31 = vpop.f32.mrb[7].mxu0 }
 0x2a8   : > { %1045 = vrot.lane.b32.xlu1 %v765_v28, %s3090_s2 }
 0x2ab   : > { %v3421_v32 = vpop.f32.mrb[8].mxu0 }
 0x2ac   : > { %828 = vrot.lane.b32.xlu1 %v3416_v24, %s3089_s29  ;;  %v2645_v33 = vpop.f32.mrb[9].mxu0 }
 0x2ad   : > { %v824_v34 = vpop.f32.mrb[10].mxu0 }
 0x2ae   : > { %v2646_v35 = vpop.f32.mrb[11].mxu0 }
 0x2b0   : > { %831 = vrot.lane.b32.xlu1 %v3416_v24, %s3090_s2 }
 0x2b4   : > { %834 = vrot.lane.b32.xlu1 %v3416_v24, %s3088_s17 }
 0x316   : > { %v1043_v36 = vpop.permute.xlu1 %1042  ;;  %v1049_v48 = vpop.permute.xlu0 %1048 }
 0x317   : > { %v1068_v54 = vcombine.high %v1043_v36, %v1049_v48  ;;  %v1067_v59 = vcombine.low %v1043_v36, %v1049_v48 }
 0x319   : > { %v1082_v63 = vrot.slane %v1068_v54, %v3430_v51  ;;  %v1075_v3 = vrot.slane %v1067_v59, %v3430_v51 }
 0x31a   : > { %v1046_v37 = vpop.permute.xlu1 %1045 }
 0x31b   : > { %v1052_v52 = vcombine.high %v765_v28, %v1046_v37  ;;  %v1051_v55 = vcombine.low %v765_v28, %v1046_v37 }
 0x31d   : > { %v1066_v60 = vrot.slane %v1052_v52, %v3430_v51  ;;  %v1059_v0 = vrot.slane %v1051_v55, %v3430_v51 }
 0x31e   : > { %v829_v38 = vpop.permute.xlu1 %828 }
 0x31f   : > { %v1099_v4 = vcombine.low %v1066_v60, %v1082_v63  ;;  %v1083_v7 = vcombine.low %v1059_v0, %v1075_v3  ;;  %v1100_v11 = vcombine.high %v1066_v60, %v1082_v63  ;;  %v1084_v15 = vcombine.high %v1059_v0, %v1075_v3 }
 0x321   : > { %v3458_v14 = vrot.slane %v1099_v4, %v3434_v58  ;;  %v3464_v18 = vrot.slane %v1083_v7, %v3434_v58  ;;  %v3470_v21 = vrot.slane %v1100_v11, %v3434_v58 }
 0x322   : > { %v832_v42 = vpop.permute.xlu1 %831 }
 0x323   : > { %v837_v47 = vcombine.low %v3416_v24, %v832_v42  ;;  %v838_v16 = vcombine.high %v3416_v24, %v832_v42  ;;  %v1133_v20 = vsel %vm907_vm2, %v3458_v14, 0.0  ;;  %v1121_v23 = vsel %vm907_vm2, %v3464_v18, 0.0 }
 0x324   : > { %v3476_v24 = vrot.slane %v1084_v15, %v3434_v58  ;;  %v1139_v26 = vsel %vm907_vm2, %v3470_v21, 0.0  ;;  %v3482_v27 = vcombine.high %v3464_v18, %v3086_v8  ;;  %v3499_v35 = vcombine.high %v3458_v14, %v3086_v8 }
 0x325   : > { %v845_v56 = vrot.slane %v837_v47, %v3430_v51  ;;  %v852_v22 = vrot.slane %v838_v16, %v3430_v51  ;;  %v3510_v39 = vcombine.high %v3470_v21, %v3086_v8 }
 0x326   : > { %v835_v49 = vpop.permute.xlu1 %834  ;;  %v1127_v28 = vsel %vm907_vm2, %v3476_v24, 0.0  ;;  %v3488_v29 = vcombine.high %v3476_v24, %v3086_v8  ;;  %v1124_v31 = vsel %vm907_vm2, %v3482_v27, 0.0 }
 0x327   : > { %v853_v53 = vcombine.low %v829_v38, %v835_v49  ;;  %v854_v12 = vcombine.high %v829_v38, %v835_v49  ;;  %v1136_v38 = vsel %vm907_vm2, %v3499_v35, 0.0  ;;  %v1142_v41 = vsel %vm907_vm2, %v3510_v39, 0.0 }
 0x328   : > { %v1130_v34 = vsel %vm907_vm2, %v3488_v29, 0.0 }
 0x329   : > { %v861_v57 = vrot.slane %v853_v53, %v3430_v51  ;;  %v868_v19 = vrot.slane %v854_v12, %v3430_v51 }
 0x32b   : > { %v869_v61 = vcombine.low %v845_v56, %v861_v57  ;;  %v870_v62 = vcombine.high %v845_v56, %v861_v57  ;;  %v885_v25 = vcombine.low %v852_v22, %v868_v19  ;;  %v886_v30 = vcombine.high %v852_v22, %v868_v19 }
 0x32d   : > { %v3440_v1 = vrot.slane %v869_v61, %v3434_v58  ;;  %v3443_v2 = vrot.slane %v870_v62, %v3434_v58  ;;  %v3493_v33 = vrot.slane %v885_v25, %v3434_v58  ;;  %v3504_v37 = vrot.slane %v886_v30, %v3434_v58 }
 0x32f   : > { %v908_v5 = vsel %vm907_vm2, %v3440_v1, 0.0  ;;  %v901_v6 = vcombine.high %v3440_v1, %v3086_v8  ;;  %v3453_v10 = vcombine.high %v3443_v2, %v3086_v8  ;;  %v914_v13 = vsel %vm907_vm2, %v3443_v2, 0.0 }
 0x330   : > { %909 = vadd.xlane.f32.xlu0 %v908_v5  ;;  %v920_v36 = vsel %vm907_vm2, %v3493_v33, 0.0  ;;  %v926_v40 = vsel %vm907_vm2, %v3504_v37, 0.0  ;;  %v3518_v42 = vcombine.high %v3493_v33, %v3086_v8  ;;  %v3524_v44 = vcombine.high %v3504_v37, %v3086_v8 }
 0x331   : > { %v911_v9 = vsel %vm907_vm2, %v901_v6, 0.0  ;;  %v917_v17 = vsel %vm907_vm2, %v3453_v10, 0.0 }
 0x332   : > { %912 = vadd.xlane.f32.xlu1 %v911_v9  ;;  %v923_v43 = vsel %vm907_vm2, %v3518_v42, 0.0  ;;  %v929_v45 = vsel %vm907_vm2, %v3524_v44, 0.0 }
 0x334   : > { %915 = vadd.xlane.f32.xlu0 %v914_v13 }
 0x336   : > { %918 = vadd.xlane.f32.xlu1 %v917_v17 }
 0x338   : > { %1134 = vadd.xlane.f32.xlu0 %v1133_v20 }
 0x33a   : > { %1122 = vadd.xlane.f32.xlu1 %v1121_v23 }
 0x33c   : > { %1140 = vadd.xlane.f32.xlu0 %v1139_v26 }
 0x33e   : > { %1128 = vadd.xlane.f32.xlu1 %v1127_v28 }
 0x340   : > { %1125 = vadd.xlane.f32.xlu0 %v1124_v31 }
 0x342   : > { %1131 = vadd.xlane.f32.xlu1 %v1130_v34 }
 0x344   : > { %921 = vadd.xlane.f32.xlu0 %v920_v36 }
 0x346   : > { %1137 = vadd.xlane.f32.xlu1 %v1136_v38 }
 0x348   : > { %927 = vadd.xlane.f32.xlu0 %v926_v40 }
 0x34a   : > { %1143 = vadd.xlane.f32.xlu1 %v1142_v41 }
 0x34e   : > { %924 = vadd.xlane.f32.xlu1 %v923_v43 }
 0x352   : > { %930 = vadd.xlane.f32.xlu1 %v929_v45 }
 0x3bd   : > { %v910_v46 = vpop.xlane.xlu0 %909 }
 0x3be   : > { %v933_v47 = vmul.f32 0.125, %v910_v46 }
 0x3bf   : > { %v913_v48 = vpop.xlane.xlu1 %912 }
 0x3c0   : > { %v3529_v49 = vsub.f32 %v3440_v1, %v933_v47  ;;  %v934_v50 = vmul.f32 0.125, %v913_v48 }
 0x3c1   : > { %v916_v52 = vpop.xlane.xlu0 %915 }
 0x3c2   : > { %v3531_v53 = vsub.f32 %v901_v6, %v934_v50  ;;  %v935_v54 = vmul.f32 0.125, %v916_v52  ;;  %v949_v55 = vmul.f32 %v3529_v49, %v3529_v49 }
 0x3c3   : > { %v919_v56 = vpop.xlane.xlu1 %918 }
 0x3c4   : > { %v3536_v57 = vsub.f32 %v3443_v2, %v935_v54  ;;  %v936_v59 = vmul.f32 0.125, %v919_v56  ;;  %v957_v60 = vsel %vm907_vm2, %v949_v55, 0.0  ;;  %v950_v61 = vmul.f32 %v3531_v53, %v3531_v53 }
 0x3c5   : > { %958 = vadd.xlane.f32.xlu0 %v957_v60  ;;  %v1135_v62 = vpop.xlane.xlu0 %1134 }
 0x3c6   : > { %v3542_v63 = vsub.f32 %v3453_v10, %v936_v59  ;;  %v960_v0 = vsel %vm907_vm2, %v950_v61, 0.0  ;;  %v951_v1 = vmul.f32 %v3536_v57, %v3536_v57  ;;  %v1149_v6 = vmul.f32 0.125, %v1135_v62 }
 0x3c7   : > { %961 = vadd.xlane.f32.xlu1 %v960_v0  ;;  %v1123_v3 = vpop.xlane.xlu1 %1122 }
 0x3c8   : > { %v1145_v2 = vmul.f32 0.125, %v1123_v3  ;;  %v963_v4 = vsel %vm907_vm2, %v951_v1, 0.0  ;;  %v952_v5 = vmul.f32 %v3542_v63, %v3542_v63  ;;  %v3557_v15 = vsub.f32 %v3458_v14, %v1149_v6 }
 0x3c9   : > { %964 = vadd.xlane.f32.xlu0 %v963_v4  ;;  %v1141_v7 = vpop.xlane.xlu0 %1140 }
 0x3ca   : > { %v3551_v9 = vsub.f32 %v3464_v18, %v1145_v2  ;;  %v966_v10 = vsel %vm907_vm2, %v952_v5, 0.0  ;;  %v1151_v16 = vmul.f32 0.125, %v1141_v7 }
 0x3cb   : > { %967 = vadd.xlane.f32.xlu1 %v966_v10  ;;  %v1129_v11 = vpop.xlane.xlu1 %1128 }
 0x3cc   : > { %v1147_v12 = vmul.f32 0.125, %v1129_v11  ;;  %v1161_v13 = vmul.f32 %v3551_v9, %v3551_v9  ;;  %v3569_v14 = vsub.f32 %v3470_v21, %v1151_v16 }
 0x3cd   : > { %v1126_v17 = vpop.xlane.xlu0 %1125 }
 0x3ce   : > { %v3560_v19 = vsub.f32 %v3476_v24, %v1147_v12  ;;  %v1146_v20 = vmul.f32 0.125, %v1126_v17  ;;  %v1169_v18 = vsel %vm907_vm2, %v1161_v13, 0.0  ;;  %v1165_v24 = vmul.f32 %v3557_v15, %v3557_v15 }
 0x3cf   : > { %1170 = vadd.xlane.f32.xlu0 %v1169_v18  ;;  %v1132_v22 = vpop.xlane.xlu1 %1131  ;;  %v1167_v47 = vmul.f32 %v3569_v14, %v3569_v14 }
 0x3d0   : > { %v3564_v23 = vsub.f32 %v3482_v27, %v1146_v20  ;;  %v1148_v25 = vmul.f32 0.125, %v1132_v22  ;;  %v1163_v26 = vmul.f32 %v3560_v19, %v3560_v19  ;;  %v1181_v43 = vsel %vm907_vm2, %v1165_v24, 0.0 }
 0x3d1   : > { %v922_v28 = vpop.xlane.xlu0 %921 }
 0x3d2   : > { %v3574_v30 = vsub.f32 %v3488_v29, %v1148_v25  ;;  %v937_v31 = vmul.f32 0.125, %v922_v28  ;;  %v1175_v34 = vsel %vm907_vm2, %v1163_v26, 0.0  ;;  %v1162_v27 = vmul.f32 %v3564_v23, %v3564_v23 }
 0x3d3   : > { %1176 = vadd.xlane.f32.xlu0 %v1175_v34  ;;  %v1138_v36 = vpop.xlane.xlu1 %1137 }
 0x3d4   : > { %v1150_v38 = vmul.f32 0.125, %v1138_v36  ;;  %v1172_v40 = vsel %vm907_vm2, %v1162_v27, 0.0  ;;  %v1164_v21 = vmul.f32 %v3574_v30, %v3574_v30  ;;  %v3584_v29 = vsub.f32 %v3493_v33, %v937_v31 }
 0x3d5   : > { %v928_v41 = vpop.xlane.xlu0 %927  ;;  %1173 = vadd.xlane.f32.xlu1 %v1172_v40 }
 0x3d6   : > { %v3587_v45 = vsub.f32 %v3499_v35, %v1150_v38  ;;  %v939_v46 = vmul.f32 0.125, %v928_v41  ;;  %v1178_v52 = vsel %vm907_vm2, %v1164_v21, 0.0  ;;  %v1187_v35 = vsel %vm907_vm2, %v1167_v47, 0.0 }
 0x3d7   : > { %1182 = vadd.xlane.f32.xlu0 %v1181_v43  ;;  %v1144_v48 = vpop.xlane.xlu1 %1143  ;;  %v953_v56 = vmul.f32 %v3584_v29, %v3584_v29 }
 0x3d8   : > { %v1152_v50 = vmul.f32 0.125, %v1144_v48  ;;  %v1166_v54 = vmul.f32 %v3587_v45, %v3587_v45  ;;  %v3595_v55 = vsub.f32 %v3504_v37, %v939_v46 }
 0x3d9   : > { %1179 = vadd.xlane.f32.xlu1 %v1178_v52 }
 0x3da   : > { %v3598_v33 = vsub.f32 %v3510_v39, %v1152_v50  ;;  %v1184_v61 = vsel %vm907_vm2, %v1166_v54, 0.0  ;;  %v969_v39 = vsel %vm907_vm2, %v953_v56, 0.0  ;;  %v955_v0 = vmul.f32 %v3595_v55, %v3595_v55 }
 0x3db   : > { %1188 = vadd.xlane.f32.xlu0 %v1187_v35  ;;  %v925_v59 = vpop.xlane.xlu1 %924 }
 0x3dc   : > { %v938_v60 = vmul.f32 0.125, %v925_v59  ;;  %v1168_v62 = vmul.f32 %v3598_v33, %v3598_v33 }
 0x3dd   : > { %1185 = vadd.xlane.f32.xlu1 %v1184_v61 }
 0x3de   : > { %v3607_v37 = vsub.f32 %v3518_v42, %v938_v60  ;;  %v1190_v2 = vsel %vm907_vm2, %v1168_v62, 0.0  ;;  %v975_v42 = vsel %vm907_vm2, %v955_v0, 0.0 }
 0x3df   : > { %970 = vadd.xlane.f32.xlu0 %v969_v39  ;;  %v931_v1 = vpop.xlane.xlu1 %930 }
 0x3e0   : > { %v940_v3 = vmul.f32 0.125, %v931_v1  ;;  %v954_v4 = vmul.f32 %v3607_v37, %v3607_v37 }
 0x3e1   : > { %1191 = vadd.xlane.f32.xlu1 %v1190_v2 }
 0x3e2   : > { %v3616_v5 = vsub.f32 %v3524_v44, %v940_v3  ;;  %v972_v6 = vsel %vm907_vm2, %v954_v4, 0.0 }
 0x3e3   : > { %976 = vadd.xlane.f32.xlu0 %v975_v42 }
 0x3e4   : > { %v956_v7 = vmul.f32 %v3616_v5, %v3616_v5 }
 0x3e5   : > { %973 = vadd.xlane.f32.xlu1 %v972_v6 }
 0x3e6   : > { %v978_v10 = vsel %vm907_vm2, %v956_v7, 0.0 }
 0x3e9   : > { %979 = vadd.xlane.f32.xlu1 %v978_v10 }
 0x452   : > { %v959_v11 = vpop.xlane.xlu0 %958 }
 0x453   : > { %v981_v41 = vmul.f32 0.125, %v959_v11 }
 0x454   : > { %v962_v12 = vpop.xlane.xlu1 %961 }
 0x455   : > { %v982_v17 = vmul.f32 0.125, %v962_v12  ;;  %v989_v35 = vadd.f32 1e-05, %v981_v41 }
 0x456   : > { %v965_v13 = vpop.xlane.xlu0 %964 }
 0x457   : > { %v983_v22 = vmul.f32 0.125, %v965_v13  ;;  %v990_v26 = vadd.f32 1e-05, %v982_v17 }
 0x458   : > { %v968_v20 = vpop.xlane.xlu1 %967 }
 0x459   : > { %v984_v34 = vmul.f32 0.125, %v968_v20  ;;  %v991_v38 = vadd.f32 1e-05, %v983_v22 }
 0x45b   : > { %v992_v48 = vadd.f32 1e-05, %v984_v34 }
 0x45c   : > { %v1171_v16 = vpop.xlane.xlu0 %1170 }
 0x45d   : > { %v1193_v44 = vmul.f32 0.125, %v1171_v16 }
 0x45f   : > { %v1201_v27 = vadd.f32 1e-05, %v1193_v44 }
 0x460   : > { %v1177_v18 = vpop.xlane.xlu0 %1176 }
 0x461   : > { %v1195_v25 = vmul.f32 0.125, %v1177_v18 }
 0x462   : > { %v1174_v28 = vpop.xlane.xlu1 %1173 }
 0x463   : > { %v1203_v24 = vadd.f32 1e-05, %v1195_v25  ;;  %v1194_v31 = vmul.f32 0.125, %v1174_v28  ;;  %v2546_v25 = vld [vmem:[#allocation7] ss:$0 sm:$0xff] }
 0x464   : > { %v1183_v36 = vpop.xlane.xlu0 %1182 }
 0x465   : > { %2841 = vrsqrt.f32 %v1203_v24  ;;  %v1202_v40 = vadd.f32 1e-05, %v1194_v31  ;;  %v1197_v21 = vmul.f32 0.125, %v1183_v36 }
 0x466   : > { %2843 = vrsqrt.f32 %v990_v26  ;;  %v1180_v43 = vpop.xlane.xlu1 %1179 }
 0x467   : > { %2845 = vrsqrt.f32 %v1202_v40  ;;  %v1205_v46 = vadd.f32 1e-05, %v1197_v21  ;;  %v1196_v47 = vmul.f32 0.125, %v1180_v43 }
 0x468   : > { %2847 = vrsqrt.f32 %v1201_v27  ;;  %v1189_v50 = vpop.xlane.xlu0 %1188 }
 0x469   : > { %2849 = vrsqrt.f32 %v991_v38  ;;  %v1204_v52 = vadd.f32 1e-05, %v1196_v47  ;;  %v1199_v54 = vmul.f32 0.125, %v1189_v50  ;;  %v2547_v50 = vld [vmem:[#allocation8] ss:$0 sm:$0xff] }
 0x46a   : > { %2851 = vrsqrt.f32 %v1205_v46  ;;  %v1186_v56 = vpop.xlane.xlu1 %1185 }
 0x46b   : > { %2853 = vrsqrt.f32 %v1204_v52  ;;  %v1207_v59 = vadd.f32 1e-05, %v1199_v54  ;;  %v1198_v60 = vmul.f32 0.125, %v1186_v56 }
 0x46c   : > { %2855 = vrsqrt.f32 %v992_v48  ;;  %v971_v61 = vpop.xlane.xlu0 %970 }
 0x46d   : > { %2857 = vrsqrt.f32 %v1207_v59  ;;  %v1206_v62 = vadd.f32 1e-05, %v1198_v60  ;;  %v985_v39 = vmul.f32 0.125, %v971_v61 }
 0x46e   : > { %2859 = vrsqrt.f32 %v989_v35  ;;  %v1192_v0 = vpop.xlane.xlu1 %1191 }
 0x46f   : > { %v2842_v1 = vpop.eup %2841  ;;  %2861 = vrsqrt.f32 %v1206_v62  ;;  %v993_v3 = vadd.f32 1e-05, %v985_v39  ;;  %v1200_v2 = vmul.f32 0.125, %v1192_v0 }
 0x470   : > { %v2844_v4 = vpop.eup %2843  ;;  %v977_v42 = vpop.xlane.xlu0 %976  ;;  %v1219_v12 = vmul.f32 %v2842_v1, %v3560_v19 }
 0x471   : > { %v2846_v6 = vpop.eup %2845  ;;  %v1208_v7 = vadd.f32 1e-05, %v1200_v2  ;;  %v987_v10 = vmul.f32 0.125, %v977_v42  ;;  %2863 = vrsqrt.f32 %v993_v3 }
 0x472   : > { %v2848_v11 = vpop.eup %2847  ;;  %v974_v13 = vpop.xlane.xlu1 %973  ;;  %v1218_v17 = vmul.f32 %v2846_v6, %v3564_v23  ;;  %v1233_v31 = vmul.f32 %v2546_v25, %v1219_v12  ;;  %v2545_v6 = vld [vmem:[#allocation5] ss:$0 sm:$0xff] }
 0x473   : > { %v2850_v16 = vpop.eup %2849  ;;  %2865 = vrsqrt.f32 %v1208_v7  ;;  %v995_v20 = vadd.f32 1e-05, %v987_v10  ;;  %v986_v44 = vmul.f32 0.125, %v974_v13  ;;  %v1217_v26 = vmul.f32 %v2848_v11, %v3551_v9 }
 0x474   : > { %v2852_v18 = vpop.eup %2851  ;;  %v1232_v36 = vmul.f32 %v2546_v25, %v1218_v17  ;;  %v1006_v9 = vmul.f32 %v2844_v4, %v3531_v53  ;;  %v1247_v59 = vadd.f32 %v2547_v50, %v1233_v31 }
 0x475   : > { %v2854_v22 = vpop.eup %2853  ;;  %2867 = vrsqrt.f32 %v995_v20  ;;  %v994_v28 = vadd.f32 1e-05, %v986_v44  ;;  %v1221_v38 = vmul.f32 %v2852_v18, %v3557_v15  ;;  %v1231_v47 = vmul.f32 %v2546_v25, %v1217_v26 }
 0x476   : > { %v2856_v24 = vpop.eup %2855  ;;  %v1220_v34 = vmul.f32 %v2854_v22, %v3574_v30  ;;  %v980_v19 = vpop.xlane.xlu1 %979  ;;  %v1007_v30 = vmul.f32 %v2850_v16, %v3536_v57  ;;  %v1246_v56 = vadd.f32 %v2547_v50, %v1232_v36 }
 0x477   : > { %v2858_v27 = vpop.eup %2857  ;;  %2869 = vrsqrt.f32 %v994_v28  ;;  %v988_v23 = vmul.f32 0.125, %v980_v19  ;;  %v1008_v46 = vmul.f32 %v2856_v24, %v3542_v63  ;;  %v1235_v35 = vmul.f32 %v2546_v25, %v1221_v38 }
 0x478   : > { %v2860_v40 = vpop.eup %2859  ;;  %v1234_v21 = vmul.f32 %v2546_v25, %v1220_v34  ;;  %v1223_v41 = vmul.f32 %v2858_v27, %v3569_v14  ;;  %v2544_v14 = vld [vmem:[#allocation2] ss:$0 sm:$0xff]  ;;  %v1245_v63 = vadd.f32 %v2547_v50, %v1231_v47 }
 0x479   : > { %v2862_v43 = vpop.eup %2861  ;;  %v996_v48 = vadd.f32 1e-05, %v988_v23  ;;  %v1005_v61 = vmul.f32 %v2860_v40, %v3529_v49  ;;  %v1022_v62 = vmul.f32 %v2544_v14, %v1008_v46  ;;  %v1020_v2 = vmul.f32 %v2544_v14, %v1006_v9 }
 0x47a   : > { %v1237_v52 = vmul.f32 %v2546_v25, %v1223_v41  ;;  %v1222_v54 = vmul.f32 %v2862_v43, %v3587_v45  ;;  %v1248_v15 = vadd.f32 %v2547_v50, %v1234_v21  ;;  %v1021_v45 = vmul.f32 %v2544_v14, %v1007_v30 }
 0x47b   : > { %2871 = vrsqrt.f32 %v996_v48  ;;  %v2864_v60 = vpop.eup %2863  ;;  %v1249_v4 = vadd.f32 %v2547_v50, %v1235_v35  ;;  %v1325_v42 = vcombine.low %v1245_v63, %v1247_v59  ;;  %v1019_v12 = vmul.f32 %v2544_v14, %v1005_v61 }
 0x47c   : > { %v1251_v39 = vadd.f32 %v2547_v50, %v1237_v52  ;;  %v1333_v0 = vcombine.low %v1246_v56, %v1248_v15  ;;  %v1236_v1 = vmul.f32 %v2546_v25, %v1222_v54  ;;  %v1009_v7 = vmul.f32 %v2864_v60, %v3584_v29 }
 0x47d   : > { %v2866_v53 = vpop.eup %2865  ;;  %v1036_v13 = vadd.f32 %v2545_v6, %v1022_v62  ;;  %v1034_v22 = vadd.f32 %v2545_v6, %v1020_v2  ;;  %v1035_v26 = vadd.f32 %v2545_v6, %v1021_v45  ;;  %v1332_v28 = vrot.slane %v1325_v42, %v3430_v51 }
 0x47e   : > { %v1224_v57 = vmul.f32 %v2866_v53, %v3598_v33  ;;  %v1340_v16 = vrot.slane %v1333_v0, %v3430_v51  ;;  %v1341_v17 = vcombine.low %v1249_v4, %v1251_v39  ;;  %v1250_v44 = vadd.f32 %v2547_v50, %v1236_v1 }
 0x47f   : > { %v2868_v3 = vpop.eup %2867  ;;  %v1023_v24 = vmul.f32 %v2544_v14, %v1009_v7  ;;  %v1033_v31 = vadd.f32 %v2545_v6, %v1019_v12  ;;  %v1261_v19 = vcombine.low %v1034_v22, %v1036_v13 }
 0x480   : > { %v1238_v10 = vmul.f32 %v2546_v25, %v1224_v57  ;;  %v1011_v11 = vmul.f32 %v2868_v3, %v3595_v55  ;;  %v1348_v55 = vrot.slane %v1341_v17, %v3430_v51  ;;  %v1357_v34 = vcombine.low %v1332_v28, %v1340_v16 }
 0x481   : > { %v2870_v49 = vpop.eup %2869  ;;  %v1253_v23 = vcombine.low %v1033_v31, %v1035_v26  ;;  %v1037_v40 = vadd.f32 %v2545_v6, %v1023_v24  ;;  %v1268_v46 = vrot.slane %v1261_v19, %v3430_v51  ;;  %v1358_v47 = vcombine.high %v1332_v28, %v1340_v16 }
 0x482   : > { %v1025_v20 = vmul.f32 %v2544_v14, %v1011_v11  ;;  %v1010_v33 = vmul.f32 %v2870_v49, %v3607_v37  ;;  %v1252_v18 = vadd.f32 %v2547_v50, %v1238_v10  ;;  %v1365_v9 = vrot.slane %v1357_v34, %v3434_v58 }
 0x483   : > { %v1260_v54 = vrot.slane %v1253_v23, %v3430_v51  ;;  %v1372_v60 = vrot.slane %v1358_v47, %v3434_v58 }
 0x484   : > { %v1349_v29 = vcombine.low %v1250_v44, %v1252_v18  ;;  %v1039_v27 = vadd.f32 %v2545_v6, %v1025_v20  ;;  %v1024_v36 = vmul.f32 %v2544_v14, %v1010_v33 }
 0x485   : > { %v2872_v25 = vpop.eup %2871  ;;  %v1285_v59 = vcombine.low %v1260_v54, %v1268_v46  ;;  %v1286_v4 = vcombine.high %v1260_v54, %v1268_v46 }
 0x486   : > { %v1012_v38 = vmul.f32 %v2872_v25, %v3616_v5  ;;  %v1356_v37 = vrot.slane %v1349_v29, %v3430_v51  ;;  %v1038_v48 = vadd.f32 %v2545_v6, %v1024_v36  ;;  %v1269_v52 = vcombine.low %v1037_v40, %v1039_v27 }
 0x487   : > { %v1293_v3 = vrot.slane %v1285_v59, %v3434_v58  ;;  %v1300_v17 = vrot.slane %v1286_v4, %v3434_v58 }
 0x488   : > { %v1026_v21 = vmul.f32 %v2544_v14, %v1012_v38  ;;  %v1373_v41 = vcombine.low %v1348_v55, %v1356_v37  ;;  %v1374_v43 = vcombine.high %v1348_v55, %v1356_v37  ;;  %v1276_v53 = vrot.slane %v1269_v52, %v3430_v51 }
 0x48a   : > { %v1040_v50 = vadd.f32 %v2545_v6, %v1026_v21  ;;  %v1381_v30 = vrot.slane %v1373_v41, %v3434_v58  ;;  %v1388_v5 = vrot.slane %v1374_v43, %v3434_v58 }
 0x48c   : > { %v1389_v15 = vcombine.low %v1365_v9, %v1381_v30  ;;  %v1390_v35 = vcombine.high %v1365_v9, %v1381_v30  ;;  %v1277_v56 = vcombine.low %v1038_v48, %v1040_v50  ;;  %v1391_v63 = vcombine.low %v1372_v60, %v1388_v5 }
 0x48d   : > { %v1392_v57 = vcombine.high %v1372_v60, %v1388_v5 }
 0x48e   : > { %v1393_v14 = vpack.c.bf16 %v1389_v15, %v1389_v15  ;;  %v1394_v61 = vpack.c.bf16 %v1390_v35, %v1390_v35  ;;  %v1284_v62 = vrot.slane %v1277_v56, %v3430_v51  ;;  %v1395_v7 = vpack.c.bf16 %v1391_v63, %v1391_v63 }
 0x48f   : > { %v1396_v10 = vpack.c.bf16 %v1392_v57, %v1392_v57 }
 0x490   : > { %v1552_v39 = vsel %vm1547_vm3, %v1393_v14, 0  ;;  %v1598_v0 = vsel %vm1547_vm3, %v1394_v61, 0  ;;  %v1301_v1 = vcombine.low %v1276_v53, %v1284_v62  ;;  %v1302_v2 = vcombine.high %v1276_v53, %v1284_v62 }
 0x491   : > { %2648 = vmatpush3.bf16.xpose.msra.mxu1 %v1552_v39  ;;  %2654 = vmatpush3.bf16.xpose.msra.mxu0 %v1598_v0  ;;  %v1644_v13 = vsel %vm1547_vm3, %v1395_v7, 0  ;;  %v1690_v16 = vsel %vm1547_vm3, %v1396_v10, 0 }
 0x492   : > { %v1309_v45 = vrot.slane %v1301_v1, %v3434_v58  ;;  %2659 = vmatprep.subr.bf16.mxu1 %v3086_v8  ;;  %2665 = vmatprep.subr.bf16.mxu0 %v3086_v8  ;;  %v1316_v12 = vrot.slane %v1302_v2, %v3434_v58 }
 0x494   : > { %v1317_v42 = vcombine.low %v1293_v3, %v1309_v45  ;;  %v1318_v6 = vcombine.high %v1293_v3, %v1309_v45  ;;  %v1319_v20 = vcombine.low %v1300_v17, %v1316_v12  ;;  %v1320_v33 = vcombine.high %v1300_v17, %v1316_v12 }
 0x496   : > { %v1321_v11 = vpack.c.bf16 %v1317_v42, %v1317_v42  ;;  %v1322_v49 = vpack.c.bf16 %v1318_v6, %v1318_v6  ;;  %v1323_v44 = vpack.c.bf16 %v1319_v20, %v1319_v20  ;;  %v1324_v18 = vpack.c.bf16 %v1320_v33, %v1320_v33 }
 0x498   : > { %2650 = vmatmul.mubr.msk.bf16.vlgmr.msra.gmra.mrb[0].mxu1 %vm1547_vm3, %v1321_v11  ;;  %2656 = vmatmul.mubr.msk.bf16.vlgmr.msra.gmra.mrb[12].mxu0 %vm1547_vm3, %v1322_v49 }
 0x499   : > { %2660 = vmatpush3.bf16.xpose.msra.mxu1 %v1644_v13  ;;  %2666 = vmatpush3.bf16.xpose.msra.mxu0 %v1690_v16 }
 0x49a   : > { %2661 = vmatprep.mubr.msk.bf16.mxu1 %vm3087_vm1, %v3086_v8  ;;  %2667 = vmatprep.mubr.msk.bf16.mxu0 %vm3087_vm1, %v3086_v8 }
 0x49b   : > { %2671 = vmatprep.subr.bf16.mxu1 %v3086_v8  ;;  %2677 = vmatprep.subr.bf16.mxu0 %v3086_v8 }
 0x4a0   : > { %2662 = vmatmul.mubr.msk.bf16.vlgmr.msra.gmra.mrb[4].mxu1 %vm1547_vm3, %v1323_v44  ;;  %2668 = vmatmul.mubr.msk.bf16.vlgmr.msra.gmra.mrb[16].mxu0 %vm1547_vm3, %v1324_v18 }
 0x4a1   : > { %2673 = vmatprep.mubr.msk.bf16.mxu1 %vm3087_vm1, %v3086_v8  ;;  %2679 = vmatprep.mubr.msk.bf16.mxu0 %vm3087_vm1, %v3086_v8 }
 0x56b   : > { %v1588_v22 = vpop.f32.mrb[0].mxu1  ;;  %v1634_v26 = vpop.f32.mrb[12].mxu0 }
 0x56c   : > { %v2651_v28 = vpop.f32.mrb[1].mxu1  ;;  %v2657_v24 = vpop.f32.mrb[13].mxu0  ;;  %v1732_v29 = vsel %vm1547_vm3, %v1588_v22, -inf  ;;  %v1735_v25 = vsel %vm1547_vm3, %v1634_v26, -inf }
 0x56d   : > { %1733 = vmax.xlane.f32.xlu0 %v1732_v29  ;;  %v1591_v31 = vpop.f32.mrb[2].mxu1  ;;  %1736 = vmax.xlane.f32.xlu1 %v1735_v25  ;;  %v1637_v55 = vpop.f32.mrb[14].mxu0 }
 0x56e   : > { %v2652_v34 = vpop.f32.mrb[3].mxu1  ;;  %v2658_v19 = vpop.f32.mrb[15].mxu0 }
 0x573   : > { %v1680_v27 = vpop.f32.mrb[4].mxu1  ;;  %v1726_v36 = vpop.f32.mrb[16].mxu0 }
 0x574   : > { %v2663_v38 = vpop.f32.mrb[5].mxu1  ;;  %v2669_v37 = vpop.f32.mrb[17].mxu0  ;;  %v1738_v23 = vsel %vm1547_vm3, %v1680_v27, -inf  ;;  %v1741_v40 = vsel %vm1547_vm3, %v1726_v36, -inf }
 0x575   : > { %1739 = vmax.xlane.f32.xlu0 %v1738_v23  ;;  %v1683_v21 = vpop.f32.mrb[6].mxu1  ;;  %1742 = vmax.xlane.f32.xlu1 %v1741_v40  ;;  %v1729_v41 = vpop.f32.mrb[18].mxu0 }
 0x576   : > { %v2664_v43 = vpop.f32.mrb[7].mxu1  ;;  %v2670_v9 = vpop.f32.mrb[19].mxu0 }
 0x586   : > { %1401 = vrot.lane.b32.xlu1 %v3421_v32, %s3090_s2 }
 0x5fa   : > { %v1734_v46 = vpop.xlane.xlu0 %1733  ;;  %v1737_v47 = vpop.xlane.xlu1 %1736 }
 0x5fb   : > { %v1744_v48 = vsub.f32 %v1588_v22, %v1734_v46  ;;  %v1745_v50 = vsub.f32 %v1634_v26, %v1737_v47 }
 0x5fd   : > { %v1748_v30 = vmul.f32 1.442695, %v1744_v48  ;;  %v1750_v52 = vmul.f32 1.442695, %v1745_v50 }
 0x5ff   : > { %2873 = vpow2.f32 %v1748_v30 }
 0x600   : > { %2875 = vpow2.f32 %v1750_v52 }
 0x602   : > { %v1740_v56 = vpop.xlane.xlu0 %1739  ;;  %v1743_v59 = vpop.xlane.xlu1 %1742 }
 0x603   : > { %v1746_v60 = vsub.f32 %v1680_v27, %v1740_v56  ;;  %v1747_v14 = vsub.f32 %v1726_v36, %v1743_v59 }
 0x605   : > { %v1752_v61 = vmul.f32 1.442695, %v1746_v60  ;;  %v1754_v53 = vmul.f32 1.442695, %v1747_v14 }
 0x606   : > { %v1402_v1 = vpop.permute.xlu1 %1401 }
 0x607   : > { %2877 = vpow2.f32 %v1752_v61  ;;  %v1407_v2 = vcombine.low %v3421_v32, %v1402_v1  ;;  %v1408_v45 = vcombine.high %v3421_v32, %v1402_v1 }
 0x608   : > { %2879 = vpow2.f32 %v1754_v53 }
 0x609   : > { %v3681_v54 = vpop.eup %2873  ;;  %v1415_v10 = vrot.slane %v1407_v2, %v3430_v51  ;;  %v1422_v11 = vrot.slane %v1408_v45, %v3430_v51 }
 0x60a   : > { %v3683_v5 = vpop.eup %2875  ;;  %v1756_v15 = vsel %vm1547_vm3, %v3681_v54, 0.0 }
 0x60b   : > { %1757 = vadd.xlane.f32.xlu0 %v1756_v15  ;;  %v1759_v35 = vsel %vm1547_vm3, %v3683_v5, 0.0 }
 0x60c   : > { %1760 = vadd.xlane.f32.xlu1 %v1759_v35 }
 0x611   : > { %v3693_v62 = vpop.eup %2877 }
 0x612   : > { %v3695_v63 = vpop.eup %2879  ;;  %v1762_v39 = vsel %vm1547_vm3, %v3693_v62, 0.0 }
 0x613   : > { %v1765_v0 = vsel %vm1547_vm3, %v3695_v63, 0.0 }
 0x61d   : > { %1404 = vrot.lane.b32.xlu1 %v3421_v32, %s3088_s17 }
 0x621   : > { %1398 = vrot.lane.b32.xlu0 %v3421_v32, %s3089_s29 }
 0x640   : > { %1763 = vadd.xlane.f32.xlu0 %v1762_v39 }
 0x641   : > { %1766 = vadd.xlane.f32.xlu1 %v1765_v0 }
 0x698   : > { %v1758_v57 = vpop.xlane.xlu0 %1757 }
 0x699   : > { %v1761_v3 = vpop.xlane.xlu1 %1760  ;;  %2881 = vrcp.f32 %v1758_v57 }
 0x69a   : > { %2883 = vrcp.f32 %v1761_v3 }
 0x69c   : > { %v1399_v4 = vpop.permute.xlu0 %1398 }
 0x69d   : > { %v1405_v42 = vpop.permute.xlu1 %1404 }
 0x69e   : > { %v1423_v6 = vcombine.low %v1399_v4, %v1405_v42  ;;  %v1424_v7 = vcombine.high %v1399_v4, %v1405_v42 }
 0x6a0   : > { %v1431_v49 = vrot.slane %v1423_v6, %v3430_v51  ;;  %v1438_v12 = vrot.slane %v1424_v7, %v3430_v51 }
 0x6a2   : > { %v1439_v13 = vcombine.low %v1415_v10, %v1431_v49  ;;  %v1440_v16 = vcombine.high %v1415_v10, %v1431_v49  ;;  %v1455_v17 = vcombine.low %v1422_v11, %v1438_v12  ;;  %v1456_v20 = vcombine.high %v1422_v11, %v1438_v12 }
 0x6a3   : > { %v2882_v23 = vpop.eup %2881 }
 0x6a4   : > { %v1447_v32 = vrot.slane %v1439_v13, %v3434_v58  ;;  %v1454_v33 = vrot.slane %v1440_v16, %v3434_v58  ;;  %v1463_v44 = vrot.slane %v1455_v17, %v3434_v58  ;;  %v1470_v18 = vrot.slane %v1456_v20, %v3434_v58  ;;  %v2884_v41 = vpop.eup %2883 }
 0x6a5   : > { %v1772_v48 = vmul.f32 %v2882_v23, %v3681_v54  ;;  %v1773_v50 = vmul.f32 %v2884_v41, %v3683_v5 }
 0x6a6   : > { %v1475_v22 = vcombine.low %v1447_v32, %v1454_v33  ;;  %v2548_v26 = vcombine.high %v1447_v32, %v1454_v33  ;;  %v1491_v28 = vcombine.low %v1463_v44, %v1470_v18  ;;  %v2549_v24 = vcombine.high %v1463_v44, %v1470_v18 }
 0x6a7   : > { %v1776_v60 = vpack.c.bf16 %v1772_v48, %v1772_v48  ;;  %v1777_v14 = vpack.c.bf16 %v1773_v50, %v1773_v50 }
 0x6a8   : > { %v1482_v29 = vrot.slane %v1475_v22, %v3430_v51  ;;  %v1490_v25 = vrot.slane %v2548_v26, %v3430_v51  ;;  %v1498_v31 = vrot.slane %v1491_v28, %v3430_v51  ;;  %v1506_v55 = vrot.slane %v2549_v24, %v3430_v51 }
 0x6aa   : > { %v1507_v34 = vcombine.low %v1482_v29, %v1490_v25  ;;  %v1508_v19 = vcombine.high %v1482_v29, %v1490_v25  ;;  %v1523_v27 = vcombine.low %v1498_v31, %v1506_v55  ;;  %v1524_v36 = vcombine.high %v1498_v31, %v1506_v55 }
 0x6ac   : > { %v1515_v38 = vrot.slane %v1507_v34, %v3434_v58  ;;  %v1522_v37 = vrot.slane %v1508_v19, %v3434_v58  ;;  %v1531_v40 = vrot.slane %v1523_v27, %v3434_v58  ;;  %v1538_v21 = vrot.slane %v1524_v36, %v3434_v58  ;;  %v2827_v19 = vld [vmem:[%s3891_s10] sm:$0xff]  }
 0x6ae   : > { %v1539_v43 = vcombine.low %v1515_v38, %v1531_v40  ;;  %v1540_v9 = vcombine.high %v1515_v38, %v1531_v40  ;;  %v1541_v46 = vcombine.low %v1522_v37, %v1538_v21  ;;  %v1542_v47 = vcombine.high %v1522_v37, %v1538_v21 }
 0x6b0   : > { %v1543_v30 = vpack.c.bf16 %v1539_v43, %v1539_v43  ;;  %v1544_v52 = vpack.c.bf16 %v1540_v9, %v1540_v9  ;;  %v1545_v56 = vpack.c.bf16 %v1541_v46, %v1541_v46  ;;  %v1546_v59 = vpack.c.bf16 %v1542_v47, %v1542_v47  ;;  %v2828_v43 = vld [vmem:[%s3891_s10 + $0x8] sm:$0xff]  }
 0x6b2   : > { %v1785_v15 = vsel %vm1783_vm4, %v1543_v30, 0  ;;  %v1831_v35 = vsel %vm1783_vm4, %v1544_v52, 0  ;;  %v1877_v54 = vsel %vm1783_vm4, %v1545_v56, 0  ;;  %v1923_v5 = vsel %vm1783_vm4, %v1546_v59, 0 }
 0x6b3   : > { %2672 = vmatpush3.bf16.msra.mxu1 %v1785_v15  ;;  %2678 = vmatpush3.bf16.msra.mxu0 %v1831_v35 }
 0x6b4   : > { %2683 = vmatprep.subr.bf16.mxu1 %v3086_v8  ;;  %2689 = vmatprep.subr.bf16.mxu0 %v3086_v8 }
 0x6b6   : > { %2674 = vmatmul.mubr.msk.bf16.vlgmr.msra.gmra.mrb[8].mxu1 %vm1547_vm3, %v1776_v60  ;;  %2680 = vmatmul.mubr.msk.bf16.vlgmr.msra.gmra.mrb[20].mxu0 %vm1547_vm3, %v1777_v14 }
 0x6b7   : > { %2684 = vmatpush3.bf16.msra.mxu1 %v1877_v54  ;;  %2690 = vmatpush3.bf16.msra.mxu0 %v1923_v5 }
 0x6b8   : > { %2685 = vmatprep.mubr.msk.bf16.mxu1 %vm3087_vm1, %v3086_v8  ;;  %2691 = vmatprep.mubr.msk.bf16.mxu0 %vm3087_vm1, %v3086_v8 }
 0x6b9   : > { %2695 = vmatprep.subr.bf16.mxu1 %v3086_v8  ;;  %2703 = vmatprep.subr.bf16.mxu0 %v3086_v8 }
 0x6cd   : > { %v1764_v61 = vpop.xlane.xlu0 %1763 }
 0x6ce   : > { %2885 = vrcp.f32 %v1764_v61  ;;  %v1767_v53 = vpop.xlane.xlu1 %1766 }
 0x6cf   : > { %2887 = vrcp.f32 %v1767_v53 }
 0x6d8   : > { %v2886_v39 = vpop.eup %2885 }
 0x6d9   : > { %v2888_v0 = vpop.eup %2887  ;;  %v1774_v1 = vmul.f32 %v2886_v39, %v3693_v62 }
 0x6da   : > { %v1775_v57 = vmul.f32 %v2888_v0, %v3695_v63 }
 0x6db   : > { %v1778_v3 = vpack.c.bf16 %v1774_v1, %v1774_v1 }
 0x6dc   : > { %v1779_v2 = vpack.c.bf16 %v1775_v57, %v1775_v57 }
 0x6dd   : > { %2686 = vmatmul.mubr.msk.bf16.vlgmr.msra.gmra.mrb[12].mxu1 %vm1547_vm3, %v1778_v3  ;;  %v2560_v3 = vld [vmem:[%s3892_s11] ss:$0 sm:$0xff] }
 0x6de   : > { %2692 = vmatmul.mubr.msk.bf16.vlgmr.msra.gmra.mrb[24].mxu0 %vm1547_vm3, %v1779_v2  ;;  %2699 = vmatprep.mubr.msk.bf16.mxu1 %vm3087_vm1, %v3086_v8 }
 0x6df   : > { %2707 = vmatprep.mubr.msk.bf16.mxu0 %vm3087_vm1, %v3086_v8  ;;  %2696 = vmatpush3.bf16.msra.mxu1 %v2827_v19  ;;  %v2835_v19 = vld [vmem:[%s3897_s16 + $0x20] sm:$0xff]  }
 0x6e0   : > { %2697 = vmatprep.subr.bf16.mxu1 %v3086_v8 }
 0x6e3   : > { %2698 = vmatpush3.bf16.msra.mxu1 %v2828_v43 }
 0x6e4   : > { %2711 = vmatprep.subr.bf16.mxu1 %v3086_v8 }
 0x789   : > { %v1821_v45 = vpop.f32.mrb[8].mxu1  ;;  %v1867_v4 = vpop.f32.mrb[20].mxu0 }
 0x78a   : > { %v2675_v42 = vpop.f32.mrb[9].mxu1  ;;  %v2681_v6 = vpop.f32.mrb[21].mxu0 }
 0x78b   : > { %v1824_v7 = vpop.f32.mrb[10].mxu1  ;;  %v1870_v62 = vpop.f32.mrb[22].mxu0  ;;  %v2893_v6 = vld [vmem:[%s3366_s22] sm:$0xff]  ;;  %s2580_s22 = sshll.u32 %s3213_s0, 7 }
 0x78c   : > { %v2676_v10 = vpop.f32.mrb[11].mxu1  ;;  %v2682_v63 = vpop.f32.mrb[23].mxu0  ;;  %s3838_s24 = scalar_lea.hbm %s3941_s23, %s2580_s22 }
 0x7b0   : > { %v1913_v11 = vpop.f32.mrb[12].mxu1 }
 0x7b1   : > { %v1965_v49 = vcombine.low %v1821_v45, %v1913_v11  ;;  %v1966_v12 = vcombine.high %v1821_v45, %v1913_v11  ;;  %v1959_v13 = vpop.f32.mrb[24].mxu0  ;;  %v2687_v16 = vpop.f32.mrb[13].mxu1 }
 0x7b2   : > { %v1981_v17 = vcombine.low %v1867_v4, %v1959_v13  ;;  %v1982_v20 = vcombine.high %v1867_v4, %v1959_v13  ;;  %v2693_v32 = vpop.f32.mrb[25].mxu0  ;;  %v1916_v33 = vpop.f32.mrb[14].mxu1  ;;  %v2829_v16 = vld [vmem:[%s3895_s14] sm:$0xff]  }
 0x7b3   : > { %v1973_v44 = vrot.slane %v1965_v49, %v3430_v51  ;;  %v1980_v18 = vrot.slane %v1966_v12, %v3430_v51  ;;  %v1962_v22 = vpop.f32.mrb[26].mxu0  ;;  %v2688_v26 = vpop.f32.mrb[15].mxu1  ;;  %2704 = vmatpush3.bf16.msra.mxu0 %v2829_v16 }
 0x7b4   : > { %v1989_v28 = vrot.slane %v1981_v17, %v3430_v51  ;;  %v1996_v24 = vrot.slane %v1982_v20, %v3430_v51  ;;  %v2694_v29 = vpop.f32.mrb[27].mxu0  ;;  %v2830_v17 = vld [vmem:[%s3895_s14 + $0x8] sm:$0xff]   ;;  %2705 = vmatprep.subr.bf16.mxu0 %v3086_v8  ;;  %v2831_v20 = vld [vmem:[%s3897_s16] sm:$0xff]  }
 0x7b5   : > { %v2564_v22 = vld [vmem:[%s3893_s12] ss:$0 sm:$0xff] }
 0x7b6   : > { %v1997_v25 = vcombine.low %v1973_v44, %v1989_v28  ;;  %v1998_v31 = vcombine.high %v1973_v44, %v1989_v28  ;;  %v2013_v55 = vcombine.low %v1980_v18, %v1996_v24  ;;  %v2014_v34 = vcombine.high %v1980_v18, %v1996_v24  ;;  %v2565_v28 = vld [vmem:[%s3894_s13] ss:$0 sm:$0xff] }
 0x7b7   : > { %2706 = vmatpush3.bf16.msra.mxu0 %v2830_v17 }
 0x7b8   : > { %v2005_v27 = vrot.slane %v1997_v25, %v3434_v58  ;;  %v2012_v36 = vrot.slane %v1998_v31, %v3434_v58  ;;  %v2021_v38 = vrot.slane %v2013_v55, %v3434_v58  ;;  %v2028_v37 = vrot.slane %v2014_v34, %v3434_v58  ;;  %v2832_v31 = vld [vmem:[%s3897_s16 + $0x8] sm:$0xff]   ;;  %v2833_v55 = vld [vmem:[%s3897_s16 + $0x10] sm:$0xff]   ;;  %v2834_v34 = vld [vmem:[%s3897_s16 + $0x18] sm:$0xff]  }
 0x7ba   : > { %v2033_v23 = vcombine.low %v2005_v27, %v2012_v36  ;;  %v2558_v40 = vcombine.high %v2005_v27, %v2012_v36  ;;  %v2049_v21 = vcombine.low %v2021_v38, %v2028_v37  ;;  %v2559_v41 = vcombine.high %v2021_v38, %v2028_v37  ;;  %v2836_v27 = vld [vmem:[%s3897_s16 + $0x28] sm:$0xff]   ;;  %v2837_v36 = vld [vmem:[%s3897_s16 + $0x30] sm:$0xff]   ;;  %v2838_v38 = vld [vmem:[%s3897_s16 + $0x38] sm:$0xff]  }
 0x7bb   : > { %v2566_v37 = vld [vmem:[%s3896_s15] ss:$0 sm:$0xff] }
 0x7bc   : > { %v2040_v9 = vrot.slane %v2033_v23, %v3430_v51  ;;  %v2048_v46 = vrot.slane %v2558_v40, %v3430_v51  ;;  %v2056_v47 = vrot.slane %v2049_v21, %v3430_v51  ;;  %v2064_v48 = vrot.slane %v2559_v41, %v3430_v51 }
 0x7be   : > { %v2066_v50 = vcombine.high %v2040_v9, %v2048_v46  ;;  %v2082_v30 = vcombine.high %v2056_v47, %v2064_v48  ;;  %v2065_v52 = vcombine.low %v2040_v9, %v2048_v46  ;;  %v2081_v15 = vcombine.low %v2056_v47, %v2064_v48 }
 0x7c0   : > { %v2080_v35 = vrot.slane %v2066_v50, %v3434_v58  ;;  %v2096_v56 = vrot.slane %v2082_v30, %v3434_v58  ;;  %v2073_v59 = vrot.slane %v2065_v52, %v3434_v58  ;;  %v2089_v60 = vrot.slane %v2081_v15, %v3434_v58 }
 0x7c2   : > { %v2099_v14 = vcombine.low %v2080_v35, %v2096_v56  ;;  %v2098_v54 = vcombine.high %v2073_v59, %v2089_v60  ;;  %v2100_v5 = vcombine.high %v2080_v35, %v2096_v56  ;;  %v2097_v61 = vcombine.low %v2073_v59, %v2089_v60  ;;  %v2570_v56 = vld [vmem:[%s3939_s26] ss:$0 sm:$0xff] }
 0x7c4   : > { %2106 = vrot.lane.b32.xlu1 %v2099_v14, %s3093_s19  ;;  %2102 = vrot.lane.b32.xlu0 %v2098_v54, %s3094_s18  ;;  %s615_s18 = sand.u32 1, %s3072_s28   ;;  %s3096_s19 = smov [#allocation10]  }
 0x7c5   : > { %s2406_s0 = scalar_lea.sflag [#allocation4], %s615_s18 }
 0x7c8   : > { %2110 = vrot.lane.b32.xlu0 %v2100_v5, %s3095_s25  ;;  %s2531_s25 = sshll.u32 %s615_s18, 3 }
 0x7c9   : > { %s617_s17 = scalar_lea.vmem [#allocation10], %s2531_s25  ;;  %s3010_s25 = sshll.u32 %s3096_s19, 4  ;;  %s3011_s25 = int_to_ptr.vmem [resolvable:$false] %s3010_s25 }
 0x7ca   : > { %s2419_s29 = sshll.u32 %s617_s17, 4  ;;  %s3012_s1 = scalar_lea.vmem %s3011_s25, 256  ;;  %s3840_s29 = int_to_ptr.vmem [resolvable:$true] %s2419_s29 }
 0x7cb   : > { %s3006_s21 = scalar_lea.vmem %s3840_s29, 128  ;;  %p3013_p8 = scmp.lt.s32.totalorder %s3840_s29, %s3011_s25 }
 0x7cc   : > { %p3007_p2 = scmp.ne.s32.totalorder %s3840_s29, %s3006_s21  ;;  %p3014_p11 = scmp.lt.s32.totalorder %s3012_s1, %s3006_s21 }
 0x7ce   : > { %p3008_p4 = pnand %p3007_p2, %p3942_p3  ;;  %p3015_p13 = por %p3014_p11, %p3013_p8 }
 0x7d0   : > { %p3009_p7 = pneg %p3008_p4 }
 0x7d2   : > { %p3016_p1 = pnand %p3015_p13, %p3009_p7 }
 0x836   : > { %v2103_v51 = vpop.permute.xlu0 %2102  ;;  %v2107_v53 = vpop.permute.xlu1 %2106 }
 0x837   : > { %v2113_v39 = vsel %vm1547_vm3, %v2097_v61, %v2103_v51 }
 0x838   : > { %v2115_v1 = vsel %vm2114_vm5, %v2113_v39, %v2107_v53 }
 0x83a   : > { %v2111_v0 = vpop.permute.xlu0 %2110 }
 0x83b   : > { %v2117_v58 = vsel %vm2116_vm6, %v2115_v1, %v2111_v0 }
 0x83c   : > { %v2118_v57 = vpack.c.bf16 %v2117_v58, %v2117_v58 }
 0x83e   : > { %2700 = vmatmul.mubr.msk.bf16.vlgmr.msra.gmra.mrb[16].mxu1 %vm626_vm0, %v2118_v57 }
 0x83f   : > { %2727 = vmatprep.mubr.msk.bf16.mxu1 %vm3087_vm1, %v3086_v8  ;;  %2712 = vmatpush3.bf16.msra.mxu1 %v2831_v20 }
 0x840   : > { %2713 = vmatprep.subr.bf16.mxu1 %v3086_v8 }
 0x843   : > { %2714 = vmatpush3.bf16.msra.mxu1 %v2832_v31 }
 0x844   : > { %2715 = vmatprep.subr.bf16.mxu1 %v3086_v8 }
 0x847   : > { %2716 = vmatpush3.bf16.msra.mxu1 %v2833_v55 }
 0x848   : > { %2717 = vmatprep.subr.bf16.mxu1 %v3086_v8 }
 0x84b   : > { %2718 = vmatpush3.bf16.msra.mxu1 %v2834_v34 }
 0x84c   : > { %2719 = vmatprep.subr.bf16.mxu1 %v3086_v8 }
 0x84f   : > { %2720 = vmatpush3.bf16.msra.mxu1 %v2835_v19 }
 0x850   : > { %2721 = vmatprep.subr.bf16.mxu1 %v3086_v8 }
 0x853   : > { %2722 = vmatpush3.bf16.msra.mxu1 %v2836_v27 }
 0x854   : > { %2723 = vmatprep.subr.bf16.mxu1 %v3086_v8 }
 0x857   : > { %2724 = vmatpush3.bf16.msra.mxu1 %v2837_v36 }
 0x858   : > { %2725 = vmatprep.subr.bf16.mxu1 %v3086_v8 }
 0x85b   : > { %2726 = vmatpush3.bf16.msra.mxu1 %v2838_v38 }
 0x911   : > { %v2179_v2 = vpop.f32.mrb[16].mxu1 }
 0x912   : > { %v2180_v45 = vadd.f32 %v2560_v3, %v2179_v2  ;;  %v2701_v4 = vpop.f32.mrb[17].mxu1 }
 0x913   : > { %v2182_v42 = vpop.f32.mrb[18].mxu1 }
 0x914   : > { %v3775_v7 = vadd.f32 %v2893_v6, %v2180_v45  ;;  %v2702_v62 = vpop.f32.mrb[19].mxu1 }
 0x916   : > { %v2188_v10 = vsel %vm626_vm0, %v3775_v7, 0.0 }
 0x917   : > { %2189 = vadd.xlane.f32.xlu1 %v2188_v10 }
 0x9a4   : > { %v2190_v63 = vpop.xlane.xlu1 %2189 }
 0x9a5   : > { %v2191_v11 = vmul.f32 0.03125, %v2190_v63 }
 0x9a7   : > { %v2192_v49 = vsub.f32 %v3775_v7, %v2191_v11 }
 0x9a9   : > { %v2193_v12 = vmul.f32 %v2192_v49, %v2192_v49 }
 0x9ab   : > { %v2194_v13 = vsel %vm626_vm0, %v2193_v12, 0.0 }
 0x9ac   : > { %2195 = vadd.xlane.f32.xlu0 %v2194_v13 }
 0xa39   : > { %v2196_v32 = vpop.xlane.xlu0 %2195 }
 0xa3a   : > { %v2197_v33 = vmul.f32 0.03125, %v2196_v32 }
 0xa3c   : > { %v2198_v44 = vadd.f32 1e-05, %v2197_v33 }
 0xa3e   : > { %2889 = vrsqrt.f32 %v2198_v44 }
 0xa48   : > { %v2890_v18 = vpop.eup %2889 }
 0xa49   : > { %v2200_v26 = vmul.f32 %v2890_v18, %v2192_v49 }
 0xa4b   : > { %v2207_v24 = vmul.f32 %v2564_v22, %v2200_v26 }
 0xa4d   : > { %v2214_v29 = vadd.f32 %v2565_v28, %v2207_v24 }
 0xa4f   : > { %v2215_v25 = vpack.c.bf16 %v2214_v29, %v2214_v29 }
 0xa51   : > { %2708 = vmatmul.mubr.msk.bf16.vlgmr.msra.gmra.mrb[28].mxu0 %vm626_vm0, %v2215_v25 }
 0xb24   : > { %v2276_v23 = vpop.f32.mrb[28].mxu0 }
 0xb25   : > { %v2277_v40 = vadd.f32 %v2566_v37, %v2276_v23  ;;  %v2709_v21 = vpop.f32.mrb[29].mxu0 }
 0xb26   : > { %v2279_v41 = vpop.f32.mrb[30].mxu0 }
 0xb27   : > { %v2283_v43 = vmul.f32 0.044715, %v2277_v40  ;;  %v2710_v9 = vpop.f32.mrb[31].mxu0  ;;  %v2282_v8 = vmul.f32 0.5, %v2277_v40 }
 0xb29   : > { %v2284_v46 = vmul.f32 %v2283_v43, %v2277_v40 }
 0xb2b   : > { %v2285_v47 = vmul.f32 %v2284_v46, %v2277_v40 }
 0xb2d   : > { %v2286_v48 = vadd.f32 %v2285_v47, %v2277_v40 }
 0xb2f   : > { %v2287_v50 = vmul.f32 0.7978846, %v2286_v48 }
 0xb31   : > { %2891 = vtanh.f32 %v2287_v50 }
 0xb3b   : > { %v2892_v30 = vpop.eup %2891 }
 0xb3c   : > { %v2289_v52 = vadd.f32 1.0, %v2892_v30 }
 0xb3e   : > { %v2290_v15 = vmul.f32 %v2289_v52, %v2282_v8 }
 0xb40   : > { %v2291_v35 = vpack.c.bf16 %v2290_v15, %v2290_v15 }
 0xb42   : > { %2728 = vmatmul.mubr.bf16.vlgmr.msra.gmra.mrb[20].mxu1 %v2291_v35 }
 0xc15   : > { %v2397_v59 = vpop.f32.mrb[20].mxu1 }
 0xc16   : > { %v2398_v60 = vadd.f32 %v2570_v56, %v2397_v59  ;;  %v2729_v14 = vpop.f32.mrb[21].mxu1 }
 0xc17   : > { %v2400_v54 = vpop.f32.mrb[22].mxu1 }
 0xc18   : > { %v2403_v5 = vadd.f32 %v2398_v60, %v3775_v7  ;;  %v2730_v61 = vpop.f32.mrb[23].mxu1 }
 0xc1a   : > { %2404 = vst.msk [vmem:[%s617_s17] sm:$0xff] %vm626_vm0, %v2403_v5 }
 0xc1b   : > { %3019 = shalt.err (!%p3016_p1)
}
 0xc1c   : > { %s3020_s18 = scalar_lea.hbm %s3838_s24, 128  ;;  %s3024_s22 = scalar_lea.hbm %s3941_s23, 256 }
 0xc1d   : > { %p3021_p0 = scmp.ne.s32.totalorder %s3838_s24, %s3020_s18  ;;  %p3025_p9 = scmp.lt.u32.totalorder %s3838_s24, %s3941_s23 }
 0xc1e   : > { %p3026_p12 = scmp.lt.u32.totalorder %s3024_s22, %s3020_s18  ;;  %p3028_p2 = scmp.lt.u32.totalorder %s3020_s18, %s3838_s24 }
 0xc1f   : > { %p3022_p6 = pnand %p3021_p0, %p3942_p3 }
 0xc20   : > { %p3027_p10 = por %p3026_p12, %p3025_p9 }
 0xc21   : > { %p3023_p5 = pneg %p3022_p6 }
 0xc22   : > { %p3029_p4 = por %p3028_p2, %p3027_p10 }
 0xc24   : > { %p3030_p7 = pnand %p3029_p4, %p3023_p5 }
 0xc26   : > { %3033 = shalt.err (!%p3030_p7)
}
 0xc27   : > { %2747 = dma.vmem_to_hbm [thread:$0]  (%p3942_p3), %s3840_s29, 128, %s3838_s24, %s2406_s0  }
 0xc28 PF: > { %s3943_s30 = sld [smem:[#allocation17_spill]]  ;;  %s3944_s21 = sld [smem:[#allocation15_spill]] }
 0xc29   : > { %s3945_s19 = sld [smem:[#allocation21_spill]] }
 0xc2e   : > { %p2774_p8 = scmp.ge.s32.totalorder %s3943_s30, 2  ;;  %s2431_s25 = sand.u32 1, %s3944_s21  }
 0xc2f   : > { %p3946_p11 = scmp.ne.s32.totalorder %s3945_s19, 0  ;;  %s2432_s1 = scalar_lea.sflag [#allocation4], %s2431_s25 }
 0xc31   : > { %p2763_p13 = pnand %p2774_p8, %p3946_p11 }
 0xc33   : > { %3063 = dma.done.wait (!%p2763_p13), %s2432_s1, 128  }
 0xc34   : > { %3065 = vsyncadd (!%p2763_p13), %s2432_s1, 4294967168  ;;  %s3947_s30 = sld [smem:[#allocation18_spill]]  ;;  %s3948_s18 = sld [smem:[#allocation16_spill]] }
 0xc35   : > { %s3949_s29 = sld [smem:[#allocation19_spill]]  ;;  %s3950_s27 = smov %s3072_s28 }
 0xc3a   : > { %p31_p1 = scmp.ge.s32.totalorder %s3947_s30, 4   ;;  %s3951_s28 = smov %s3948_s18 }
 0xc3c   :  { %33 = sbr.rel (!%p31_p1) target bundleno = 12 (0xc), region = 144 }
 0xc43   :  { %2437 = vsyncpa [#allocation3], 1 }
 0xc44   :  { %2439 = vsyncpa [#allocation3 + $0x1], 1 }
 0xc45   :  { %2440 = vsyncpa [#allocation6], 1 }
 0xc46   :  { %2441 = vsyncpa [#allocation9], 1 }
 0xc47   :  { %2442 = vsyncpa [#allocation4], 1 }
 0xc48   :  { %2444 = vsyncpa [#allocation4 + $0x1], 1 }

// kernel: tpu_custom_call.1
= control target key start
LH: loop header
LB: loop body
LE: loop exit
PB: predicated region body
PF: predicated region fallthrough
CT: control target
= control target key end

     0   :  { %s3881_s0 = inlined_call_operand.vmem [shape: f32[2,8,32], index: 0, kind: input, shape index: {}]   ;;  %s3882_s1 = inlined_call_operand.vmem [shape: f32[1,32], index: 1, kind: input, shape index: {}]   ;;  %s3883_s2 = inlined_call_operand.vmem [shape: f32[1,32], index: 2, kind: input, shape index: {}]   ;;  %s3884_s3 = inlined_call_operand.vmem [shape: bf16[32,32], index: 3, kind: input, shape index: {}]   ;;  %s3885_s4 = inlined_call_operand.vmem [shape: bf16[32,32], index: 4, kind: input, shape index: {}]   ;;  %s3886_s5 = inlined_call_operand.vmem [shape: bf16[32,32], index: 5, kind: input, shape index: {}]   ;;  %s3887_s6 = inlined_call_operand.hbm [shape: f32[1,8], index: 6, kind: input, shape index: {}]   ;;  %s3888_s7 = inlined_call_operand.hbm [shape: f32[1,8], index: 7, kind: input, shape index: {}]   ;;  %s3889_s8 = inlined_call_operand.hbm [shape: f32[1,8], index: 8, kind: input, shape index: {}]   ;;  %s3890_s9 = inlined_call_operand.hbm [shape: f32[1,8], index: 9, kind: input, shape index: {}]   ;;  %s3891_s10 = inlined_call_operand.vmem [shape: bf16[32,32], index: 10, kind: input, shape index: {}]   ;;  %s3892_s11 = inlined_call_operand.vmem [shape: f32[1,32], index: 11, kind: input, shape index: {}]   ;;  %s3893_s12 = inlined_call_operand.vmem [shape: f32[1,32], index: 12, kind: input, shape index: {}]   ;;  %s3894_s13 = inlined_call_operand.vmem [shape: f32[1,32], index: 13, kind: input, shape index: {}]   ;;  %s3895_s14 = inlined_call_operand.vmem [shape: bf16[32,128], index: 14, kind: input, shape index: {}]   ;;  %s3896_s15 = inlined_call_operand.vmem [shape: f32[1,128], index: 15, kind: input, shape index: {}]   ;;  %s3897_s16 = inlined_call_operand.vmem [shape: bf16[128,32], index: 16, kind: input, shape index: {}]   ;;  %s3898_s17 = inlined_call_operand.vmem [shape: f32[1,32], index: 17, kind: input, shape index: {}]   ;;  %s3899_s18 = inlined_call_operand.hbm [shape: f32[2,8,32], index: 18, kind: output, shape index: {}]  }
   0x1   :  { %3912 = sst [smem:[#allocation22_spill]] %s3881_s0 }
   0x2   :  { %3913 = sst [smem:[#allocation23_spill]] %s3882_s1 }
   0x3   :  { %3914 = sst [smem:[#allocation24_spill]] %s3883_s2 }
   0x4   :  { %3915 = sst [smem:[#allocation25_spill]] %s3898_s17 }
   0x5   :  { %3916 = sst [smem:[#allocation26_spill]] %s3899_s18 }
   0x6   :  { %23 = vsyncpa [#allocation3], 0 }
   0x7   :  { %24 = vsyncpa [#allocation6], 0 }
   0x8   :  { %25 = vsyncpa [#allocation9], 0 }
   0x9   :  { %26 = vsyncpa [#allocation4], 0 }
   0xa   :  { %28 = vsyncpa [#allocation4 + $0x1], 0  ;;  %s3192_s27 = smov 0   ;;  %s3194_s28 = smov 0  }
   0xb   :  { %s3196_s29 = smov 0   ;;  %s3198_s30 = smov 0  }
   0xc LB: > { %3917 = sst [smem:[#allocation15_spill]] %s3068_s27  ;;  %s3213_s0 = sadd.s32 4294967295, %s3080_s30   ;;  %s3080_s30 = sphi %s3198_s30, %s3947_s30   ;;  %s3076_s29 = sphi %s3196_s29, %s3949_s29   ;;  %s3072_s28 = sphi %s3194_s28, %s3951_s28   ;;  %s3068_s27 = sphi %s3192_s27, %s3950_s27  }
   0xd   : > { %3918 = sst [smem:[#allocation16_spill]] %s3076_s29  ;;  %s2519_s19 = sadd.s32 4294967294, %s3080_s30  }
   0xe   : > { %3919 = sst [smem:[#allocation17_spill]] %s3080_s30  ;;  %s3217_s1 = sadd.s32 1, %s3080_s30  }
   0xf   : > { %3920 = sst [smem:[#allocation18_spill]] %s3217_s1  ;;  %s424_s20 = sadd.s32 1, %s3076_s29 }
  0x10   : > { %s421_s21 = ssub.s32 %s3080_s30, %s3217_s1  ;;  %p434_p0 = scmp.ne.s32.totalorder %s3076_s29, %s3072_s28 }
  0x11   : > { %p422_p1 = scmp.eq.s32.totalorder %s421_s21, 0  ;;  %p435_p2 = scmp.eq.s32.totalorder %s3213_s0, 1 }
  0x12   : > { %p440_p3 = scmp.ne.s32.totalorder %s3072_s28, %s3068_s27  ;;  %p441_p4 = scmp.eq.s32.totalorder %s2519_s19, 1 }
  0x13   : > { %s3228_s22 = scalar_select %p422_p1, %s3076_s29, %s424_s20  }
  0x14   : > { %p3230_p5 = por %p435_p2, %p434_p0  ;;  %p3234_p6 = por %p441_p4, %p440_p3 }
  0x15   : > { %3921 = sst [smem:[#allocation19_spill]] %s3228_s22  ;;  %p2520_p7 = scmp.ge.s32.totalorder %s3080_s30, 1 }
  0x16   : > { %s3922_s2 = scalar_select %p3230_p5, 1, 0 }
  0x17   : > { %s3924_s23 = scalar_select %p3234_p6, 1, 0 }
  0x18   : > { %3923 = sst [smem:[#allocation20_spill]] %s3922_s2  ;;  %p448_p8 = scmp.lt.s32.totalorder %s3080_s30, 3 }
  0x19   : > { %3925 = sst [smem:[#allocation21_spill]] %s3924_s23  ;;  %p3907_p9 = scmp.eq.s32.totalorder %s3213_s0, 0 }
  0x1a   : > { %p3241_p10 = pnand %p2520_p7, %p448_p8  ;;  %s3082_s25 = smov [#allocation5]  }
  0x1b   : > { %s487_s26 = sshll.u32 %s3082_s25, 4  ;;  %s3083_s19 = smov [#allocation2]   ;;  %s488_s26 = int_to_ptr.vmem [resolvable:$true] %s487_s26 }
  0x1c   : > { %s3926_s24 = scalar_select %p3241_p10, 1, 0 }
  0x1d   : > { %p2749_p11 = pneg %p3241_p10  ;;  %s476_s20 = sshll.u32 %s3083_s19, 4  ;;  %s3253_s20 = int_to_ptr.vmem [resolvable:$true] %s476_s20 }
  0x1e   : > { %s3084_s22 = smov [#allocation7]   ;;  %s2894_s25 = scalar_lea.hbm %s3888_s7, 16 }
  0x1f   : > { %p3249_p12 = pnand %p3907_p9, %p2749_p11  ;;  %s498_s29 = sshll.u32 %s3084_s22, 4  ;;  %s3255_s29 = int_to_ptr.vmem [resolvable:$true] %s498_s29 }
  0x20   : > { %p2895_p13 = scmp.ne.s32.totalorder %s3888_s7, %s2894_s25  ;;  %p2901_p3 = scmp.lt.u32.totalorder %s2894_s25, %s3888_s7 }
  0x21   : > { %p3265_p0 = pneg %p3249_p12 }
  0x23   : > { %p2897_p1 = pnand %p3265_p0, %p2895_p13 }
  0x25   : > { %p2898_p2 = pneg %p2897_p1 }
  0x27   : > { %p2903_p4 = pnand %p2901_p3, %p2898_p2 }
  0x29   : > { %2906 = shalt.err (!%p2903_p4)
}
  0x2a   : > { %s2907_s1 = scalar_lea.vmem %s488_s26, 16  ;;  %s2914_s27 = scalar_lea.vmem %s488_s26, 32 }
  0x2b   : > { %p2908_p7 = scmp.ne.s32.totalorder %s488_s26, %s2907_s1  ;;  %p2915_p9 = scmp.lt.s32.totalorder %s488_s26, %s488_s26 }
  0x2c   : > { %p2916_p6 = scmp.lt.s32.totalorder %s2914_s27, %s2907_s1 }
  0x2d   : > { %p2910_p8 = pnand %p2908_p7, %p3265_p0 }
  0x2e   : > { %p2917_p5 = por %p2916_p6, %p2915_p9 }
  0x2f   : > { %p2911_p11 = pneg %p2910_p8 }
  0x31   : > { %p2918_p10 = pnand %p2917_p5, %p2911_p11 }
  0x33   : > { %2921 = shalt.err (!%p2918_p10)
}
  0x34   : > { %2755 = dma.hbm_to_vmem [thread:$0]  (!%p3249_p12), %s3888_s7, 16, %s488_s26, [#allocation6]  }
  0x35   : > { %s2922_s22 = scalar_lea.hbm %s3887_s6, 16 }
  0x36   : > { %p2923_p13 = scmp.ne.s32.totalorder %s3887_s6, %s2922_s22  ;;  %p2929_p5 = scmp.lt.u32.totalorder %s2922_s22, %s3887_s6 }
  0x38   : > { %p2925_p1 = pnand %p2923_p13, %p3265_p0 }
  0x3a   : > { %p2926_p6 = pneg %p2925_p1 }
  0x3c   : > { %p2931_p9 = pnand %p2929_p5, %p2926_p6 }
  0x3e   : > { %2934 = shalt.err (!%p2931_p9)
}
  0x3f   : > { %s2935_s26 = scalar_lea.vmem %s3253_s20, 16  ;;  %s2942_s17 = scalar_lea.vmem %s3253_s20, 32 }
  0x40   : > { %p2936_p10 = scmp.ne.s32.totalorder %s3253_s20, %s2935_s26  ;;  %p2943_p4 = scmp.lt.s32.totalorder %s3253_s20, %s3253_s20 }
  0x41   : > { %p2944_p7 = scmp.lt.s32.totalorder %s2942_s17, %s2935_s26 }
  0x42   : > { %p2938_p2 = pnand %p2936_p10, %p3265_p0 }
  0x43   : > { %p2945_p8 = por %p2944_p7, %p2943_p4 }
  0x44   : > { %p2939_p3 = pneg %p2938_p2 }
  0x46   : > { %p2946_p11 = pnand %p2945_p8, %p2939_p3 }
  0x48   : > { %2949 = shalt.err (!%p2946_p11)
}
  0x49   : > { %2752 = dma.hbm_to_vmem [thread:$0]  (!%p3249_p12), %s3887_s6, 16, %s3253_s20, [#allocation3]  }
  0x4a   : > { %s2950_s25 = scalar_lea.hbm %s3889_s8, 16 }
  0x4b   : > { %p2951_p13 = scmp.ne.s32.totalorder %s3889_s8, %s2950_s25  ;;  %p2957_p5 = scmp.lt.u32.totalorder %s2950_s25, %s3889_s8 }
  0x4d   : > { %p2953_p1 = pnand %p2951_p13, %p3265_p0 }
  0x4f   : > { %p2954_p6 = pneg %p2953_p1 }
  0x51   : > { %p2959_p9 = pnand %p2957_p5, %p2954_p6 }
  0x53   : > { %2962 = shalt.err (!%p2959_p9)
}
  0x54   : > { %s2963_s20 = scalar_lea.vmem %s3255_s29, 16  ;;  %s2970_s17 = scalar_lea.vmem %s3255_s29, 32 }
  0x55   : > { %p2964_p10 = scmp.ne.s32.totalorder %s3255_s29, %s2963_s20  ;;  %p2971_p4 = scmp.lt.s32.totalorder %s3255_s29, %s3255_s29 }
  0x56   : > { %p2972_p7 = scmp.lt.s32.totalorder %s2970_s17, %s2963_s20 }
  0x57   : > { %p2966_p2 = pnand %p2964_p10, %p3265_p0 }
  0x58   : > { %p2973_p8 = por %p2972_p7, %p2971_p4 }
  0x59   : > { %p2967_p3 = pneg %p2966_p2 }
  0x5b   : > { %p2974_p11 = pnand %p2973_p8, %p2967_p3 }
  0x5d   : > { %2977 = shalt.err (!%p2974_p11)
}
  0x5e   : > { %2758 = dma.hbm_to_vmem [thread:$0]  (!%p3249_p12), %s3889_s8, 16, %s3255_s29, [#allocation6]  }
  0x5f   : > { %s3085_s23 = smov [#allocation8]   ;;  %s2978_s1 = scalar_lea.hbm %s3890_s9, 16 }
  0x60   : > { %s509_s18 = sshll.u32 %s3085_s23, 4  ;;  %p2979_p13 = scmp.ne.s32.totalorder %s3890_s9, %s2978_s1  ;;  %s510_s18 = int_to_ptr.vmem [resolvable:$true] %s509_s18 }
  0x61   : > { %p2985_p5 = scmp.lt.u32.totalorder %s2978_s1, %s3890_s9 }
  0x62   : > { %p2981_p1 = pnand %p2979_p13, %p3265_p0 }
  0x64   : > { %p2982_p6 = pneg %p2981_p1 }
  0x66   : > { %p2987_p9 = pnand %p2985_p5, %p2982_p6 }
  0x68   : > { %2990 = shalt.err (!%p2987_p9)
}
  0x69   : > { %s2991_s29 = scalar_lea.vmem %s510_s18, 16  ;;  %s2998_s2 = scalar_lea.vmem %s510_s18, 32 }
  0x6a   : > { %p2992_p10 = scmp.ne.s32.totalorder %s510_s18, %s2991_s29  ;;  %p2999_p4 = scmp.lt.s32.totalorder %s510_s18, %s510_s18 }
  0x6b   : > { %p3000_p7 = scmp.lt.s32.totalorder %s2998_s2, %s2991_s29 }
  0x6c   : > { %p2994_p2 = pnand %p2992_p10, %p3265_p0 }
  0x6d   : > { %p3001_p8 = por %p3000_p7, %p2999_p4 }
  0x6e   : > { %p2995_p3 = pneg %p2994_p2 }
  0x70   : > { %p3002_p11 = pnand %p3001_p8, %p2995_p3 }
  0x72   : > { %3005 = shalt.err (!%p3002_p11)
}
  0x73   : > { %2761 = dma.hbm_to_vmem [thread:$0]  (!%p3249_p12), %s3890_s9, 16, %s510_s18, [#allocation9]  }
  0x74   : > { %p3929_p13 = scmp.ne.s32.totalorder %s3926_s24, 0 }
  0x75   : > { %p3930_p1 = scmp.eq.s32.totalorder (!%p3929_p13), %s3213_s0, 0 }
  0x76   : > { %553 = sbr.rel (%p3929_p13) target bundleno = 3112 (0xc28), region = 92 }
  0x7d   : > { %3051 = dma.done.wait (%p3930_p1), [#allocation3], 16   ;;  %p3931_p0 = pmov %p3930_p1 }
  0x7f   : > { %3053 = vsyncadd (%p3931_p0), [#allocation3], 4294967280  ;;  %p3932_p6 = pmov %p3931_p0 }
  0x80   : > { %p3933_p5 = pmov %p3931_p0 }
  0x81   : > { %3055 = dma.done.wait (%p3932_p6), [#allocation6], 32  }
  0x82   : > { %3057 = vsyncadd (%p3933_p5), [#allocation6], 4294967264  ;;  %p3934_p9 = pmov %p3931_p0 }
  0x83   : > { %p3935_p12 = pmov %p3931_p0 }
  0x84   : > { %3059 = dma.done.wait (%p3934_p9), [#allocation9], 16  }
  0x85   : > { %3061 = vsyncadd (%p3935_p12), [#allocation9], 4294967280  ;;  %p618_p10 = scmp.lt.s32.totalorder %s3213_s0, 1  ;;  %s3936_s25 = sld [smem:[#allocation22_spill]]  ;;  %vm626_vm0 = vcmask 261120   ;;  %v2821_v7 = vld [vmem:[%s3884_s3] sm:$0xff]   ;;  %v842_v41 = vlaneseq }
  0x86   : > { %v3086_v8 = vmov 0.0   ;;  %vm3087_vm1 = vmmov 0   ;;  %v2822_v9 = vld [vmem:[%s3884_s3 + $0x8] sm:$0xff]   ;;  %s3937_s2 = sld [smem:[#allocation23_spill]]  ;;  %v2823_v19 = vld [vmem:[%s3885_s4] sm:$0xff]   ;;  %s3088_s17 = smov 104  }
  0x87   : > { %s619_s24 = scalar_select %p618_p10, %s3213_s0, 1  ;;  %2623 = vmatprep.subr.bf16.mxu0 %v3086_v8  ;;  %2627 = vmatprep.mubr.msk.bf16.mxu0 %vm3087_vm1, %v3086_v8  ;;  %v2824_v21 = vld [vmem:[%s3885_s4 + $0x8] sm:$0xff]   ;;  %v2825_v22 = vld [vmem:[%s3886_s5] sm:$0xff]   ;;  %v3091_v39 = vmov 1983009808   ;;  %v843_v46 = vshrl.u32 %v842_v41, 7 }
  0x88   : > { %2624 = vmatpush3.bf16.msra.mxu0 %v2821_v7  ;;  %2647 = vmatprep.subr.bf16.mxu1 %v3086_v8  ;;  %v2826_v23 = vld [vmem:[%s3886_s5 + $0x8] sm:$0xff]   ;;  %s3089_s29 = smov 120   ;;  %v840_v40 = vunpack.c.l.s4 %v3091_v39  ;;  %v3092_v43 = vmov 1934713408   ;;  %vm907_vm2 = vcmask 60416   ;;  %vm1547_vm3 = vcmask 64512  }
  0x89   : > { %s2532_s21 = sshll.u32 %s619_s24, 3  ;;  %2625 = vmatprep.subr.bf16.mxu0 %v3086_v8  ;;  %2649 = vmatprep.mubr.msk.bf16.mxu1 %vm3087_vm1, %v3086_v8  ;;  %s3938_s24 = sld [smem:[#allocation24_spill]]  ;;  %v872_v44 = vunpack.c.l.s4 %v3092_v43  ;;  %vm1783_vm4 = vcmask 1043456   ;;  %vm2114_vm5 = vcmask 130048   ;;  %vm2116_vm6 = vcmask 195584  }
  0x8a   : > { %v841_v45 = vunpack.c.0.s8 %v840_v40  ;;  %s3093_s19 = smov 16   ;;  %s3094_s18 = smov 8  }
  0x8b   : > { %s3366_s22 = scalar_lea.vmem %s3936_s25, %s2532_s21  ;;  %v873_v50 = vunpack.c.0.s8 %v872_v44  ;;  %s3095_s25 = smov 24  }
  0x8c   : > { %v623_v0 = vld [vmem:[%s3366_s22] sm:$0xff]  ;;  %2626 = vmatpush3.bf16.msra.mxu0 %v2822_v9  ;;  %v3430_v51 = vsub.s32 %v841_v45, %v843_v46  ;;  %s3939_s26 = sld [smem:[#allocation25_spill]]  ;;  %s3940_s20 = sld [smem:[#allocation20_spill]] }
  0x8d   : > { %v627_v1 = vsel %vm626_vm0, %v623_v0, 0.0  ;;  %2631 = vmatprep.subr.bf16.mxu0 %v3086_v8  ;;  %v2533_v14 = vld [vmem:[%s3937_s2] ss:$0 sm:$0xff]  ;;  %s3090_s2 = smov 112   ;;  %v3434_v58 = vsub.s32 %v873_v50, %v843_v46  ;;  %s3941_s23 = sld [smem:[#allocation26_spill]] }
  0x8e   : > { %628 = vadd.xlane.f32.xlu0 %v627_v1 }
  0x8f   : > { %v2534_v16 = vld [vmem:[%s3938_s24] ss:$0 sm:$0xff] }
  0x92   : > { %p3942_p3 = scmp.ne.s32.totalorder %s3940_s20, 0 }
 0x11b   : > { %v629_v2 = vpop.xlane.xlu0 %628 }
 0x11c   : > { %v631_v3 = vmul.f32 0.03125, %v629_v2 }
 0x11e   : > { %v632_v4 = vsub.f32 %v623_v0, %v631_v3 }
 0x120   : > { %v633_v5 = vmul.f32 %v632_v4, %v632_v4 }
 0x122   : > { %v634_v6 = vsel %vm626_vm0, %v633_v5, 0.0 }
 0x123   : > { %635 = vadd.xlane.f32.xlu0 %v634_v6 }
 0x1b0   : > { %v636_v10 = vpop.xlane.xlu0 %635 }
 0x1b1   : > { %v637_v11 = vmul.f32 0.03125, %v636_v10 }
 0x1b3   : > { %v638_v12 = vadd.f32 1e-05, %v637_v11 }
 0x1b5   : > { %2839 = vrsqrt.f32 %v638_v12 }
 0x1bf   : > { %v2840_v13 = vpop.eup %2839 }
 0x1c0   : > { %v640_v15 = vmul.f32 %v2840_v13, %v632_v4 }
 0x1c2   : > { %v647_v17 = vmul.f32 %v2533_v14, %v640_v15 }
 0x1c4   : > { %v654_v18 = vadd.f32 %v2534_v16, %v647_v17 }
 0x1c6   : > { %v655_v20 = vpack.c.bf16 %v654_v18, %v654_v18 }
 0x1c8   : > { %2628 = vmatmul.mubr.msk.bf16.vlgmr.msra.gmra.mrb[0].mxu0 %vm626_vm0, %v655_v20 }
 0x1c9   : > { %2632 = vmatpush3.bf16.msra.mxu0 %v2823_v19  ;;  %2635 = vmatprep.mubr.msk.bf16.mxu0 %vm3087_vm1, %v3086_v8 }
 0x1ca   : > { %2633 = vmatprep.subr.bf16.mxu0 %v3086_v8 }
 0x1cd   : > { %2634 = vmatpush3.bf16.msra.mxu0 %v2824_v21 }
 0x1ce   : > { %2639 = vmatprep.subr.bf16.mxu0 %v3086_v8 }
 0x1d0   : > { %2636 = vmatmul.mubr.msk.bf16.vlgmr.msra.gmra.mrb[4].mxu0 %vm626_vm0, %v655_v20 }
 0x1d1   : > { %2640 = vmatpush3.bf16.msra.mxu0 %v2825_v22  ;;  %2643 = vmatprep.mubr.msk.bf16.mxu0 %vm3087_vm1, %v3086_v8 }
 0x1d2   : > { %2641 = vmatprep.subr.bf16.mxu0 %v3086_v8 }
 0x1d5   : > { %2642 = vmatpush3.bf16.msra.mxu0 %v2826_v23 }
 0x1d6   : > { %2653 = vmatprep.subr.bf16.mxu0 %v3086_v8 }
 0x1d8   : > { %2644 = vmatmul.mubr.msk.bf16.vlgmr.msra.gmra.mrb[8].mxu0 %vm626_vm0, %v655_v20 }
 0x1d9   : > { %2655 = vmatprep.mubr.msk.bf16.mxu0 %vm3087_vm1, %v3086_v8 }
 0x29b   : > { %v3416_v24 = vpop.f32.mrb[0].mxu0 }
 0x29c   : > { %v2629_v25 = vpop.f32.mrb[1].mxu0 }
 0x29d   : > { %v712_v26 = vpop.f32.mrb[2].mxu0 }
 0x29e   : > { %v2630_v27 = vpop.f32.mrb[3].mxu0 }
 0x2a3   : > { %v765_v28 = vpop.f32.mrb[4].mxu0 }
 0x2a4   : > { %1048 = vrot.lane.b32.xlu0 %v765_v28, %s3088_s17  ;;  %1042 = vrot.lane.b32.xlu1 %v765_v28, %s3089_s29  ;;  %v2637_v29 = vpop.f32.mrb[5].mxu0 }
 0x2a5   : > { %v768_v30 = vpop.f32.mrb[6].mxu0 }
 0x2a6   : > { %v2638_v31 = vpop.f32.mrb[7].mxu0 }
 0x2a8   : > { %1045 = vrot.lane.b32.xlu1 %v765_v28, %s3090_s2 }
 0x2ab   : > { %v3421_v32 = vpop.f32.mrb[8].mxu0 }
 0x2ac   : > { %828 = vrot.lane.b32.xlu1 %v3416_v24, %s3089_s29  ;;  %v2645_v33 = vpop.f32.mrb[9].mxu0 }
 0x2ad   : > { %v824_v34 = vpop.f32.mrb[10].mxu0 }
 0x2ae   : > { %v2646_v35 = vpop.f32.mrb[11].mxu0 }
 0x2b0   : > { %831 = vrot.lane.b32.xlu1 %v3416_v24, %s3090_s2 }
 0x2b4   : > { %834 = vrot.lane.b32.xlu1 %v3416_v24, %s3088_s17 }
 0x316   : > { %v1043_v36 = vpop.permute.xlu1 %1042  ;;  %v1049_v48 = vpop.permute.xlu0 %1048 }
 0x317   : > { %v1068_v54 = vcombine.high %v1043_v36, %v1049_v48  ;;  %v1067_v59 = vcombine.low %v1043_v36, %v1049_v48 }
 0x319   : > { %v1082_v63 = vrot.slane %v1068_v54, %v3430_v51  ;;  %v1075_v3 = vrot.slane %v1067_v59, %v3430_v51 }
 0x31a   : > { %v1046_v37 = vpop.permute.xlu1 %1045 }
 0x31b   : > { %v1052_v52 = vcombine.high %v765_v28, %v1046_v37  ;;  %v1051_v55 = vcombine.low %v765_v28, %v1046_v37 }
 0x31d   : > { %v1066_v60 = vrot.slane %v1052_v52, %v3430_v51  ;;  %v1059_v0 = vrot.slane %v1051_v55, %v3430_v51 }
 0x31e   : > { %v829_v38 = vpop.permute.xlu1 %828 }
 0x31f   : > { %v1099_v4 = vcombine.low %v1066_v60, %v1082_v63  ;;  %v1083_v7 = vcombine.low %v1059_v0, %v1075_v3  ;;  %v1100_v11 = vcombine.high %v1066_v60, %v1082_v63  ;;  %v1084_v15 = vcombine.high %v1059_v0, %v1075_v3 }
 0x321   : > { %v3458_v14 = vrot.slane %v1099_v4, %v3434_v58  ;;  %v3464_v18 = vrot.slane %v1083_v7, %v3434_v58  ;;  %v3470_v21 = vrot.slane %v1100_v11, %v3434_v58 }
 0x322   : > { %v832_v42 = vpop.permute.xlu1 %831 }
 0x323   : > { %v837_v47 = vcombine.low %v3416_v24, %v832_v42  ;;  %v838_v16 = vcombine.high %v3416_v24, %v832_v42  ;;  %v1133_v20 = vsel %vm907_vm2, %v3458_v14, 0.0  ;;  %v1121_v23 = vsel %vm907_vm2, %v3464_v18, 0.0 }
 0x324   : > { %v3476_v24 = vrot.slane %v1084_v15, %v3434_v58  ;;  %v1139_v26 = vsel %vm907_vm2, %v3470_v21, 0.0  ;;  %v3482_v27 = vcombine.high %v3464_v18, %v3086_v8  ;;  %v3499_v35 = vcombine.high %v3458_v14, %v3086_v8 }
 0x325   : > { %v845_v56 = vrot.slane %v837_v47, %v3430_v51  ;;  %v852_v22 = vrot.slane %v838_v16, %v3430_v51  ;;  %v3510_v39 = vcombine.high %v3470_v21, %v3086_v8 }
 0x326   : > { %v835_v49 = vpop.permute.xlu1 %834  ;;  %v1127_v28 = vsel %vm907_vm2, %v3476_v24, 0.0  ;;  %v3488_v29 = vcombine.high %v3476_v24, %v3086_v8  ;;  %v1124_v31 = vsel %vm907_vm2, %v3482_v27, 0.0 }
 0x327   : > { %v853_v53 = vcombine.low %v829_v38, %v835_v49  ;;  %v854_v12 = vcombine.high %v829_v38, %v835_v49  ;;  %v1136_v38 = vsel %vm907_vm2, %v3499_v35, 0.0  ;;  %v1142_v41 = vsel %vm907_vm2, %v3510_v39, 0.0 }
 0x328   : > { %v1130_v34 = vsel %vm907_vm2, %v3488_v29, 0.0 }
 0x329   : > { %v861_v57 = vrot.slane %v853_v53, %v3430_v51  ;;  %v868_v19 = vrot.slane %v854_v12, %v3430_v51 }
 0x32b   : > { %v869_v61 = vcombine.low %v845_v56, %v861_v57  ;;  %v870_v62 = vcombine.high %v845_v56, %v861_v57  ;;  %v885_v25 = vcombine.low %v852_v22, %v868_v19  ;;  %v886_v30 = vcombine.high %v852_v22, %v868_v19 }
 0x32d   : > { %v3440_v1 = vrot.slane %v869_v61, %v3434_v58  ;;  %v3443_v2 = vrot.slane %v870_v62, %v3434_v58  ;;  %v3493_v33 = vrot.slane %v885_v25, %v3434_v58  ;;  %v3504_v37 = vrot.slane %v886_v30, %v3434_v58 }
 0x32f   : > { %v908_v5 = vsel %vm907_vm2, %v3440_v1, 0.0  ;;  %v901_v6 = vcombine.high %v3440_v1, %v3086_v8  ;;  %v3453_v10 = vcombine.high %v3443_v2, %v3086_v8  ;;  %v914_v13 = vsel %vm907_vm2, %v3443_v2, 0.0 }
 0x330   : > { %909 = vadd.xlane.f32.xlu0 %v908_v5  ;;  %v920_v36 = vsel %vm907_vm2, %v3493_v33, 0.0  ;;  %v926_v40 = vsel %vm907_vm2, %v3504_v37, 0.0  ;;  %v3518_v42 = vcombine.high %v3493_v33, %v3086_v8  ;;  %v3524_v44 = vcombine.high %v3504_v37, %v3086_v8 }
 0x331   : > { %v911_v9 = vsel %vm907_vm2, %v901_v6, 0.0  ;;  %v917_v17 = vsel %vm907_vm2, %v3453_v10, 0.0 }
 0x332   : > { %912 = vadd.xlane.f32.xlu1 %v911_v9  ;;  %v923_v43 = vsel %vm907_vm2, %v3518_v42, 0.0  ;;  %v929_v45 = vsel %vm907_vm2, %v3524_v44, 0.0 }
 0x334   : > { %915 = vadd.xlane.f32.xlu0 %v914_v13 }
 0x336   : > { %918 = vadd.xlane.f32.xlu1 %v917_v17 }
 0x338   : > { %1134 = vadd.xlane.f32.xlu0 %v1133_v20 }
 0x33a   : > { %1122 = vadd.xlane.f32.xlu1 %v1121_v23 }
 0x33c   : > { %1140 = vadd.xlane.f32.xlu0 %v1139_v26 }
 0x33e   : > { %1128 = vadd.xlane.f32.xlu1 %v1127_v28 }
 0x340   : > { %1125 = vadd.xlane.f32.xlu0 %v1124_v31 }
 0x342   : > { %1131 = vadd.xlane.f32.xlu1 %v1130_v34 }
 0x344   : > { %921 = vadd.xlane.f32.xlu0 %v920_v36 }
 0x346   : > { %1137 = vadd.xlane.f32.xlu1 %v1136_v38 }
 0x348   : > { %927 = vadd.xlane.f32.xlu0 %v926_v40 }
 0x34a   : > { %1143 = vadd.xlane.f32.xlu1 %v1142_v41 }
 0x34e   : > { %924 = vadd.xlane.f32.xlu1 %v923_v43 }
 0x352   : > { %930 = vadd.xlane.f32.xlu1 %v929_v45 }
 0x3bd   : > { %v910_v46 = vpop.xlane.xlu0 %909 }
 0x3be   : > { %v933_v47 = vmul.f32 0.125, %v910_v46 }
 0x3bf   : > { %v913_v48 = vpop.xlane.xlu1 %912 }
 0x3c0   : > { %v3529_v49 = vsub.f32 %v3440_v1, %v933_v47  ;;  %v934_v50 = vmul.f32 0.125, %v913_v48 }
 0x3c1   : > { %v916_v52 = vpop.xlane.xlu0 %915 }
 0x3c2   : > { %v3531_v53 = vsub.f32 %v901_v6, %v934_v50  ;;  %v935_v54 = vmul.f32 0.125, %v916_v52  ;;  %v949_v55 = vmul.f32 %v3529_v49, %v3529_v49 }
 0x3c3   : > { %v919_v56 = vpop.xlane.xlu1 %918 }
 0x3c4   : > { %v3536_v57 = vsub.f32 %v3443_v2, %v935_v54  ;;  %v936_v59 = vmul.f32 0.125, %v919_v56  ;;  %v957_v60 = vsel %vm907_vm2, %v949_v55, 0.0  ;;  %v950_v61 = vmul.f32 %v3531_v53, %v3531_v53 }
 0x3c5   : > { %958 = vadd.xlane.f32.xlu0 %v957_v60  ;;  %v1135_v62 = vpop.xlane.xlu0 %1134 }
 0x3c6   : > { %v3542_v63 = vsub.f32 %v3453_v10, %v936_v59  ;;  %v960_v0 = vsel %vm907_vm2, %v950_v61, 0.0  ;;  %v951_v1 = vmul.f32 %v3536_v57, %v3536_v57  ;;  %v1149_v6 = vmul.f32 0.125, %v1135_v62 }
 0x3c7   : > { %961 = vadd.xlane.f32.xlu1 %v960_v0  ;;  %v1123_v3 = vpop.xlane.xlu1 %1122 }
 0x3c8   : > { %v1145_v2 = vmul.f32 0.125, %v1123_v3  ;;  %v963_v4 = vsel %vm907_vm2, %v951_v1, 0.0  ;;  %v952_v5 = vmul.f32 %v3542_v63, %v3542_v63  ;;  %v3557_v15 = vsub.f32 %v3458_v14, %v1149_v6 }
 0x3c9   : > { %964 = vadd.xlane.f32.xlu0 %v963_v4  ;;  %v1141_v7 = vpop.xlane.xlu0 %1140 }
 0x3ca   : > { %v3551_v9 = vsub.f32 %v3464_v18, %v1145_v2  ;;  %v966_v10 = vsel %vm907_vm2, %v952_v5, 0.0  ;;  %v1151_v16 = vmul.f32 0.125, %v1141_v7 }
 0x3cb   : > { %967 = vadd.xlane.f32.xlu1 %v966_v10  ;;  %v1129_v11 = vpop.xlane.xlu1 %1128 }
 0x3cc   : > { %v1147_v12 = vmul.f32 0.125, %v1129_v11  ;;  %v1161_v13 = vmul.f32 %v3551_v9, %v3551_v9  ;;  %v3569_v14 = vsub.f32 %v3470_v21, %v1151_v16 }
 0x3cd   : > { %v1126_v17 = vpop.xlane.xlu0 %1125 }
 0x3ce   : > { %v3560_v19 = vsub.f32 %v3476_v24, %v1147_v12  ;;  %v1146_v20 = vmul.f32 0.125, %v1126_v17  ;;  %v1169_v18 = vsel %vm907_vm2, %v1161_v13, 0.0  ;;  %v1165_v24 = vmul.f32 %v3557_v15, %v3557_v15 }
 0x3cf   : > { %1170 = vadd.xlane.f32.xlu0 %v1169_v18  ;;  %v1132_v22 = vpop.xlane.xlu1 %1131  ;;  %v1167_v47 = vmul.f32 %v3569_v14, %v3569_v14 }
 0x3d0   : > { %v3564_v23 = vsub.f32 %v3482_v27, %v1146_v20  ;;  %v1148_v25 = vmul.f32 0.125, %v1132_v22  ;;  %v1163_v26 = vmul.f32 %v3560_v19, %v3560_v19  ;;  %v1181_v43 = vsel %vm907_vm2, %v1165_v24, 0.0 }
 0x3d1   : > { %v922_v28 = vpop.xlane.xlu0 %921 }
 0x3d2   : > { %v3574_v30 = vsub.f32 %v3488_v29, %v1148_v25  ;;  %v937_v31 = vmul.f32 0.125, %v922_v28  ;;  %v1175_v34 = vsel %vm907_vm2, %v1163_v26, 0.0  ;;  %v1162_v27 = vmul.f32 %v3564_v23, %v3564_v23 }
 0x3d3   : > { %1176 = vadd.xlane.f32.xlu0 %v1175_v34  ;;  %v1138_v36 = vpop.xlane.xlu1 %1137 }
 0x3d4   : > { %v1150_v38 = vmul.f32 0.125, %v1138_v36  ;;  %v1172_v40 = vsel %vm907_vm2, %v1162_v27, 0.0  ;;  %v1164_v21 = vmul.f32 %v3574_v30, %v3574_v30  ;;  %v3584_v29 = vsub.f32 %v3493_v33, %v937_v31 }
 0x3d5   : > { %v928_v41 = vpop.xlane.xlu0 %927  ;;  %1173 = vadd.xlane.f32.xlu1 %v1172_v40 }
 0x3d6   : > { %v3587_v45 = vsub.f32 %v3499_v35, %v1150_v38  ;;  %v939_v46 = vmul.f32 0.125, %v928_v41  ;;  %v1178_v52 = vsel %vm907_vm2, %v1164_v21, 0.0  ;;  %v1187_v35 = vsel %vm907_vm2, %v1167_v47, 0.0 }
 0x3d7   : > { %1182 = vadd.xlane.f32.xlu0 %v1181_v43  ;;  %v1144_v48 = vpop.xlane.xlu1 %1143  ;;  %v953_v56 = vmul.f32 %v3584_v29, %v3584_v29 }
 0x3d8   : > { %v1152_v50 = vmul.f32 0.125, %v1144_v48  ;;  %v1166_v54 = vmul.f32 %v3587_v45, %v3587_v45  ;;  %v3595_v55 = vsub.f32 %v3504_v37, %v939_v46 }
 0x3d9   : > { %1179 = vadd.xlane.f32.xlu1 %v1178_v52 }
 0x3da   : > { %v3598_v33 = vsub.f32 %v3510_v39, %v1152_v50  ;;  %v1184_v61 = vsel %vm907_vm2, %v1166_v54, 0.0  ;;  %v969_v39 = vsel %vm907_vm2, %v953_v56, 0.0  ;;  %v955_v0 = vmul.f32 %v3595_v55, %v3595_v55 }
 0x3db   : > { %1188 = vadd.xlane.f32.xlu0 %v1187_v35  ;;  %v925_v59 = vpop.xlane.xlu1 %924 }
 0x3dc   : > { %v938_v60 = vmul.f32 0.125, %v925_v59  ;;  %v1168_v62 = vmul.f32 %v3598_v33, %v3598_v33 }
 0x3dd   : > { %1185 = vadd.xlane.f32.xlu1 %v1184_v61 }
 0x3de   : > { %v3607_v37 = vsub.f32 %v3518_v42, %v938_v60  ;;  %v1190_v2 = vsel %vm907_vm2, %v1168_v62, 0.0  ;;  %v975_v42 = vsel %vm907_vm2, %v955_v0, 0.0 }
 0x3df   : > { %970 = vadd.xlane.f32.xlu0 %v969_v39  ;;  %v931_v1 = vpop.xlane.xlu1 %930 }
 0x3e0   : > { %v940_v3 = vmul.f32 0.125, %v931_v1  ;;  %v954_v4 = vmul.f32 %v3607_v37, %v3607_v37 }
 0x3e1   : > { %1191 = vadd.xlane.f32.xlu1 %v1190_v2 }
 0x3e2   : > { %v3616_v5 = vsub.f32 %v3524_v44, %v940_v3  ;;  %v972_v6 = vsel %vm907_vm2, %v954_v4, 0.0 }
 0x3e3   : > { %976 = vadd.xlane.f32.xlu0 %v975_v42 }
 0x3e4   : > { %v956_v7 = vmul.f32 %v3616_v5, %v3616_v5 }
 0x3e5   : > { %973 = vadd.xlane.f32.xlu1 %v972_v6 }
 0x3e6   : > { %v978_v10 = vsel %vm907_vm2, %v956_v7, 0.0 }
 0x3e9   : > { %979 = vadd.xlane.f32.xlu1 %v978_v10 }
 0x452   : > { %v959_v11 = vpop.xlane.xlu0 %958 }
 0x453   : > { %v981_v41 = vmul.f32 0.125, %v959_v11 }
 0x454   : > { %v962_v12 = vpop.xlane.xlu1 %961 }
 0x455   : > { %v982_v17 = vmul.f32 0.125, %v962_v12  ;;  %v989_v35 = vadd.f32 1e-05, %v981_v41 }
 0x456   : > { %v965_v13 = vpop.xlane.xlu0 %964 }
 0x457   : > { %v983_v22 = vmul.f32 0.125, %v965_v13  ;;  %v990_v26 = vadd.f32 1e-05, %v982_v17 }
 0x458   : > { %v968_v20 = vpop.xlane.xlu1 %967 }
 0x459   : > { %v984_v34 = vmul.f32 0.125, %v968_v20  ;;  %v991_v38 = vadd.f32 1e-05, %v983_v22 }
 0x45b   : > { %v992_v48 = vadd.f32 1e-05, %v984_v34 }
 0x45c   : > { %v1171_v16 = vpop.xlane.xlu0 %1170 }
 0x45d   : > { %v1193_v44 = vmul.f32 0.125, %v1171_v16 }
 0x45f   : > { %v1201_v27 = vadd.f32 1e-05, %v1193_v44 }
 0x460   : > { %v1177_v18 = vpop.xlane.xlu0 %1176 }
 0x461   : > { %v1195_v25 = vmul.f32 0.125, %v1177_v18 }
 0x462   : > { %v1174_v28 = vpop.xlane.xlu1 %1173 }
 0x463   : > { %v1203_v24 = vadd.f32 1e-05, %v1195_v25  ;;  %v1194_v31 = vmul.f32 0.125, %v1174_v28  ;;  %v2546_v25 = vld [vmem:[#allocation7] ss:$0 sm:$0xff] }
 0x464   : > { %v1183_v36 = vpop.xlane.xlu0 %1182 }
 0x465   : > { %2841 = vrsqrt.f32 %v1203_v24  ;;  %v1202_v40 = vadd.f32 1e-05, %v1194_v31  ;;  %v1197_v21 = vmul.f32 0.125, %v1183_v36 }
 0x466   : > { %2843 = vrsqrt.f32 %v990_v26  ;;  %v1180_v43 = vpop.xlane.xlu1 %1179 }
 0x467   : > { %2845 = vrsqrt.f32 %v1202_v40  ;;  %v1205_v46 = vadd.f32 1e-05, %v1197_v21  ;;  %v1196_v47 = vmul.f32 0.125, %v1180_v43 }
 0x468   : > { %2847 = vrsqrt.f32 %v1201_v27  ;;  %v1189_v50 = vpop.xlane.xlu0 %1188 }
 0x469   : > { %2849 = vrsqrt.f32 %v991_v38  ;;  %v1204_v52 = vadd.f32 1e-05, %v1196_v47  ;;  %v1199_v54 = vmul.f32 0.125, %v1189_v50  ;;  %v2547_v50 = vld [vmem:[#allocation8] ss:$0 sm:$0xff] }
 0x46a   : > { %2851 = vrsqrt.f32 %v1205_v46  ;;  %v1186_v56 = vpop.xlane.xlu1 %1185 }
 0x46b   : > { %2853 = vrsqrt.f32 %v1204_v52  ;;  %v1207_v59 = vadd.f32 1e-05, %v1199_v54  ;;  %v1198_v60 = vmul.f32 0.125, %v1186_v56 }
 0x46c   : > { %2855 = vrsqrt.f32 %v992_v48  ;;  %v971_v61 = vpop.xlane.xlu0 %970 }
 0x46d   : > { %2857 = vrsqrt.f32 %v1207_v59  ;;  %v1206_v62 = vadd.f32 1e-05, %v1198_v60  ;;  %v985_v39 = vmul.f32 0.125, %v971_v61 }
 0x46e   : > { %2859 = vrsqrt.f32 %v989_v35  ;;  %v1192_v0 = vpop.xlane.xlu1 %1191 }
 0x46f   : > { %v2842_v1 = vpop.eup %2841  ;;  %2861 = vrsqrt.f32 %v1206_v62  ;;  %v993_v3 = vadd.f32 1e-05, %v985_v39  ;;  %v1200_v2 = vmul.f32 0.125, %v1192_v0 }
 0x470   : > { %v2844_v4 = vpop.eup %2843  ;;  %v977_v42 = vpop.xlane.xlu0 %976  ;;  %v1219_v12 = vmul.f32 %v2842_v1, %v3560_v19 }
 0x471   : > { %v2846_v6 = vpop.eup %2845  ;;  %v1208_v7 = vadd.f32 1e-05, %v1200_v2  ;;  %v987_v10 = vmul.f32 0.125, %v977_v42  ;;  %2863 = vrsqrt.f32 %v993_v3 }
 0x472   : > { %v2848_v11 = vpop.eup %2847  ;;  %v974_v13 = vpop.xlane.xlu1 %973  ;;  %v1218_v17 = vmul.f32 %v2846_v6, %v3564_v23  ;;  %v1233_v31 = vmul.f32 %v2546_v25, %v1219_v12  ;;  %v2545_v6 = vld [vmem:[#allocation5] ss:$0 sm:$0xff] }
 0x473   : > { %v2850_v16 = vpop.eup %2849  ;;  %2865 = vrsqrt.f32 %v1208_v7  ;;  %v995_v20 = vadd.f32 1e-05, %v987_v10  ;;  %v986_v44 = vmul.f32 0.125, %v974_v13  ;;  %v1217_v26 = vmul.f32 %v2848_v11, %v3551_v9 }
 0x474   : > { %v2852_v18 = vpop.eup %2851  ;;  %v1232_v36 = vmul.f32 %v2546_v25, %v1218_v17  ;;  %v1006_v9 = vmul.f32 %v2844_v4, %v3531_v53  ;;  %v1247_v59 = vadd.f32 %v2547_v50, %v1233_v31 }
 0x475   : > { %v2854_v22 = vpop.eup %2853  ;;  %2867 = vrsqrt.f32 %v995_v20  ;;  %v994_v28 = vadd.f32 1e-05, %v986_v44  ;;  %v1221_v38 = vmul.f32 %v2852_v18, %v3557_v15  ;;  %v1231_v47 = vmul.f32 %v2546_v25, %v1217_v26 }
 0x476   : > { %v2856_v24 = vpop.eup %2855  ;;  %v1220_v34 = vmul.f32 %v2854_v22, %v3574_v30  ;;  %v980_v19 = vpop.xlane.xlu1 %979  ;;  %v1007_v30 = vmul.f32 %v2850_v16, %v3536_v57  ;;  %v1246_v56 = vadd.f32 %v2547_v50, %v1232_v36 }
 0x477   : > { %v2858_v27 = vpop.eup %2857  ;;  %2869 = vrsqrt.f32 %v994_v28  ;;  %v988_v23 = vmul.f32 0.125, %v980_v19  ;;  %v1008_v46 = vmul.f32 %v2856_v24, %v3542_v63  ;;  %v1235_v35 = vmul.f32 %v2546_v25, %v1221_v38 }
 0x478   : > { %v2860_v40 = vpop.eup %2859  ;;  %v1234_v21 = vmul.f32 %v2546_v25, %v1220_v34  ;;  %v1223_v41 = vmul.f32 %v2858_v27, %v3569_v14  ;;  %v2544_v14 = vld [vmem:[#allocation2] ss:$0 sm:$0xff]  ;;  %v1245_v63 = vadd.f32 %v2547_v50, %v1231_v47 }
 0x479   : > { %v2862_v43 = vpop.eup %2861  ;;  %v996_v48 = vadd.f32 1e-05, %v988_v23  ;;  %v1005_v61 = vmul.f32 %v2860_v40, %v3529_v49  ;;  %v1022_v62 = vmul.f32 %v2544_v14, %v1008_v46  ;;  %v1020_v2 = vmul.f32 %v2544_v14, %v1006_v9 }
 0x47a   : > { %v1237_v52 = vmul.f32 %v2546_v25, %v1223_v41  ;;  %v1222_v54 = vmul.f32 %v2862_v43, %v3587_v45  ;;  %v1248_v15 = vadd.f32 %v2547_v50, %v1234_v21  ;;  %v1021_v45 = vmul.f32 %v2544_v14, %v1007_v30 }
 0x47b   : > { %2871 = vrsqrt.f32 %v996_v48  ;;  %v2864_v60 = vpop.eup %2863  ;;  %v1249_v4 = vadd.f32 %v2547_v50, %v1235_v35  ;;  %v1325_v42 = vcombine.low %v1245_v63, %v1247_v59  ;;  %v1019_v12 = vmul.f32 %v2544_v14, %v1005_v61 }
 0x47c   : > { %v1251_v39 = vadd.f32 %v2547_v50, %v1237_v52  ;;  %v1333_v0 = vcombine.low %v1246_v56, %v1248_v15  ;;  %v1236_v1 = vmul.f32 %v2546_v25, %v1222_v54  ;;  %v1009_v7 = vmul.f32 %v2864_v60, %v3584_v29 }
 0x47d   : > { %v2866_v53 = vpop.eup %2865  ;;  %v1036_v13 = vadd.f32 %v2545_v6, %v1022_v62  ;;  %v1034_v22 = vadd.f32 %v2545_v6, %v1020_v2  ;;  %v1035_v26 = vadd.f32 %v2545_v6, %v1021_v45  ;;  %v1332_v28 = vrot.slane %v1325_v42, %v3430_v51 }
 0x47e   : > { %v1224_v57 = vmul.f32 %v2866_v53, %v3598_v33  ;;  %v1340_v16 = vrot.slane %v1333_v0, %v3430_v51  ;;  %v1341_v17 = vcombine.low %v1249_v4, %v1251_v39  ;;  %v1250_v44 = vadd.f32 %v2547_v50, %v1236_v1 }
 0x47f   : > { %v2868_v3 = vpop.eup %2867  ;;  %v1023_v24 = vmul.f32 %v2544_v14, %v1009_v7  ;;  %v1033_v31 = vadd.f32 %v2545_v6, %v1019_v12  ;;  %v1261_v19 = vcombine.low %v1034_v22, %v1036_v13 }
 0x480   : > { %v1238_v10 = vmul.f32 %v2546_v25, %v1224_v57  ;;  %v1011_v11 = vmul.f32 %v2868_v3, %v3595_v55  ;;  %v1348_v55 = vrot.slane %v1341_v17, %v3430_v51  ;;  %v1357_v34 = vcombine.low %v1332_v28, %v1340_v16 }
 0x481   : > { %v2870_v49 = vpop.eup %2869  ;;  %v1253_v23 = vcombine.low %v1033_v31, %v1035_v26  ;;  %v1037_v40 = vadd.f32 %v2545_v6, %v1023_v24  ;;  %v1268_v46 = vrot.slane %v1261_v19, %v3430_v51  ;;  %v1358_v47 = vcombine.high %v1332_v28, %v1340_v16 }
 0x482   : > { %v1025_v20 = vmul.f32 %v2544_v14, %v1011_v11  ;;  %v1010_v33 = vmul.f32 %v2870_v49, %v3607_v37  ;;  %v1252_v18 = vadd.f32 %v2547_v50, %v1238_v10  ;;  %v1365_v9 = vrot.slane %v1357_v34, %v3434_v58 }
 0x483   : > { %v1260_v54 = vrot.slane %v1253_v23, %v3430_v51  ;;  %v1372_v60 = vrot.slane %v1358_v47, %v3434_v58 }
 0x484   : > { %v1349_v29 = vcombine.low %v1250_v44, %v1252_v18  ;;  %v1039_v27 = vadd.f32 %v2545_v6, %v1025_v20  ;;  %v1024_v36 = vmul.f32 %v2544_v14, %v1010_v33 }
 0x485   : > { %v2872_v25 = vpop.eup %2871  ;;  %v1285_v59 = vcombine.low %v1260_v54, %v1268_v46  ;;  %v1286_v4 = vcombine.high %v1260_v54, %v1268_v46 }
 0x486   : > { %v1012_v38 = vmul.f32 %v2872_v25, %v3616_v5  ;;  %v1356_v37 = vrot.slane %v1349_v29, %v3430_v51  ;;  %v1038_v48 = vadd.f32 %v2545_v6, %v1024_v36  ;;  %v1269_v52 = vcombine.low %v1037_v40, %v1039_v27 }
 0x487   : > { %v1293_v3 = vrot.slane %v1285_v59, %v3434_v58  ;;  %v1300_v17 = vrot.slane %v1286_v4, %v3434_v58 }
 0x488   : > { %v1026_v21 = vmul.f32 %v2544_v14, %v1012_v38  ;;  %v1373_v41 = vcombine.low %v1348_v55, %v1356_v37  ;;  %v1374_v43 = vcombine.high %v1348_v55, %v1356_v37  ;;  %v1276_v53 = vrot.slane %v1269_v52, %v3430_v51 }
 0x48a   : > { %v1040_v50 = vadd.f32 %v2545_v6, %v1026_v21  ;;  %v1381_v30 = vrot.slane %v1373_v41, %v3434_v58  ;;  %v1388_v5 = vrot.slane %v1374_v43, %v3434_v58 }
 0x48c   : > { %v1389_v15 = vcombine.low %v1365_v9, %v1381_v30  ;;  %v1390_v35 = vcombine.high %v1365_v9, %v1381_v30  ;;  %v1277_v56 = vcombine.low %v1038_v48, %v1040_v50  ;;  %v1391_v63 = vcombine.low %v1372_v60, %v1388_v5 }
 0x48d   : > { %v1392_v57 = vcombine.high %v1372_v60, %v1388_v5 }
 0x48e   : > { %v1393_v14 = vpack.c.bf16 %v1389_v15, %v1389_v15  ;;  %v1394_v61 = vpack.c.bf16 %v1390_v35, %v1390_v35  ;;  %v1284_v62 = vrot.slane %v1277_v56, %v3430_v51  ;;  %v1395_v7 = vpack.c.bf16 %v1391_v63, %v1391_v63 }
 0x48f   : > { %v1396_v10 = vpack.c.bf16 %v1392_v57, %v1392_v57 }
 0x490   : > { %v1552_v39 = vsel %vm1547_vm3, %v1393_v14, 0  ;;  %v1598_v0 = vsel %vm1547_vm3, %v1394_v61, 0  ;;  %v1301_v1 = vcombine.low %v1276_v53, %v1284_v62  ;;  %v1302_v2 = vcombine.high %v1276_v53, %v1284_v62 }
 0x491   : > { %2648 = vmatpush3.bf16.xpose.msra.mxu1 %v1552_v39  ;;  %2654 = vmatpush3.bf16.xpose.msra.mxu0 %v1598_v0  ;;  %v1644_v13 = vsel %vm1547_vm3, %v1395_v7, 0  ;;  %v1690_v16 = vsel %vm1547_vm3, %v1396_v10, 0 }
 0x492   : > { %v1309_v45 = vrot.slane %v1301_v1, %v3434_v58  ;;  %2659 = vmatprep.subr.bf16.mxu1 %v3086_v8  ;;  %2665 = vmatprep.subr.bf16.mxu0 %v3086_v8  ;;  %v1316_v12 = vrot.slane %v1302_v2, %v3434_v58 }
 0x494   : > { %v1317_v42 = vcombine.low %v1293_v3, %v1309_v45  ;;  %v1318_v6 = vcombine.high %v1293_v3, %v1309_v45  ;;  %v1319_v20 = vcombine.low %v1300_v17, %v1316_v12  ;;  %v1320_v33 = vcombine.high %v1300_v17, %v1316_v12 }
 0x496   : > { %v1321_v11 = vpack.c.bf16 %v1317_v42, %v1317_v42  ;;  %v1322_v49 = vpack.c.bf16 %v1318_v6, %v1318_v6  ;;  %v1323_v44 = vpack.c.bf16 %v1319_v20, %v1319_v20  ;;  %v1324_v18 = vpack.c.bf16 %v1320_v33, %v1320_v33 }
 0x498   : > { %2650 = vmatmul.mubr.msk.bf16.vlgmr.msra.gmra.mrb[0].mxu1 %vm1547_vm3, %v1321_v11  ;;  %2656 = vmatmul.mubr.msk.bf16.vlgmr.msra.gmra.mrb[12].mxu0 %vm1547_vm3, %v1322_v49 }
 0x499   : > { %2660 = vmatpush3.bf16.xpose.msra.mxu1 %v1644_v13  ;;  %2666 = vmatpush3.bf16.xpose.msra.mxu0 %v1690_v16 }
 0x49a   : > { %2661 = vmatprep.mubr.msk.bf16.mxu1 %vm3087_vm1, %v3086_v8  ;;  %2667 = vmatprep.mubr.msk.bf16.mxu0 %vm3087_vm1, %v3086_v8 }
 0x49b   : > { %2671 = vmatprep.subr.bf16.mxu1 %v3086_v8  ;;  %2677 = vmatprep.subr.bf16.mxu0 %v3086_v8 }
 0x4a0   : > { %2662 = vmatmul.mubr.msk.bf16.vlgmr.msra.gmra.mrb[4].mxu1 %vm1547_vm3, %v1323_v44  ;;  %2668 = vmatmul.mubr.msk.bf16.vlgmr.msra.gmra.mrb[16].mxu0 %vm1547_vm3, %v1324_v18 }
 0x4a1   : > { %2673 = vmatprep.mubr.msk.bf16.mxu1 %vm3087_vm1, %v3086_v8  ;;  %2679 = vmatprep.mubr.msk.bf16.mxu0 %vm3087_vm1, %v3086_v8 }
 0x56b   : > { %v1588_v22 = vpop.f32.mrb[0].mxu1  ;;  %v1634_v26 = vpop.f32.mrb[12].mxu0 }
 0x56c   : > { %v2651_v28 = vpop.f32.mrb[1].mxu1  ;;  %v2657_v24 = vpop.f32.mrb[13].mxu0  ;;  %v1732_v29 = vsel %vm1547_vm3, %v1588_v22, -inf  ;;  %v1735_v25 = vsel %vm1547_vm3, %v1634_v26, -inf }
 0x56d   : > { %1733 = vmax.xlane.f32.xlu0 %v1732_v29  ;;  %v1591_v31 = vpop.f32.mrb[2].mxu1  ;;  %1736 = vmax.xlane.f32.xlu1 %v1735_v25  ;;  %v1637_v55 = vpop.f32.mrb[14].mxu0 }
 0x56e   : > { %v2652_v34 = vpop.f32.mrb[3].mxu1  ;;  %v2658_v19 = vpop.f32.mrb[15].mxu0 }
 0x573   : > { %v1680_v27 = vpop.f32.mrb[4].mxu1  ;;  %v1726_v36 = vpop.f32.mrb[16].mxu0 }
 0x574   : > { %v2663_v38 = vpop.f32.mrb[5].mxu1  ;;  %v2669_v37 = vpop.f32.mrb[17].mxu0  ;;  %v1738_v23 = vsel %vm1547_vm3, %v1680_v27, -inf  ;;  %v1741_v40 = vsel %vm1547_vm3, %v1726_v36, -inf }
 0x575   : > { %1739 = vmax.xlane.f32.xlu0 %v1738_v23  ;;  %v1683_v21 = vpop.f32.mrb[6].mxu1  ;;  %1742 = vmax.xlane.f32.xlu1 %v1741_v40  ;;  %v1729_v41 = vpop.f32.mrb[18].mxu0 }
 0x576   : > { %v2664_v43 = vpop.f32.mrb[7].mxu1  ;;  %v2670_v9 = vpop.f32.mrb[19].mxu0 }
 0x586   : > { %1401 = vrot.lane.b32.xlu1 %v3421_v32, %s3090_s2 }
 0x5fa   : > { %v1734_v46 = vpop.xlane.xlu0 %1733  ;;  %v1737_v47 = vpop.xlane.xlu1 %1736 }
 0x5fb   : > { %v1744_v48 = vsub.f32 %v1588_v22, %v1734_v46  ;;  %v1745_v50 = vsub.f32 %v1634_v26, %v1737_v47 }
 0x5fd   : > { %v1748_v30 = vmul.f32 1.442695, %v1744_v48  ;;  %v1750_v52 = vmul.f32 1.442695, %v1745_v50 }
 0x5ff   : > { %2873 = vpow2.f32 %v1748_v30 }
 0x600   : > { %2875 = vpow2.f32 %v1750_v52 }
 0x602   : > { %v1740_v56 = vpop.xlane.xlu0 %1739  ;;  %v1743_v59 = vpop.xlane.xlu1 %1742 }
 0x603   : > { %v1746_v60 = vsub.f32 %v1680_v27, %v1740_v56  ;;  %v1747_v14 = vsub.f32 %v1726_v36, %v1743_v59 }
 0x605   : > { %v1752_v61 = vmul.f32 1.442695, %v1746_v60  ;;  %v1754_v53 = vmul.f32 1.442695, %v1747_v14 }
 0x606   : > { %v1402_v1 = vpop.permute.xlu1 %1401 }
 0x607   : > { %2877 = vpow2.f32 %v1752_v61  ;;  %v1407_v2 = vcombine.low %v3421_v32, %v1402_v1  ;;  %v1408_v45 = vcombine.high %v3421_v32, %v1402_v1 }
 0x608   : > { %2879 = vpow2.f32 %v1754_v53 }
 0x609   : > { %v3681_v54 = vpop.eup %2873  ;;  %v1415_v10 = vrot.slane %v1407_v2, %v3430_v51  ;;  %v1422_v11 = vrot.slane %v1408_v45, %v3430_v51 }
 0x60a   : > { %v3683_v5 = vpop.eup %2875  ;;  %v1756_v15 = vsel %vm1547_vm3, %v3681_v54, 0.0 }
 0x60b   : > { %1757 = vadd.xlane.f32.xlu0 %v1756_v15  ;;  %v1759_v35 = vsel %vm1547_vm3, %v3683_v5, 0.0 }
 0x60c   : > { %1760 = vadd.xlane.f32.xlu1 %v1759_v35 }
 0x611   : > { %v3693_v62 = vpop.eup %2877 }
 0x612   : > { %v3695_v63 = vpop.eup %2879  ;;  %v1762_v39 = vsel %vm1547_vm3, %v3693_v62, 0.0 }
 0x613   : > { %v1765_v0 = vsel %vm1547_vm3, %v3695_v63, 0.0 }
 0x61d   : > { %1404 = vrot.lane.b32.xlu1 %v3421_v32, %s3088_s17 }
 0x621   : > { %1398 = vrot.lane.b32.xlu0 %v3421_v32, %s3089_s29 }
 0x640   : > { %1763 = vadd.xlane.f32.xlu0 %v1762_v39 }
 0x641   : > { %1766 = vadd.xlane.f32.xlu1 %v1765_v0 }
 0x698   : > { %v1758_v57 = vpop.xlane.xlu0 %1757 }
 0x699   : > { %v1761_v3 = vpop.xlane.xlu1 %1760  ;;  %2881 = vrcp.f32 %v1758_v57 }
 0x69a   : > { %2883 = vrcp.f32 %v1761_v3 }
 0x69c   : > { %v1399_v4 = vpop.permute.xlu0 %1398 }
 0x69d   : > { %v1405_v42 = vpop.permute.xlu1 %1404 }
 0x69e   : > { %v1423_v6 = vcombine.low %v1399_v4, %v1405_v42  ;;  %v1424_v7 = vcombine.high %v1399_v4, %v1405_v42 }
 0x6a0   : > { %v1431_v49 = vrot.slane %v1423_v6, %v3430_v51  ;;  %v1438_v12 = vrot.slane %v1424_v7, %v3430_v51 }
 0x6a2   : > { %v1439_v13 = vcombine.low %v1415_v10, %v1431_v49  ;;  %v1440_v16 = vcombine.high %v1415_v10, %v1431_v49  ;;  %v1455_v17 = vcombine.low %v1422_v11, %v1438_v12  ;;  %v1456_v20 = vcombine.high %v1422_v11, %v1438_v12 }
 0x6a3   : > { %v2882_v23 = vpop.eup %2881 }
 0x6a4   : > { %v1447_v32 = vrot.slane %v1439_v13, %v3434_v58  ;;  %v1454_v33 = vrot.slane %v1440_v16, %v3434_v58  ;;  %v1463_v44 = vrot.slane %v1455_v17, %v3434_v58  ;;  %v1470_v18 = vrot.slane %v1456_v20, %v3434_v58  ;;  %v2884_v41 = vpop.eup %2883 }
 0x6a5   : > { %v1772_v48 = vmul.f32 %v2882_v23, %v3681_v54  ;;  %v1773_v50 = vmul.f32 %v2884_v41, %v3683_v5 }
 0x6a6   : > { %v1475_v22 = vcombine.low %v1447_v32, %v1454_v33  ;;  %v2548_v26 = vcombine.high %v1447_v32, %v1454_v33  ;;  %v1491_v28 = vcombine.low %v1463_v44, %v1470_v18  ;;  %v2549_v24 = vcombine.high %v1463_v44, %v1470_v18 }
 0x6a7   : > { %v1776_v60 = vpack.c.bf16 %v1772_v48, %v1772_v48  ;;  %v1777_v14 = vpack.c.bf16 %v1773_v50, %v1773_v50 }
 0x6a8   : > { %v1482_v29 = vrot.slane %v1475_v22, %v3430_v51  ;;  %v1490_v25 = vrot.slane %v2548_v26, %v3430_v51  ;;  %v1498_v31 = vrot.slane %v1491_v28, %v3430_v51  ;;  %v1506_v55 = vrot.slane %v2549_v24, %v3430_v51 }
 0x6aa   : > { %v1507_v34 = vcombine.low %v1482_v29, %v1490_v25  ;;  %v1508_v19 = vcombine.high %v1482_v29, %v1490_v25  ;;  %v1523_v27 = vcombine.low %v1498_v31, %v1506_v55  ;;  %v1524_v36 = vcombine.high %v1498_v31, %v1506_v55 }
 0x6ac   : > { %v1515_v38 = vrot.slane %v1507_v34, %v3434_v58  ;;  %v1522_v37 = vrot.slane %v1508_v19, %v3434_v58  ;;  %v1531_v40 = vrot.slane %v1523_v27, %v3434_v58  ;;  %v1538_v21 = vrot.slane %v1524_v36, %v3434_v58  ;;  %v2827_v19 = vld [vmem:[%s3891_s10] sm:$0xff]  }
 0x6ae   : > { %v1539_v43 = vcombine.low %v1515_v38, %v1531_v40  ;;  %v1540_v9 = vcombine.high %v1515_v38, %v1531_v40  ;;  %v1541_v46 = vcombine.low %v1522_v37, %v1538_v21  ;;  %v1542_v47 = vcombine.high %v1522_v37, %v1538_v21 }
 0x6b0   : > { %v1543_v30 = vpack.c.bf16 %v1539_v43, %v1539_v43  ;;  %v1544_v52 = vpack.c.bf16 %v1540_v9, %v1540_v9  ;;  %v1545_v56 = vpack.c.bf16 %v1541_v46, %v1541_v46  ;;  %v1546_v59 = vpack.c.bf16 %v1542_v47, %v1542_v47  ;;  %v2828_v43 = vld [vmem:[%s3891_s10 + $0x8] sm:$0xff]  }
 0x6b2   : > { %v1785_v15 = vsel %vm1783_vm4, %v1543_v30, 0  ;;  %v1831_v35 = vsel %vm1783_vm4, %v1544_v52, 0  ;;  %v1877_v54 = vsel %vm1783_vm4, %v1545_v56, 0  ;;  %v1923_v5 = vsel %vm1783_vm4, %v1546_v59, 0 }
 0x6b3   : > { %2672 = vmatpush3.bf16.msra.mxu1 %v1785_v15  ;;  %2678 = vmatpush3.bf16.msra.mxu0 %v1831_v35 }
 0x6b4   : > { %2683 = vmatprep.subr.bf16.mxu1 %v3086_v8  ;;  %2689 = vmatprep.subr.bf16.mxu0 %v3086_v8 }
 0x6b6   : > { %2674 = vmatmul.mubr.msk.bf16.vlgmr.msra.gmra.mrb[8].mxu1 %vm1547_vm3, %v1776_v60  ;;  %2680 = vmatmul.mubr.msk.bf16.vlgmr.msra.gmra.mrb[20].mxu0 %vm1547_vm3, %v1777_v14 }
 0x6b7   : > { %2684 = vmatpush3.bf16.msra.mxu1 %v1877_v54  ;;  %2690 = vmatpush3.bf16.msra.mxu0 %v1923_v5 }
 0x6b8   : > { %2685 = vmatprep.mubr.msk.bf16.mxu1 %vm3087_vm1, %v3086_v8  ;;  %2691 = vmatprep.mubr.msk.bf16.mxu0 %vm3087_vm1, %v3086_v8 }
 0x6b9   : > { %2695 = vmatprep.subr.bf16.mxu1 %v3086_v8  ;;  %2703 = vmatprep.subr.bf16.mxu0 %v3086_v8 }
 0x6cd   : > { %v1764_v61 = vpop.xlane.xlu0 %1763 }
 0x6ce   : > { %2885 = vrcp.f32 %v1764_v61  ;;  %v1767_v53 = vpop.xlane.xlu1 %1766 }
 0x6cf   : > { %2887 = vrcp.f32 %v1767_v53 }
 0x6d8   : > { %v2886_v39 = vpop.eup %2885 }
 0x6d9   : > { %v2888_v0 = vpop.eup %2887  ;;  %v1774_v1 = vmul.f32 %v2886_v39, %v3693_v62 }
 0x6da   : > { %v1775_v57 = vmul.f32 %v2888_v0, %v3695_v63 }
 0x6db   : > { %v1778_v3 = vpack.c.bf16 %v1774_v1, %v1774_v1 }
 0x6dc   : > { %v1779_v2 = vpack.c.bf16 %v1775_v57, %v1775_v57 }
 0x6dd   : > { %2686 = vmatmul.mubr.msk.bf16.vlgmr.msra.gmra.mrb[12].mxu1 %vm1547_vm3, %v1778_v3  ;;  %v2560_v3 = vld [vmem:[%s3892_s11] ss:$0 sm:$0xff] }
 0x6de   : > { %2692 = vmatmul.mubr.msk.bf16.vlgmr.msra.gmra.mrb[24].mxu0 %vm1547_vm3, %v1779_v2  ;;  %2699 = vmatprep.mubr.msk.bf16.mxu1 %vm3087_vm1, %v3086_v8 }
 0x6df   : > { %2707 = vmatprep.mubr.msk.bf16.mxu0 %vm3087_vm1, %v3086_v8  ;;  %2696 = vmatpush3.bf16.msra.mxu1 %v2827_v19  ;;  %v2835_v19 = vld [vmem:[%s3897_s16 + $0x20] sm:$0xff]  }
 0x6e0   : > { %2697 = vmatprep.subr.bf16.mxu1 %v3086_v8 }
 0x6e3   : > { %2698 = vmatpush3.bf16.msra.mxu1 %v2828_v43 }
 0x6e4   : > { %2711 = vmatprep.subr.bf16.mxu1 %v3086_v8 }
 0x789   : > { %v1821_v45 = vpop.f32.mrb[8].mxu1  ;;  %v1867_v4 = vpop.f32.mrb[20].mxu0 }
 0x78a   : > { %v2675_v42 = vpop.f32.mrb[9].mxu1  ;;  %v2681_v6 = vpop.f32.mrb[21].mxu0 }
 0x78b   : > { %v1824_v7 = vpop.f32.mrb[10].mxu1  ;;  %v1870_v62 = vpop.f32.mrb[22].mxu0  ;;  %v2893_v6 = vld [vmem:[%s3366_s22] sm:$0xff]  ;;  %s2580_s22 = sshll.u32 %s3213_s0, 7 }
 0x78c   : > { %v2676_v10 = vpop.f32.mrb[11].mxu1  ;;  %v2682_v63 = vpop.f32.mrb[23].mxu0  ;;  %s3838_s24 = scalar_lea.hbm %s3941_s23, %s2580_s22 }
 0x7b0   : > { %v1913_v11 = vpop.f32.mrb[12].mxu1 }
 0x7b1   : > { %v1965_v49 = vcombine.low %v1821_v45, %v1913_v11  ;;  %v1966_v12 = vcombine.high %v1821_v45, %v1913_v11  ;;  %v1959_v13 = vpop.f32.mrb[24].mxu0  ;;  %v2687_v16 = vpop.f32.mrb[13].mxu1 }
 0x7b2   : > { %v1981_v17 = vcombine.low %v1867_v4, %v1959_v13  ;;  %v1982_v20 = vcombine.high %v1867_v4, %v1959_v13  ;;  %v2693_v32 = vpop.f32.mrb[25].mxu0  ;;  %v1916_v33 = vpop.f32.mrb[14].mxu1  ;;  %v2829_v16 = vld [vmem:[%s3895_s14] sm:$0xff]  }
 0x7b3   : > { %v1973_v44 = vrot.slane %v1965_v49, %v3430_v51  ;;  %v1980_v18 = vrot.slane %v1966_v12, %v3430_v51  ;;  %v1962_v22 = vpop.f32.mrb[26].mxu0  ;;  %v2688_v26 = vpop.f32.mrb[15].mxu1  ;;  %2704 = vmatpush3.bf16.msra.mxu0 %v2829_v16 }
 0x7b4   : > { %v1989_v28 = vrot.slane %v1981_v17, %v3430_v51  ;;  %v1996_v24 = vrot.slane %v1982_v20, %v3430_v51  ;;  %v2694_v29 = vpop.f32.mrb[27].mxu0  ;;  %v2830_v17 = vld [vmem:[%s3895_s14 + $0x8] sm:$0xff]   ;;  %2705 = vmatprep.subr.bf16.mxu0 %v3086_v8  ;;  %v2831_v20 = vld [vmem:[%s3897_s16] sm:$0xff]  }
 0x7b5   : > { %v2564_v22 = vld [vmem:[%s3893_s12] ss:$0 sm:$0xff] }
 0x7b6   : > { %v1997_v25 = vcombine.low %v1973_v44, %v1989_v28  ;;  %v1998_v31 = vcombine.high %v1973_v44, %v1989_v28  ;;  %v2013_v55 = vcombine.low %v1980_v18, %v1996_v24  ;;  %v2014_v34 = vcombine.high %v1980_v18, %v1996_v24  ;;  %v2565_v28 = vld [vmem:[%s3894_s13] ss:$0 sm:$0xff] }
 0x7b7   : > { %2706 = vmatpush3.bf16.msra.mxu0 %v2830_v17 }
 0x7b8   : > { %v2005_v27 = vrot.slane %v1997_v25, %v3434_v58  ;;  %v2012_v36 = vrot.slane %v1998_v31, %v3434_v58  ;;  %v2021_v38 = vrot.slane %v2013_v55, %v3434_v58  ;;  %v2028_v37 = vrot.slane %v2014_v34, %v3434_v58  ;;  %v2832_v31 = vld [vmem:[%s3897_s16 + $0x8] sm:$0xff]   ;;  %v2833_v55 = vld [vmem:[%s3897_s16 + $0x10] sm:$0xff]   ;;  %v2834_v34 = vld [vmem:[%s3897_s16 + $0x18] sm:$0xff]  }
 0x7ba   : > { %v2033_v23 = vcombine.low %v2005_v27, %v2012_v36  ;;  %v2558_v40 = vcombine.high %v2005_v27, %v2012_v36  ;;  %v2049_v21 = vcombine.low %v2021_v38, %v2028_v37  ;;  %v2559_v41 = vcombine.high %v2021_v38, %v2028_v37  ;;  %v2836_v27 = vld [vmem:[%s3897_s16 + $0x28] sm:$0xff]   ;;  %v2837_v36 = vld [vmem:[%s3897_s16 + $0x30] sm:$0xff]   ;;  %v2838_v38 = vld [vmem:[%s3897_s16 + $0x38] sm:$0xff]  }
 0x7bb   : > { %v2566_v37 = vld [vmem:[%s3896_s15] ss:$0 sm:$0xff] }
 0x7bc   : > { %v2040_v9 = vrot.slane %v2033_v23, %v3430_v51  ;;  %v2048_v46 = vrot.slane %v2558_v40, %v3430_v51  ;;  %v2056_v47 = vrot.slane %v2049_v21, %v3430_v51  ;;  %v2064_v48 = vrot.slane %v2559_v41, %v3430_v51 }
 0x7be   : > { %v2066_v50 = vcombine.high %v2040_v9, %v2048_v46  ;;  %v2082_v30 = vcombine.high %v2056_v47, %v2064_v48  ;;  %v2065_v52 = vcombine.low %v2040_v9, %v2048_v46  ;;  %v2081_v15 = vcombine.low %v2056_v47, %v2064_v48 }
 0x7c0   : > { %v2080_v35 = vrot.slane %v2066_v50, %v3434_v58  ;;  %v2096_v56 = vrot.slane %v2082_v30, %v3434_v58  ;;  %v2073_v59 = vrot.slane %v2065_v52, %v3434_v58  ;;  %v2089_v60 = vrot.slane %v2081_v15, %v3434_v58 }
 0x7c2   : > { %v2099_v14 = vcombine.low %v2080_v35, %v2096_v56  ;;  %v2098_v54 = vcombine.high %v2073_v59, %v2089_v60  ;;  %v2100_v5 = vcombine.high %v2080_v35, %v2096_v56  ;;  %v2097_v61 = vcombine.low %v2073_v59, %v2089_v60  ;;  %v2570_v56 = vld [vmem:[%s3939_s26] ss:$0 sm:$0xff] }
 0x7c4   : > { %2106 = vrot.lane.b32.xlu1 %v2099_v14, %s3093_s19  ;;  %2102 = vrot.lane.b32.xlu0 %v2098_v54, %s3094_s18  ;;  %s615_s18 = sand.u32 1, %s3072_s28   ;;  %s3096_s19 = smov [#allocation10]  }
 0x7c5   : > { %s2406_s0 = scalar_lea.sflag [#allocation4], %s615_s18 }
 0x7c8   : > { %2110 = vrot.lane.b32.xlu0 %v2100_v5, %s3095_s25  ;;  %s2531_s25 = sshll.u32 %s615_s18, 3 }
 0x7c9   : > { %s617_s17 = scalar_lea.vmem [#allocation10], %s2531_s25  ;;  %s3010_s25 = sshll.u32 %s3096_s19, 4  ;;  %s3011_s25 = int_to_ptr.vmem [resolvable:$false] %s3010_s25 }
 0x7ca   : > { %s2419_s29 = sshll.u32 %s617_s17, 4  ;;  %s3012_s1 = scalar_lea.vmem %s3011_s25, 256  ;;  %s3840_s29 = int_to_ptr.vmem [resolvable:$true] %s2419_s29 }
 0x7cb   : > { %s3006_s21 = scalar_lea.vmem %s3840_s29, 128  ;;  %p3013_p8 = scmp.lt.s32.totalorder %s3840_s29, %s3011_s25 }
 0x7cc   : > { %p3007_p2 = scmp.ne.s32.totalorder %s3840_s29, %s3006_s21  ;;  %p3014_p11 = scmp.lt.s32.totalorder %s3012_s1, %s3006_s21 }
 0x7ce   : > { %p3008_p4 = pnand %p3007_p2, %p3942_p3  ;;  %p3015_p13 = por %p3014_p11, %p3013_p8 }
 0x7d0   : > { %p3009_p7 = pneg %p3008_p4 }
 0x7d2   : > { %p3016_p1 = pnand %p3015_p13, %p3009_p7 }
 0x836   : > { %v2103_v51 = vpop.permute.xlu0 %2102  ;;  %v2107_v53 = vpop.permute.xlu1 %2106 }
 0x837   : > { %v2113_v39 = vsel %vm1547_vm3, %v2097_v61, %v2103_v51 }
 0x838   : > { %v2115_v1 = vsel %vm2114_vm5, %v2113_v39, %v2107_v53 }
 0x83a   : > { %v2111_v0 = vpop.permute.xlu0 %2110 }
 0x83b   : > { %v2117_v58 = vsel %vm2116_vm6, %v2115_v1, %v2111_v0 }
 0x83c   : > { %v2118_v57 = vpack.c.bf16 %v2117_v58, %v2117_v58 }
 0x83e   : > { %2700 = vmatmul.mubr.msk.bf16.vlgmr.msra.gmra.mrb[16].mxu1 %vm626_vm0, %v2118_v57 }
 0x83f   : > { %2727 = vmatprep.mubr.msk.bf16.mxu1 %vm3087_vm1, %v3086_v8  ;;  %2712 = vmatpush3.bf16.msra.mxu1 %v2831_v20 }
 0x840   : > { %2713 = vmatprep.subr.bf16.mxu1 %v3086_v8 }
 0x843   : > { %2714 = vmatpush3.bf16.msra.mxu1 %v2832_v31 }
 0x844   : > { %2715 = vmatprep.subr.bf16.mxu1 %v3086_v8 }
 0x847   : > { %2716 = vmatpush3.bf16.msra.mxu1 %v2833_v55 }
 0x848   : > { %2717 = vmatprep.subr.bf16.mxu1 %v3086_v8 }
 0x84b   : > { %2718 = vmatpush3.bf16.msra.mxu1 %v2834_v34 }
 0x84c   : > { %2719 = vmatprep.subr.bf16.mxu1 %v3086_v8 }
 0x84f   : > { %2720 = vmatpush3.bf16.msra.mxu1 %v2835_v19 }
 0x850   : > { %2721 = vmatprep.subr.bf16.mxu1 %v3086_v8 }
 0x853   : > { %2722 = vmatpush3.bf16.msra.mxu1 %v2836_v27 }
 0x854   : > { %2723 = vmatprep.subr.bf16.mxu1 %v3086_v8 }
 0x857   : > { %2724 = vmatpush3.bf16.msra.mxu1 %v2837_v36 }
 0x858   : > { %2725 = vmatprep.subr.bf16.mxu1 %v3086_v8 }
 0x85b   : > { %2726 = vmatpush3.bf16.msra.mxu1 %v2838_v38 }
 0x911   : > { %v2179_v2 = vpop.f32.mrb[16].mxu1 }
 0x912   : > { %v2180_v45 = vadd.f32 %v2560_v3, %v2179_v2  ;;  %v2701_v4 = vpop.f32.mrb[17].mxu1 }
 0x913   : > { %v2182_v42 = vpop.f32.mrb[18].mxu1 }
 0x914   : > { %v3775_v7 = vadd.f32 %v2893_v6, %v2180_v45  ;;  %v2702_v62 = vpop.f32.mrb[19].mxu1 }
 0x916   : > { %v2188_v10 = vsel %vm626_vm0, %v3775_v7, 0.0 }
 0x917   : > { %2189 = vadd.xlane.f32.xlu1 %v2188_v10 }
 0x9a4   : > { %v2190_v63 = vpop.xlane.xlu1 %2189 }
 0x9a5   : > { %v2191_v11 = vmul.f32 0.03125, %v2190_v63 }
 0x9a7   : > { %v2192_v49 = vsub.f32 %v3775_v7, %v2191_v11 }
 0x9a9   : > { %v2193_v12 = vmul.f32 %v2192_v49, %v2192_v49 }
 0x9ab   : > { %v2194_v13 = vsel %vm626_vm0, %v2193_v12, 0.0 }
 0x9ac   : > { %2195 = vadd.xlane.f32.xlu0 %v2194_v13 }
 0xa39   : > { %v2196_v32 = vpop.xlane.xlu0 %2195 }
 0xa3a   : > { %v2197_v33 = vmul.f32 0.03125, %v2196_v32 }
 0xa3c   : > { %v2198_v44 = vadd.f32 1e-05, %v2197_v33 }
 0xa3e   : > { %2889 = vrsqrt.f32 %v2198_v44 }
 0xa48   : > { %v2890_v18 = vpop.eup %2889 }
 0xa49   : > { %v2200_v26 = vmul.f32 %v2890_v18, %v2192_v49 }
 0xa4b   : > { %v2207_v24 = vmul.f32 %v2564_v22, %v2200_v26 }
 0xa4d   : > { %v2214_v29 = vadd.f32 %v2565_v28, %v2207_v24 }
 0xa4f   : > { %v2215_v25 = vpack.c.bf16 %v2214_v29, %v2214_v29 }
 0xa51   : > { %2708 = vmatmul.mubr.msk.bf16.vlgmr.msra.gmra.mrb[28].mxu0 %vm626_vm0, %v2215_v25 }
 0xb24   : > { %v2276_v23 = vpop.f32.mrb[28].mxu0 }
 0xb25   : > { %v2277_v40 = vadd.f32 %v2566_v37, %v2276_v23  ;;  %v2709_v21 = vpop.f32.mrb[29].mxu0 }
 0xb26   : > { %v2279_v41 = vpop.f32.mrb[30].mxu0 }
 0xb27   : > { %v2283_v43 = vmul.f32 0.044715, %v2277_v40  ;;  %v2710_v9 = vpop.f32.mrb[31].mxu0  ;;  %v2282_v8 = vmul.f32 0.5, %v2277_v40 }
 0xb29   : > { %v2284_v46 = vmul.f32 %v2283_v43, %v2277_v40 }
 0xb2b   : > { %v2285_v47 = vmul.f32 %v2284_v46, %v2277_v40 }
 0xb2d   : > { %v2286_v48 = vadd.f32 %v2285_v47, %v2277_v40 }
 0xb2f   : > { %v2287_v50 = vmul.f32 0.7978846, %v2286_v48 }
 0xb31   : > { %2891 = vtanh.f32 %v2287_v50 }
 0xb3b   : > { %v2892_v30 = vpop.eup %2891 }
 0xb3c   : > { %v2289_v52 = vadd.f32 1.0, %v2892_v30 }
 0xb3e   : > { %v2290_v15 = vmul.f32 %v2289_v52, %v2282_v8 }
 0xb40   : > { %v2291_v35 = vpack.c.bf16 %v2290_v15, %v2290_v15 }
 0xb42   : > { %2728 = vmatmul.mubr.bf16.vlgmr.msra.gmra.mrb[20].mxu1 %v2291_v35 }
 0xc15   : > { %v2397_v59 = vpop.f32.mrb[20].mxu1 }
 0xc16   : > { %v2398_v60 = vadd.f32 %v2570_v56, %v2397_v59  ;;  %v2729_v14 = vpop.f32.mrb[21].mxu1 }
 0xc17   : > { %v2400_v54 = vpop.f32.mrb[22].mxu1 }
 0xc18   : > { %v2403_v5 = vadd.f32 %v2398_v60, %v3775_v7  ;;  %v2730_v61 = vpop.f32.mrb[23].mxu1 }
 0xc1a   : > { %2404 = vst.msk [vmem:[%s617_s17] sm:$0xff] %vm626_vm0, %v2403_v5 }
 0xc1b   : > { %3019 = shalt.err (!%p3016_p1)
}
 0xc1c   : > { %s3020_s18 = scalar_lea.hbm %s3838_s24, 128  ;;  %s3024_s22 = scalar_lea.hbm %s3941_s23, 256 }
 0xc1d   : > { %p3021_p0 = scmp.ne.s32.totalorder %s3838_s24, %s3020_s18  ;;  %p3025_p9 = scmp.lt.u32.totalorder %s3838_s24, %s3941_s23 }
 0xc1e   : > { %p3026_p12 = scmp.lt.u32.totalorder %s3024_s22, %s3020_s18  ;;  %p3028_p2 = scmp.lt.u32.totalorder %s3020_s18, %s3838_s24 }
 0xc1f   : > { %p3022_p6 = pnand %p3021_p0, %p3942_p3 }
 0xc20   : > { %p3027_p10 = por %p3026_p12, %p3025_p9 }
 0xc21   : > { %p3023_p5 = pneg %p3022_p6 }
 0xc22   : > { %p3029_p4 = por %p3028_p2, %p3027_p10 }
 0xc24   : > { %p3030_p7 = pnand %p3029_p4, %p3023_p5 }
 0xc26   : > { %3033 = shalt.err (!%p3030_p7)
}
 0xc27   : > { %2747 = dma.vmem_to_hbm [thread:$0]  (%p3942_p3), %s3840_s29, 128, %s3838_s24, %s2406_s0  }
 0xc28 PF: > { %s3943_s30 = sld [smem:[#allocation17_spill]]  ;;  %s3944_s21 = sld [smem:[#allocation15_spill]] }
 0xc29   : > { %s3945_s19 = sld [smem:[#allocation21_spill]] }
 0xc2e   : > { %p2774_p8 = scmp.ge.s32.totalorder %s3943_s30, 2  ;;  %s2431_s25 = sand.u32 1, %s3944_s21  }
 0xc2f   : > { %p3946_p11 = scmp.ne.s32.totalorder %s3945_s19, 0  ;;  %s2432_s1 = scalar_lea.sflag [#allocation4], %s2431_s25 }
 0xc31   : > { %p2763_p13 = pnand %p2774_p8, %p3946_p11 }
 0xc33   : > { %3063 = dma.done.wait (!%p2763_p13), %s2432_s1, 128  }
 0xc34   : > { %3065 = vsyncadd (!%p2763_p13), %s2432_s1, 4294967168  ;;  %s3947_s30 = sld [smem:[#allocation18_spill]]  ;;  %s3948_s18 = sld [smem:[#allocation16_spill]] }
 0xc35   : > { %s3949_s29 = sld [smem:[#allocation19_spill]]  ;;  %s3950_s27 = smov %s3072_s28 }
 0xc3a   : > { %p31_p1 = scmp.ge.s32.totalorder %s3947_s30, 4   ;;  %s3951_s28 = smov %s3948_s18 }
 0xc3c   :  { %33 = sbr.rel (!%p31_p1) target bundleno = 12 (0xc), region = 144 }
 0xc43   :  { %2437 = vsyncpa [#allocation3], 1 }
 0xc44   :  { %2439 = vsyncpa [#allocation3 + $0x1], 1 }
 0xc45   :  { %2440 = vsyncpa [#allocation6], 1 }
 0xc46   :  { %2441 = vsyncpa [#allocation9], 1 }
 0xc47   :  { %2442 = vsyncpa [#allocation4], 1 }
 0xc48   :  { %2444 = vsyncpa [#allocation4 + $0x1], 1 }

// kernel: tpu_custom_call.1
= control target key start
LH: loop header
LB: loop body
LE: loop exit
PB: predicated region body
PF: predicated region fallthrough
CT: control target
= control target key end

     0   :  { %s3117_s0 = inlined_call_operand.vmem [shape: f32[2,8,32], index: 0, kind: input, shape index: {}]   ;;  %s3118_s1 = inlined_call_operand.vmem [shape: f32[1,32], index: 1, kind: input, shape index: {}]   ;;  %s3119_s2 = inlined_call_operand.vmem [shape: f32[1,32], index: 2, kind: input, shape index: {}]   ;;  %s3120_s3 = inlined_call_operand.vmem [shape: bf16[32,32], index: 3, kind: input, shape index: {}]   ;;  %s3121_s4 = inlined_call_operand.vmem [shape: bf16[32,32], index: 4, kind: input, shape index: {}]   ;;  %s3122_s5 = inlined_call_operand.vmem [shape: bf16[32,32], index: 5, kind: input, shape index: {}]   ;;  %s3123_s6 = inlined_call_operand.hbm [shape: f32[1,8], index: 6, kind: input, shape index: {}]   ;;  %s3124_s7 = inlined_call_operand.hbm [shape: f32[1,8], index: 7, kind: input, shape index: {}]   ;;  %s3125_s8 = inlined_call_operand.hbm [shape: f32[1,8], index: 8, kind: input, shape index: {}]   ;;  %s3126_s9 = inlined_call_operand.hbm [shape: f32[1,8], index: 9, kind: input, shape index: {}]   ;;  %s3127_s10 = inlined_call_operand.vmem [shape: bf16[32,32], index: 10, kind: input, shape index: {}]   ;;  %s3128_s11 = inlined_call_operand.vmem [shape: f32[1,32], index: 11, kind: input, shape index: {}]   ;;  %s3129_s12 = inlined_call_operand.vmem [shape: f32[1,32], index: 12, kind: input, shape index: {}]   ;;  %s3130_s13 = inlined_call_operand.vmem [shape: f32[1,32], index: 13, kind: input, shape index: {}]   ;;  %s3131_s14 = inlined_call_operand.vmem [shape: bf16[32,128], index: 14, kind: input, shape index: {}]   ;;  %s3132_s15 = inlined_call_operand.vmem [shape: f32[1,128], index: 15, kind: input, shape index: {}]   ;;  %s3133_s16 = inlined_call_operand.vmem [shape: bf16[128,32], index: 16, kind: input, shape index: {}]   ;;  %s3134_s17 = inlined_call_operand.vmem [shape: f32[1,32], index: 17, kind: input, shape index: {}]   ;;  %s3135_s18 = inlined_call_operand.hbm [shape: f32[2,8,32], index: 18, kind: output, shape index: {}]  }
   0x1   :  { %3148 = sst [smem:[#allocation22_spill]] %s3117_s0 }
   0x2   :  { %3149 = sst [smem:[#allocation23_spill]] %s3118_s1 }
   0x3   :  { %3150 = sst [smem:[#allocation24_spill]] %s3119_s2 }
   0x4   :  { %3151 = sst [smem:[#allocation25_spill]] %s3134_s17 }
   0x5   :  { %3152 = sst [smem:[#allocation26_spill]] %s3135_s18 }
   0x6   :  { %23 = vsyncpa [#allocation3], 0 }
   0x7   :  { %24 = vsyncpa [#allocation6], 0 }
   0x8   :  { %25 = vsyncpa [#allocation9], 0 }
   0x9   :  { %26 = vsyncpa [#allocation4], 0 }
   0xa   :  { %28 = vsyncpa [#allocation4 + $0x1], 0  ;;  %s2574_s27 = smov 0   ;;  %s2576_s28 = smov 0  }
   0xb   :  { %s2578_s29 = smov 0   ;;  %s2580_s30 = smov 0  }
   0xc LB: > { %3153 = sst [smem:[#allocation15_spill]] %s2452_s27  ;;  %s2595_s0 = sadd.s32 4294967295, %s2464_s30   ;;  %s2464_s30 = sphi %s2580_s30, %s3184_s30   ;;  %s2460_s29 = sphi %s2578_s29, %s3186_s29   ;;  %s2456_s28 = sphi %s2576_s28, %s3188_s28   ;;  %s2452_s27 = sphi %s2574_s27, %s3187_s27  }
   0xd   : > { %3154 = sst [smem:[#allocation16_spill]] %s2460_s29  ;;  %s1926_s19 = sadd.s32 4294967294, %s2464_s30  }
   0xe   : > { %3155 = sst [smem:[#allocation17_spill]] %s2464_s30  ;;  %s2599_s1 = sadd.s32 1, %s2464_s30  }
   0xf   : > { %3156 = sst [smem:[#allocation18_spill]] %s2599_s1  ;;  %s424_s20 = sadd.s32 1, %s2460_s29 }
  0x10   : > { %s421_s21 = ssub.s32 %s2464_s30, %s2599_s1  ;;  %p434_p0 = scmp.ne.s32.totalorder %s2460_s29, %s2456_s28 }
  0x11   : > { %p422_p1 = scmp.eq.s32.totalorder %s421_s21, 0  ;;  %p435_p2 = scmp.eq.s32.totalorder %s2595_s0, 1 }
  0x12   : > { %p440_p3 = scmp.ne.s32.totalorder %s2456_s28, %s2452_s27  ;;  %p441_p4 = scmp.eq.s32.totalorder %s1926_s19, 1 }
  0x13   : > { %s2610_s22 = scalar_select %p422_p1, %s2460_s29, %s424_s20  }
  0x14   : > { %p2612_p5 = por %p435_p2, %p434_p0  ;;  %p2616_p6 = por %p441_p4, %p440_p3 }
  0x15   : > { %3157 = sst [smem:[#allocation19_spill]] %s2610_s22  ;;  %p1927_p7 = scmp.ge.s32.totalorder %s2464_s30, 1 }
  0x16   : > { %s3158_s2 = scalar_select %p2612_p5, 1, 0 }
  0x17   : > { %s3160_s23 = scalar_select %p2616_p6, 1, 0 }
  0x18   : > { %3159 = sst [smem:[#allocation20_spill]] %s3158_s2  ;;  %p448_p8 = scmp.lt.s32.totalorder %s2464_s30, 3 }
  0x19   : > { %3161 = sst [smem:[#allocation21_spill]] %s3160_s23  ;;  %p3143_p9 = scmp.eq.s32.totalorder %s2595_s0, 0 }
  0x1a   : > { %p2623_p10 = pnand %p1927_p7, %p448_p8  ;;  %s2466_s25 = smov [#allocation5]  }
  0x1b   : > { %s487_s26 = sshll.u32 %s2466_s25, 4  ;;  %s2467_s19 = smov [#allocation2]   ;;  %s488_s26 = int_to_ptr.vmem [resolvable:$true] %s487_s26 }
  0x1c   : > { %s3162_s24 = scalar_select %p2623_p10, 1, 0 }
  0x1d   : > { %p2152_p11 = pneg %p2623_p10  ;;  %s476_s20 = sshll.u32 %s2467_s19, 4  ;;  %s2635_s20 = int_to_ptr.vmem [resolvable:$true] %s476_s20 }
  0x1e   : > { %s2468_s22 = smov [#allocation7]   ;;  %s2278_s25 = scalar_lea.hbm %s3124_s7, 16 }
  0x1f   : > { %p2631_p12 = pnand %p3143_p9, %p2152_p11  ;;  %s498_s29 = sshll.u32 %s2468_s22, 4  ;;  %s2637_s29 = int_to_ptr.vmem [resolvable:$true] %s498_s29 }
  0x20   : > { %p2279_p13 = scmp.ne.s32.totalorder %s3124_s7, %s2278_s25  ;;  %p2285_p3 = scmp.lt.u32.totalorder %s2278_s25, %s3124_s7 }
  0x21   : > { %p2647_p0 = pneg %p2631_p12 }
  0x23   : > { %p2281_p1 = pnand %p2647_p0, %p2279_p13 }
  0x25   : > { %p2282_p2 = pneg %p2281_p1 }
  0x27   : > { %p2287_p4 = pnand %p2285_p3, %p2282_p2 }
  0x29   : > { %2290 = shalt.err (!%p2287_p4)
}
  0x2a   : > { %s2291_s1 = scalar_lea.vmem %s488_s26, 16  ;;  %s2298_s27 = scalar_lea.vmem %s488_s26, 32 }
  0x2b   : > { %p2292_p7 = scmp.ne.s32.totalorder %s488_s26, %s2291_s1  ;;  %p2299_p9 = scmp.lt.s32.totalorder %s488_s26, %s488_s26 }
  0x2c   : > { %p2300_p6 = scmp.lt.s32.totalorder %s2298_s27, %s2291_s1 }
  0x2d   : > { %p2294_p8 = pnand %p2292_p7, %p2647_p0 }
  0x2e   : > { %p2301_p5 = por %p2300_p6, %p2299_p9 }
  0x2f   : > { %p2295_p11 = pneg %p2294_p8 }
  0x31   : > { %p2302_p10 = pnand %p2301_p5, %p2295_p11 }
  0x33   : > { %2305 = shalt.err (!%p2302_p10)
}
  0x34   : > { %2158 = dma.hbm_to_vmem [thread:$0]  (!%p2631_p12), %s3124_s7, 16, %s488_s26, [#allocation6]  }
  0x35   : > { %s2306_s22 = scalar_lea.hbm %s3123_s6, 16 }
  0x36   : > { %p2307_p13 = scmp.ne.s32.totalorder %s3123_s6, %s2306_s22  ;;  %p2313_p5 = scmp.lt.u32.totalorder %s2306_s22, %s3123_s6 }
  0x38   : > { %p2309_p1 = pnand %p2307_p13, %p2647_p0 }
  0x3a   : > { %p2310_p6 = pneg %p2309_p1 }
  0x3c   : > { %p2315_p9 = pnand %p2313_p5, %p2310_p6 }
  0x3e   : > { %2318 = shalt.err (!%p2315_p9)
}
  0x3f   : > { %s2319_s26 = scalar_lea.vmem %s2635_s20, 16  ;;  %s2326_s17 = scalar_lea.vmem %s2635_s20, 32 }
  0x40   : > { %p2320_p10 = scmp.ne.s32.totalorder %s2635_s20, %s2319_s26  ;;  %p2327_p4 = scmp.lt.s32.totalorder %s2635_s20, %s2635_s20 }
  0x41   : > { %p2328_p7 = scmp.lt.s32.totalorder %s2326_s17, %s2319_s26 }
  0x42   : > { %p2322_p2 = pnand %p2320_p10, %p2647_p0 }
  0x43   : > { %p2329_p8 = por %p2328_p7, %p2327_p4 }
  0x44   : > { %p2323_p3 = pneg %p2322_p2 }
  0x46   : > { %p2330_p11 = pnand %p2329_p8, %p2323_p3 }
  0x48   : > { %2333 = shalt.err (!%p2330_p11)
}
  0x49   : > { %2155 = dma.hbm_to_vmem [thread:$0]  (!%p2631_p12), %s3123_s6, 16, %s2635_s20, [#allocation3]  }
  0x4a   : > { %s2334_s25 = scalar_lea.hbm %s3125_s8, 16 }
  0x4b   : > { %p2335_p13 = scmp.ne.s32.totalorder %s3125_s8, %s2334_s25  ;;  %p2341_p5 = scmp.lt.u32.totalorder %s2334_s25, %s3125_s8 }
  0x4d   : > { %p2337_p1 = pnand %p2335_p13, %p2647_p0 }
  0x4f   : > { %p2338_p6 = pneg %p2337_p1 }
  0x51   : > { %p2343_p9 = pnand %p2341_p5, %p2338_p6 }
  0x53   : > { %2346 = shalt.err (!%p2343_p9)
}
  0x54   : > { %s2347_s20 = scalar_lea.vmem %s2637_s29, 16  ;;  %s2354_s17 = scalar_lea.vmem %s2637_s29, 32 }
  0x55   : > { %p2348_p10 = scmp.ne.s32.totalorder %s2637_s29, %s2347_s20  ;;  %p2355_p4 = scmp.lt.s32.totalorder %s2637_s29, %s2637_s29 }
  0x56   : > { %p2356_p7 = scmp.lt.s32.totalorder %s2354_s17, %s2347_s20 }
  0x57   : > { %p2350_p2 = pnand %p2348_p10, %p2647_p0 }
  0x58   : > { %p2357_p8 = por %p2356_p7, %p2355_p4 }
  0x59   : > { %p2351_p3 = pneg %p2350_p2 }
  0x5b   : > { %p2358_p11 = pnand %p2357_p8, %p2351_p3 }
  0x5d   : > { %2361 = shalt.err (!%p2358_p11)
}
  0x5e   : > { %2161 = dma.hbm_to_vmem [thread:$0]  (!%p2631_p12), %s3125_s8, 16, %s2637_s29, [#allocation6]  }
  0x5f   : > { %s2469_s23 = smov [#allocation8]   ;;  %s2362_s1 = scalar_lea.hbm %s3126_s9, 16 }
  0x60   : > { %s509_s18 = sshll.u32 %s2469_s23, 4  ;;  %p2363_p13 = scmp.ne.s32.totalorder %s3126_s9, %s2362_s1  ;;  %s510_s18 = int_to_ptr.vmem [resolvable:$true] %s509_s18 }
  0x61   : > { %p2369_p5 = scmp.lt.u32.totalorder %s2362_s1, %s3126_s9 }
  0x62   : > { %p2365_p1 = pnand %p2363_p13, %p2647_p0 }
  0x64   : > { %p2366_p6 = pneg %p2365_p1 }
  0x66   : > { %p2371_p9 = pnand %p2369_p5, %p2366_p6 }
  0x68   : > { %2374 = shalt.err (!%p2371_p9)
}
  0x69   : > { %s2375_s29 = scalar_lea.vmem %s510_s18, 16  ;;  %s2382_s2 = scalar_lea.vmem %s510_s18, 32 }
  0x6a   : > { %p2376_p10 = scmp.ne.s32.totalorder %s510_s18, %s2375_s29  ;;  %p2383_p4 = scmp.lt.s32.totalorder %s510_s18, %s510_s18 }
  0x6b   : > { %p2384_p7 = scmp.lt.s32.totalorder %s2382_s2, %s2375_s29 }
  0x6c   : > { %p2378_p2 = pnand %p2376_p10, %p2647_p0 }
  0x6d   : > { %p2385_p8 = por %p2384_p7, %p2383_p4 }
  0x6e   : > { %p2379_p3 = pneg %p2378_p2 }
  0x70   : > { %p2386_p11 = pnand %p2385_p8, %p2379_p3 }
  0x72   : > { %2389 = shalt.err (!%p2386_p11)
}
  0x73   : > { %2164 = dma.hbm_to_vmem [thread:$0]  (!%p2631_p12), %s3126_s9, 16, %s510_s18, [#allocation9]  }
  0x74   : > { %p3165_p13 = scmp.ne.s32.totalorder %s3162_s24, 0 }
  0x75   : > { %p3166_p1 = scmp.eq.s32.totalorder (!%p3165_p13), %s2595_s0, 0 }
  0x76   : > { %553 = sbr.rel (%p3165_p13) target bundleno = 3295 (0xcdf), region = 92 }
  0x7d   : > { %2435 = dma.done.wait (%p3166_p1), [#allocation3], 16   ;;  %p3167_p0 = pmov %p3166_p1 }
  0x7f   : > { %2437 = vsyncadd (%p3167_p0), [#allocation3], 4294967280  ;;  %p3168_p6 = pmov %p3167_p0 }
  0x80   : > { %p3169_p5 = pmov %p3167_p0 }
  0x81   : > { %2439 = dma.done.wait (%p3168_p6), [#allocation6], 32  }
  0x82   : > { %2441 = vsyncadd (%p3169_p5), [#allocation6], 4294967264  ;;  %p3170_p9 = pmov %p3167_p0 }
  0x83   : > { %p3171_p12 = pmov %p3167_p0 }
  0x84   : > { %2443 = dma.done.wait (%p3170_p9), [#allocation9], 16  }
  0x85   : > { %2445 = vsyncadd (%p3171_p12), [#allocation9], 4294967280  ;;  %p618_p10 = scmp.lt.s32.totalorder %s2595_s0, 1  ;;  %s3172_s25 = sld [smem:[#allocation22_spill]]  ;;  %vm626_vm0 = vcmask 261120   ;;  %v2222_v7 = vld [vmem:[%s3120_s3] sm:$0xff]  }
  0x86   : > { %v2470_v8 = vmov 0.0   ;;  %vm2471_vm1 = vmmov 0   ;;  %v2223_v9 = vld [vmem:[%s3120_s3 + $0x8] sm:$0xff]   ;;  %s3173_s2 = sld [smem:[#allocation23_spill]]  ;;  %v2224_v19 = vld [vmem:[%s3121_s4] sm:$0xff]   ;;  %s2472_s20 = smov 112  }
  0x87   : > { %s619_s24 = scalar_select %p618_p10, %s2595_s0, 1  ;;  %2026 = vmatprep.subr.bf16.mxu0 %v2470_v8  ;;  %2030 = vmatprep.mubr.msk.bf16.mxu0 %vm2471_vm1, %v2470_v8  ;;  %v2225_v21 = vld [vmem:[%s3121_s4 + $0x8] sm:$0xff]   ;;  %v2226_v22 = vld [vmem:[%s3122_s5] sm:$0xff]   ;;  %vm951_vm2 = vcmask 1043456   ;;  %vm829_vm3 = vcmask 64512   ;;  %vm1521_vm4 = vcmask 130048  }
  0x88   : > { %2027 = vmatpush3.bf16.msra.mxu0 %v2222_v7  ;;  %2050 = vmatprep.subr.bf16.mxu1 %v2470_v8  ;;  %v2227_v23 = vld [vmem:[%s3122_s5 + $0x8] sm:$0xff]   ;;  %s2473_s17 = smov 120   ;;  %s2474_s29 = smov 104   ;;  %vm1523_vm5 = vcmask 195584  }
  0x89   : > { %s1939_s21 = sshll.u32 %s619_s24, 3  ;;  %2028 = vmatprep.subr.bf16.mxu0 %v2470_v8  ;;  %2052 = vmatprep.mubr.msk.bf16.mxu1 %vm2471_vm1, %v2470_v8  ;;  %s3174_s24 = sld [smem:[#allocation24_spill]] }
  0x8a   : > { %s2476_s30 = smov 16   ;;  %s2477_s23 = smov 24  }
  0x8b   : > { %s621_s22 = scalar_lea.vmem %s3172_s25, %s1939_s21  ;;  %s615_s19 = sand.u32 1, %s2456_s28  }
  0x8c   : > { %v2748_v0 = vld [vmem:[%s621_s22] sm:$0xff]  ;;  %2029 = vmatpush3.bf16.msra.mxu0 %v2223_v9  ;;  %s1938_s18 = sshll.u32 %s615_s19, 3  ;;  %s3175_s1 = sld [smem:[#allocation25_spill]] }
  0x8d   : > { %v627_v1 = vsel %vm626_vm0, %v2748_v0, 0.0  ;;  %2034 = vmatprep.subr.bf16.mxu0 %v2470_v8  ;;  %v1940_v14 = vld [vmem:[%s3173_s2] ss:$0 sm:$0xff]  ;;  %s2475_s2 = smov 8   ;;  %s3176_s27 = sld [smem:[#allocation20_spill]] }
  0x8e   : > { %628 = vadd.xlane.f32.xlu0 %v627_v1  ;;  %s1983_s26 = sshll.u32 %s2595_s0, 7  ;;  %s1813_s0 = scalar_lea.sflag [#allocation4], %s615_s19 }
  0x8f   : > { %v1941_v16 = vld [vmem:[%s3174_s24] ss:$0 sm:$0xff] }
  0x93   : > { %p3179_p3 = scmp.ne.s32.totalorder %s3176_s27, 0 }
 0x11b   : > { %v629_v2 = vpop.xlane.xlu0 %628 }
 0x11c   : > { %v631_v3 = vmul.f32 0.03125, %v629_v2 }
 0x11e   : > { %v632_v4 = vsub.f32 %v2748_v0, %v631_v3 }
 0x120   : > { %v633_v5 = vmul.f32 %v632_v4, %v632_v4 }
 0x122   : > { %v634_v6 = vsel %vm626_vm0, %v633_v5, 0.0 }
 0x123   : > { %635 = vadd.xlane.f32.xlu0 %v634_v6 }
 0x1b0   : > { %v636_v10 = vpop.xlane.xlu0 %635 }
 0x1b1   : > { %v637_v11 = vmul.f32 0.03125, %v636_v10 }
 0x1b3   : > { %v638_v12 = vadd.f32 1e-05, %v637_v11 }
 0x1b5   : > { %2240 = vrsqrt.f32 %v638_v12  ;;  %v2860_v12 = vld [vmem:[#allocation7] ss:$0 sm:$0xff] }
 0x1bf   : > { %v2241_v13 = vpop.eup %2240 }
 0x1c0   : > { %v640_v15 = vmul.f32 %v2241_v13, %v632_v4 }
 0x1c2   : > { %v647_v17 = vmul.f32 %v1940_v14, %v640_v15  ;;  %v2872_v15 = vld [vmem:[#allocation8] ss:$0 sm:$0xff] }
 0x1c4   : > { %v654_v18 = vadd.f32 %v1941_v16, %v647_v17  ;;  %v2878_v16 = vld [vmem:[#allocation2] ss:$0 sm:$0xff]  ;;  %v2884_v17 = vld [vmem:[#allocation5] ss:$0 sm:$0xff] }
 0x1c6   : > { %v655_v20 = vpack.c.bf16 %v654_v18, %v654_v18 }
 0x1c8   : > { %2031 = vmatmul.mubr.msk.bf16.vlgmr.msra.gmra.mrb[0].mxu0 %vm626_vm0, %v655_v20 }
 0x1c9   : > { %2035 = vmatpush3.bf16.msra.mxu0 %v2224_v19  ;;  %2038 = vmatprep.mubr.msk.bf16.mxu0 %vm2471_vm1, %v2470_v8 }
 0x1ca   : > { %2036 = vmatprep.subr.bf16.mxu0 %v2470_v8 }
 0x1cd   : > { %2037 = vmatpush3.bf16.msra.mxu0 %v2225_v21 }
 0x1ce   : > { %2042 = vmatprep.subr.bf16.mxu0 %v2470_v8 }
 0x1d0   : > { %2039 = vmatmul.mubr.msk.bf16.vlgmr.msra.gmra.mrb[4].mxu0 %vm626_vm0, %v655_v20 }
 0x1d1   : > { %2043 = vmatpush3.bf16.msra.mxu0 %v2226_v22  ;;  %2046 = vmatprep.mubr.msk.bf16.mxu0 %vm2471_vm1, %v2470_v8 }
 0x1d2   : > { %2044 = vmatprep.subr.bf16.mxu0 %v2470_v8 }
 0x1d5   : > { %2045 = vmatpush3.bf16.msra.mxu0 %v2227_v23 }
 0x1d6   : > { %2056 = vmatprep.subr.bf16.mxu0 %v2470_v8 }
 0x1d8   : > { %2047 = vmatmul.mubr.msk.bf16.vlgmr.msra.gmra.mrb[8].mxu0 %vm626_vm0, %v655_v20 }
 0x1d9   : > { %2058 = vmatprep.mubr.msk.bf16.mxu0 %vm2471_vm1, %v2470_v8 }
 0x29b   : > { %v2799_v24 = vpop.f32.mrb[0].mxu0 }
 0x29c   : > { %v2032_v25 = vpop.f32.mrb[1].mxu0  ;;  %v830_v7 = vsel %vm829_vm3, %v2799_v24, 0.0 }
 0x29d   : > { %v712_v26 = vpop.f32.mrb[2].mxu0 }
 0x29e   : > { %v2033_v27 = vpop.f32.mrb[3].mxu0 }
 0x2a3   : > { %v2801_v28 = vpop.f32.mrb[4].mxu0 }
 0x2a4   : > { %1196 = vrot.lane.b32.xlu0 %v2801_v28, %s2472_s20  ;;  %1025 = vrot.lane.b32.xlu1 %v2801_v28, %s2473_s17  ;;  %v2040_v29 = vpop.f32.mrb[5].mxu0  ;;  %v860_v9 = vsel %vm829_vm3, %v2801_v28, 0.0 }
 0x2a5   : > { %v768_v30 = vpop.f32.mrb[6].mxu0 }
 0x2a6   : > { %v2041_v31 = vpop.f32.mrb[7].mxu0 }
 0x2a8   : > { %996 = vrot.lane.b32.xlu1 %v2799_v24, %s2473_s17 }
 0x2ab   : > { %v821_v32 = vpop.f32.mrb[8].mxu0 }
 0x2ac   : > { %v2809_v33 = vpack.c.bf16 %v821_v32, %v821_v32  ;;  %1168 = vrot.lane.b32.xlu1 %v2799_v24, %s2472_s20  ;;  %v2048_v34 = vpop.f32.mrb[9].mxu0 }
 0x2ad   : > { %v824_v35 = vpop.f32.mrb[10].mxu0 }
 0x2ae   : > { %v2049_v36 = vpop.f32.mrb[11].mxu0  ;;  %v953_v37 = vsel %vm951_vm2, %v2809_v33, 0 }
 0x2af   : > { %2057 = vmatpush3.bf16.msra.mxu0 %v953_v37 }
 0x2b0   : > { %1366 = vrot.lane.b32.xlu1 %v2801_v28, %s2474_s29  ;;  %2068 = vmatprep.subr.bf16.mxu0 %v2470_v8 }
 0x2b4   : > { %1338 = vrot.lane.b32.xlu1 %v2799_v24, %s2474_s29 }
 0x316   : > { %v1026_v38 = vpop.permute.xlu1 %1025  ;;  %v1197_v48 = vpop.permute.xlu0 %1196 }
 0x317   : > { %v1028_v47 = vsel %vm829_vm3, %v1026_v38, 0.0  ;;  %v1199_v49 = vsel %vm829_vm3, %v1197_v48, 0.0 }
 0x31a   : > { %v997_v39 = vpop.permute.xlu1 %996 }
 0x31b   : > { %v999_v40 = vsel %vm829_vm3, %v997_v39, 0.0 }
 0x31c   : > { %1000 = vadd.xlane.f32.xlu0 %v999_v40 }
 0x31e   : > { %v1169_v41 = vpop.permute.xlu1 %1168 }
 0x31f   : > { %v1171_v42 = vsel %vm829_vm3, %v1169_v41, 0.0 }
 0x320   : > { %1172 = vadd.xlane.f32.xlu1 %v1171_v42 }
 0x322   : > { %v1367_v43 = vpop.permute.xlu1 %1366 }
 0x323   : > { %v1369_v44 = vsel %vm829_vm3, %v1367_v43, 0.0 }
 0x324   : > { %1370 = vadd.xlane.f32.xlu0 %v1369_v44 }
 0x326   : > { %v1339_v45 = vpop.permute.xlu1 %1338 }
 0x327   : > { %v1341_v46 = vsel %vm829_vm3, %v1339_v45, 0.0 }
 0x328   : > { %1342 = vadd.xlane.f32.xlu1 %v1341_v46 }
 0x32c   : > { %1029 = vadd.xlane.f32.xlu1 %v1028_v47 }
 0x330   : > { %1200 = vadd.xlane.f32.xlu1 %v1199_v49 }
 0x3a9   : > { %v1001_v50 = vpop.xlane.xlu0 %1000 }
 0x3aa   : > { %v1002_v51 = vmul.f32 0.125, %v1001_v50 }
 0x3ac   : > { %v2827_v52 = vsub.f32 %v2799_v24, %v1002_v51 }
 0x3ad   : > { %v1173_v53 = vpop.xlane.xlu1 %1172 }
 0x3ae   : > { %v1174_v54 = vmul.f32 0.125, %v1173_v53  ;;  %v1004_v55 = vmul.f32 %v2827_v52, %v2827_v52 }
 0x3b0   : > { %v2832_v56 = vsub.f32 %v2799_v24, %v1174_v54  ;;  %1006 = vrot.lane.b32.xlu1 %v1004_v55, %s2473_s17 }
 0x3b1   : > { %v1371_v10 = vpop.xlane.xlu0 %1370 }
 0x3b2   : > { %v1176_v57 = vmul.f32 %v2832_v56, %v2832_v56  ;;  %v1372_v11 = vmul.f32 0.125, %v1371_v10 }
 0x3b4   : > { %1178 = vrot.lane.b32.xlu0 %v1176_v57, %s2472_s20  ;;  %v2863_v13 = vsub.f32 %v2801_v28, %v1372_v11 }
 0x3b5   : > { %v1343_v58 = vpop.xlane.xlu1 %1342 }
 0x3b6   : > { %v1344_v59 = vmul.f32 0.125, %v1343_v58  ;;  %v1374_v14 = vmul.f32 %v2863_v13, %v2863_v13 }
 0x3b8   : > { %v2839_v60 = vsub.f32 %v2799_v24, %v1344_v59 }
 0x3b9   : > { %v1030_v61 = vpop.xlane.xlu1 %1029 }
 0x3ba   : > { %v1031_v62 = vmul.f32 0.125, %v1030_v61  ;;  %v1346_v63 = vmul.f32 %v2839_v60, %v2839_v60 }
 0x3bc   : > { %v2844_v1 = vsub.f32 %v2801_v28, %v1031_v62  ;;  %1348 = vrot.lane.b32.xlu0 %v1346_v63, %s2474_s29 }
 0x3bd   : > { %v1201_v2 = vpop.xlane.xlu1 %1200 }
 0x3be   : > { %v1202_v3 = vmul.f32 0.125, %v1201_v2  ;;  %v1033_v4 = vmul.f32 %v2844_v1, %v2844_v1 }
 0x3c0   : > { %v2850_v5 = vsub.f32 %v2801_v28, %v1202_v3  ;;  %1035 = vrot.lane.b32.xlu0 %v1033_v4, %s2473_s17 }
 0x3c2   : > { %v1204_v6 = vmul.f32 %v2850_v5, %v2850_v5 }
 0x3c4   : > { %1206 = vrot.lane.b32.xlu1 %v1204_v6, %s2472_s20 }
 0x3df   : > { %831 = vadd.xlane.f32.xlu0 %v830_v7 }
 0x3e8   : > { %861 = vadd.xlane.f32.xlu1 %v860_v9 }
 0x3f5   : > { %1045 = vrot.lane.b32.xlu0 %v2860_v12, %s2475_s2 }
 0x3f9   : > { %1376 = vrot.lane.b32.xlu1 %v1374_v14, %s2474_s29  ;;  %1216 = vrot.lane.b32.xlu0 %v2860_v12, %s2476_s30 }
 0x3fd   : > { %1049 = vrot.lane.b32.xlu1 %v2872_v15, %s2475_s2  ;;  %1220 = vrot.lane.b32.xlu0 %v2872_v15, %s2476_s30 }
 0x401   : > { %1016 = vrot.lane.b32.xlu1 %v2878_v16, %s2475_s2  ;;  %1386 = vrot.lane.b32.xlu0 %v2860_v12, %s2477_s23 }
 0x405   : > { %1020 = vrot.lane.b32.xlu1 %v2884_v17, %s2475_s2  ;;  %1390 = vrot.lane.b32.xlu0 %v2872_v15, %s2477_s23 }
 0x409   : > { %1188 = vrot.lane.b32.xlu1 %v2878_v16, %s2476_s30  ;;  %1358 = vrot.lane.b32.xlu0 %v2878_v16, %s2477_s23 }
 0x422   : > { %v1007_v18 = vpop.permute.xlu1 %1006 }
 0x423   : > { %v1009_v20 = vsel %vm829_vm3, %v1007_v18, 0.0 }
 0x426   : > { %v1179_v19 = vpop.permute.xlu0 %1178 }
 0x427   : > { %v1181_v22 = vsel %vm829_vm3, %v1179_v19, 0.0 }
 0x42d   : > { %1010 = vadd.xlane.f32.xlu1 %v1009_v20 }
 0x42e   : > { %v1349_v21 = vpop.permute.xlu0 %1348 }
 0x42f   : > { %v1351_v26 = vsel %vm829_vm3, %v1349_v21, 0.0 }
 0x431   : > { %1182 = vadd.xlane.f32.xlu1 %v1181_v22 }
 0x432   : > { %v1036_v23 = vpop.permute.xlu0 %1035 }
 0x433   : > { %v1038_v25 = vsel %vm829_vm3, %v1036_v23, 0.0 }
 0x434   : > { %1039 = vadd.xlane.f32.xlu0 %v1038_v25 }
 0x435   : > { %1352 = vadd.xlane.f32.xlu1 %v1351_v26 }
 0x436   : > { %v1207_v27 = vpop.permute.xlu1 %1206 }
 0x437   : > { %v1209_v29 = vsel %vm829_vm3, %v1207_v27, 0.0 }
 0x438   : > { %1210 = vadd.xlane.f32.xlu0 %v1209_v29 }
 0x446   : > { %1192 = vrot.lane.b32.xlu1 %v2884_v17, %s2476_s30 }
 0x46c   : > { %v832_v38 = vpop.xlane.xlu0 %831 }
 0x46d   : > { %v834_v40 = vmul.f32 0.125, %v832_v38 }
 0x470   : > { %v1046_v39 = vpop.permute.xlu0 %1045 }
 0x474   : > { %v1217_v42 = vpop.permute.xlu0 %1216 }
 0x475   : > { %v862_v30 = vpop.xlane.xlu1 %861 }
 0x476   : > { %v863_v31 = vmul.f32 0.125, %v862_v30 }
 0x478   : > { %v2902_v32 = vsub.f32 %v2801_v28, %v863_v31  ;;  %v2911_v28 = vsub.f32 %v2799_v24, %v834_v40  ;;  %v1221_v44 = vpop.permute.xlu0 %1220 }
 0x479   : > { %v1377_v34 = vpop.permute.xlu1 %1376 }
 0x47a   : > { %v1379_v35 = vsel %vm829_vm3, %v1377_v34, 0.0  ;;  %v865_v36 = vmul.f32 %v2902_v32, %v2902_v32  ;;  %v836_v45 = vmul.f32 %v2911_v28, %v2911_v28 }
 0x47b   : > { %1380 = vadd.xlane.f32.xlu0 %v1379_v35 }
 0x47c   : > { %v866_v37 = vsel %vm829_vm3, %v865_v36, 0.0  ;;  %v837_v46 = vsel %vm829_vm3, %v836_v45, 0.0  ;;  %v2916_v48 = vpop.permute.xlu0 %1386 }
 0x47d   : > { %867 = vadd.xlane.f32.xlu1 %v866_v37  ;;  %v1050_v41 = vpop.permute.xlu1 %1049 }
 0x480   : > { %v2918_v50 = vpop.permute.xlu0 %1390 }
 0x481   : > { %v1017_v43 = vpop.permute.xlu1 %1016 }
 0x484   : > { %v1359_v54 = vpop.permute.xlu0 %1358 }
 0x485   : > { %v1021_v47 = vpop.permute.xlu1 %1020 }
 0x489   : > { %v1189_v49 = vpop.permute.xlu1 %1188 }
 0x491   : > { %1362 = vrot.lane.b32.xlu0 %v2884_v17, %s2477_s23 }
 0x4b0   : > { %838 = vadd.xlane.f32.xlu0 %v837_v46 }
 0x4ba   : > { %v1011_v51 = vpop.xlane.xlu1 %1010 }
 0x4bb   : > { %v1012_v53 = vmul.f32 0.125, %v1011_v51 }
 0x4bd   : > { %v1013_v55 = vadd.f32 1e-05, %v1012_v53 }
 0x4be   : > { %v1183_v24 = vpop.xlane.xlu1 %1182 }
 0x4bf   : > { %2242 = vrsqrt.f32 %v1013_v55  ;;  %v1184_v57 = vmul.f32 0.125, %v1183_v24 }
 0x4c1   : > { %v1185_v58 = vadd.f32 1e-05, %v1184_v57  ;;  %v1040_v59 = vpop.xlane.xlu0 %1039 }
 0x4c2   : > { %v1041_v61 = vmul.f32 0.125, %v1040_v59  ;;  %v1353_v22 = vpop.xlane.xlu1 %1352 }
 0x4c3   : > { %2244 = vrsqrt.f32 %v1185_v58 }
 0x4c4   : > { %v1042_v62 = vadd.f32 1e-05, %v1041_v61 }
 0x4c5   : > { %v1211_v63 = vpop.xlane.xlu0 %1210 }
 0x4c6   : > { %2246 = vrsqrt.f32 %v1042_v62  ;;  %v1212_v2 = vmul.f32 0.125, %v1211_v63  ;;  %v1193_v29 = vpop.permute.xlu1 %1192 }
 0x4c8   : > { %v1213_v3 = vadd.f32 1e-05, %v1212_v2 }
 0x4c9   : > { %v2243_v4 = vpop.eup %2242 }
 0x4ca   : > { %2248 = vrsqrt.f32 %v1213_v3  ;;  %v1015_v6 = vmul.f32 %v2243_v4, %v2827_v52 }
 0x4cc   : > { %v1019_v7 = vmul.f32 %v1017_v43, %v1015_v6 }
 0x4cd   : > { %v2245_v10 = vpop.eup %2244 }
 0x4ce   : > { %v1023_v9 = vadd.f32 %v1021_v47, %v1019_v7  ;;  %v1187_v19 = vmul.f32 %v2245_v10, %v2832_v56  ;;  %v1354_v56 = vmul.f32 0.125, %v1353_v22 }
 0x4d0   : > { %v2247_v11 = vpop.eup %2246  ;;  %v1053_v14 = vpack.c.bf16 %v1023_v9, %v1023_v9  ;;  %v1191_v26 = vmul.f32 %v1189_v49, %v1187_v19  ;;  %v1355_v35 = vadd.f32 1e-05, %v1354_v56 }
 0x4d1   : > { %v1044_v18 = vmul.f32 %v2247_v11, %v2844_v1 }
 0x4d2   : > { %1056 = vrot.lane.b32.xlu0 %v1053_v14, %s2473_s17  ;;  %v1195_v31 = vadd.f32 %v1193_v29, %v1191_v26  ;;  %2250 = vrsqrt.f32 %v1355_v35 }
 0x4d3   : > { %v1048_v20 = vmul.f32 %v1046_v39, %v1044_v18 }
 0x4d4   : > { %v2249_v21 = vpop.eup %2248  ;;  %v1224_v1 = vpack.c.bf16 %v1195_v31, %v1195_v31 }
 0x4d5   : > { %v1052_v23 = vadd.f32 %v1050_v41, %v1048_v20  ;;  %v1215_v25 = vmul.f32 %v2249_v21, %v2850_v5 }
 0x4d7   : > { %v1054_v27 = vpack.c.bf16 %v1052_v23, %v1052_v23  ;;  %v1219_v52 = vmul.f32 %v1217_v42, %v1215_v25 }
 0x4d9   : > { %1059 = vrot.lane.b32.xlu1 %v1054_v27, %s2473_s17  ;;  %v1223_v30 = vadd.f32 %v1221_v44, %v1219_v52 }
 0x4db   : > { %v1225_v34 = vpack.c.bf16 %v1223_v30, %v1223_v30 }
 0x4dc   : > { %v2251_v36 = vpop.eup %2250 }
 0x4dd   : > { %1230 = vrot.lane.b32.xlu1 %v1225_v34, %s2472_s20  ;;  %v1357_v5 = vmul.f32 %v2251_v36, %v2839_v60 }
 0x4df   : > { %v1361_v42 = vmul.f32 %v1359_v54, %v1357_v5 }
 0x4e1   : > { %1227 = vrot.lane.b32.xlu1 %v1224_v1, %s2472_s20 }
 0x508   : > { %v1381_v37 = vpop.xlane.xlu0 %1380 }
 0x509   : > { %v1382_v38 = vmul.f32 0.125, %v1381_v37 }
 0x50a   : > { %v868_v39 = vpop.xlane.xlu1 %867 }
 0x50b   : > { %v1383_v40 = vadd.f32 1e-05, %v1382_v38  ;;  %v869_v41 = vmul.f32 0.125, %v868_v39 }
 0x50c   : > { %v1363_v43 = vpop.permute.xlu0 %1362 }
 0x50d   : > { %2252 = vrsqrt.f32 %v1383_v40  ;;  %v870_v44 = vadd.f32 1e-05, %v869_v41  ;;  %v1365_v45 = vadd.f32 %v1363_v43, %v1361_v42 }
 0x50f   : > { %2254 = vrsqrt.f32 %v870_v44  ;;  %v1394_v46 = vpack.c.bf16 %v1365_v45, %v1365_v45 }
 0x511   : > { %1397 = vrot.lane.b32.xlu0 %v1394_v46, %s2474_s29 }
 0x517   : > { %v2253_v47 = vpop.eup %2252 }
 0x518   : > { %v1385_v49 = vmul.f32 %v2253_v47, %v2863_v13 }
 0x519   : > { %v2255_v51 = vpop.eup %2254 }
 0x51a   : > { %v1389_v60 = vmul.f32 %v2916_v48, %v1385_v49  ;;  %v872_v53 = vmul.f32 %v2255_v51, %v2902_v32 }
 0x51c   : > { %v1393_v55 = vadd.f32 %v2918_v50, %v1389_v60  ;;  %v879_v54 = vmul.f32 %v2860_v12, %v872_v53 }
 0x51e   : > { %v1395_v24 = vpack.c.bf16 %v1393_v55, %v1393_v55  ;;  %v886_v57 = vadd.f32 %v2872_v15, %v879_v54 }
 0x520   : > { %1400 = vrot.lane.b32.xlu1 %v1395_v24, %s2474_s29  ;;  %v888_v58 = vpack.c.bf16 %v886_v57, %v886_v57 }
 0x522   : > { %v893_v59 = vsel %vm829_vm3, %v888_v58, 0 }
 0x523   : > { %2051 = vmatpush3.bf16.xpose.msra.mxu1 %v893_v59 }
 0x524   : > { %2062 = vmatprep.subr.bf16.mxu1 %v2470_v8 }
 0x53d   : > { %v839_v13 = vpop.xlane.xlu0 %838 }
 0x53e   : > { %v840_v61 = vmul.f32 0.125, %v839_v13 }
 0x540   : > { %v841_v48 = vadd.f32 1e-05, %v840_v61 }
 0x542   : > { %2256 = vrsqrt.f32 %v841_v48 }
 0x544   : > { %v1057_v4 = vpop.permute.xlu0 %1056 }
 0x54b   : > { %v1060_v15 = vpop.permute.xlu1 %1059 }
 0x54c   : > { %v2257_v32 = vpop.eup %2256  ;;  %v1065_v2 = vsel %vm829_vm3, %v1060_v15, 0 }
 0x54d   : > { %v843_v50 = vmul.f32 %v2257_v32, %v2911_v28 }
 0x54f   : > { %v850_v12 = vmul.f32 %v2878_v16, %v843_v50  ;;  %v1231_v3 = vpop.permute.xlu1 %1230 }
 0x550   : > { %v1236_v28 = vsel %vm829_vm3, %v1231_v3, 0 }
 0x551   : > { %v857_v62 = vadd.f32 %v2884_v17, %v850_v12 }
 0x553   : > { %v887_v63 = vpack.c.bf16 %v857_v62, %v857_v62  ;;  %v1228_v16 = vpop.permute.xlu1 %1227 }
 0x555   : > { %2053 = vmatmul.mubr.msk.bf16.vlgmr.msra.gmra.mrb[0].mxu1 %vm829_vm3, %v887_v63 }
 0x556   : > { %2063 = vmatpush3.bf16.xpose.msra.mxu1 %v1065_v2  ;;  %2064 = vmatprep.mubr.msk.bf16.mxu1 %vm2471_vm1, %v2470_v8 }
 0x557   : > { %2074 = vmatprep.subr.bf16.mxu1 %v2470_v8 }
 0x55d   : > { %2065 = vmatmul.mubr.msk.bf16.vlgmr.msra.gmra.mrb[4].mxu1 %vm829_vm3, %v1057_v4 }
 0x55e   : > { %2075 = vmatpush3.bf16.xpose.msra.mxu1 %v1236_v28  ;;  %2076 = vmatprep.mubr.msk.bf16.mxu1 %vm2471_vm1, %v2470_v8 }
 0x55f   : > { %2086 = vmatprep.subr.bf16.mxu1 %v2470_v8 }
 0x565   : > { %2077 = vmatmul.mubr.msk.bf16.vlgmr.msra.gmra.mrb[8].mxu1 %vm829_vm3, %v1228_v16 }
 0x566   : > { %2088 = vmatprep.mubr.msk.bf16.mxu1 %vm2471_vm1, %v2470_v8 }
 0x583   : > { %v1398_v7 = vpop.permute.xlu0 %1397 }
 0x592   : > { %v1401_v17 = vpop.permute.xlu1 %1400 }
 0x593   : > { %v1406_v6 = vsel %vm829_vm3, %v1401_v17, 0 }
 0x594   : > { %2087 = vmatpush3.bf16.xpose.msra.mxu1 %v1406_v6 }
 0x595   : > { %2098 = vmatprep.subr.bf16.mxu1 %v2470_v8 }
 0x59b   : > { %2089 = vmatmul.mubr.msk.bf16.vlgmr.msra.gmra.mrb[12].mxu1 %vm829_vm3, %v1398_v7 }
 0x59c   : > { %2102 = vmatprep.mubr.msk.bf16.mxu1 %vm2471_vm1, %v2470_v8 }
 0x628   : > { %v929_v9 = vpop.f32.mrb[0].mxu1 }
 0x629   : > { %v2054_v10 = vpop.f32.mrb[1].mxu1  ;;  %v935_v11 = vsel %vm829_vm3, %v929_v9, -inf }
 0x62a   : > { %936 = vmax.xlane.f32.xlu1 %v935_v11  ;;  %v932_v14 = vpop.f32.mrb[2].mxu1 }
 0x62b   : > { %v2055_v18 = vpop.f32.mrb[3].mxu1 }
 0x62c   : > { %v2228_v18 = vld [vmem:[%s3127_s10] sm:$0xff]  }
 0x62d   : > { %2099 = vmatpush3.bf16.msra.mxu1 %v2228_v18 }
 0x62e   : > { %2100 = vmatprep.subr.bf16.mxu1 %v2470_v8 }
 0x630   : > { %v1101_v19 = vpop.f32.mrb[4].mxu1 }
 0x631   : > { %v2066_v20 = vpop.f32.mrb[5].mxu1  ;;  %v1107_v21 = vsel %vm829_vm3, %v1101_v19, -inf }
 0x632   : > { %1108 = vmax.xlane.f32.xlu0 %v1107_v21  ;;  %v1104_v22 = vpop.f32.mrb[6].mxu1 }
 0x633   : > { %v2067_v23 = vpop.f32.mrb[7].mxu1 }
 0x638   : > { %v1272_v25 = vpop.f32.mrb[8].mxu1 }
 0x639   : > { %v2078_v26 = vpop.f32.mrb[9].mxu1  ;;  %v1278_v27 = vsel %vm829_vm3, %v1272_v25, -inf }
 0x63a   : > { %1279 = vmax.xlane.f32.xlu0 %v1278_v27  ;;  %v1275_v52 = vpop.f32.mrb[10].mxu1 }
 0x63b   : > { %v2079_v29 = vpop.f32.mrb[11].mxu1  ;;  %v2229_v52 = vld [vmem:[%s3127_s10 + $0x8] sm:$0xff]  }
 0x63c   : > { %2101 = vmatpush3.bf16.msra.mxu1 %v2229_v52 }
 0x63d   : > { %2114 = vmatprep.subr.bf16.mxu1 %v2470_v8 }
 0x66e   : > { %v1442_v30 = vpop.f32.mrb[12].mxu1 }
 0x66f   : > { %v2090_v31 = vpop.f32.mrb[13].mxu1  ;;  %v1448_v34 = vsel %vm829_vm3, %v1442_v30, -inf }
 0x670   : > { %1449 = vmax.xlane.f32.xlu1 %v1448_v34  ;;  %v1445_v1 = vpop.f32.mrb[14].mxu1 }
 0x671   : > { %v2091_v56 = vpop.f32.mrb[15].mxu1 }
 0x6b7   : > { %v937_v35 = vpop.xlane.xlu1 %936 }
 0x6b8   : > { %v938_v36 = vsub.f32 %v929_v9, %v937_v35 }
 0x6ba   : > { %v939_v5 = vmul.f32 1.442695, %v938_v36 }
 0x6bc   : > { %2258 = vpow2.f32 %v939_v5 }
 0x6bf   : > { %v1109_v37 = vpop.xlane.xlu0 %1108 }
 0x6c0   : > { %v1110_v38 = vsub.f32 %v1101_v19, %v1109_v37 }
 0x6c2   : > { %v1111_v39 = vmul.f32 1.442695, %v1110_v38 }
 0x6c4   : > { %2260 = vpow2.f32 %v1111_v39  ;;  %v1963_v39 = vld [vmem:[%s3128_s11] ss:$0 sm:$0xff] }
 0x6c6   : > { %v2259_v40 = vpop.eup %2258 }
 0x6c7   : > { %v1280_v41 = vpop.xlane.xlu0 %1279  ;;  %v941_v42 = vsel %vm829_vm3, %v2259_v40, 0.0 }
 0x6c8   : > { %v1281_v43 = vsub.f32 %v1272_v25, %v1280_v41  ;;  %942 = vadd.xlane.f32.xlu0 %v941_v42 }
 0x6ca   : > { %v1282_v44 = vmul.f32 1.442695, %v1281_v43 }
 0x6cc   : > { %2262 = vpow2.f32 %v1282_v44 }
 0x6ce   : > { %v2261_v45 = vpop.eup %2260 }
 0x6cf   : > { %v1113_v46 = vsel %vm829_vm3, %v2261_v45, 0.0 }
 0x6d0   : > { %1114 = vadd.xlane.f32.xlu1 %v1113_v46 }
 0x6d6   : > { %v2263_v47 = vpop.eup %2262 }
 0x6d7   : > { %v1284_v49 = vsel %vm829_vm3, %v2263_v47, 0.0 }
 0x6d8   : > { %1285 = vadd.xlane.f32.xlu0 %v1284_v49 }
 0x6e1   : > { %1290 = vrot.lane.b32.xlu1 %v2809_v33, %s2472_s20  ;;  %s617_s20 = scalar_lea.vmem [#allocation10], %s1938_s18  ;;  %s2478_s18 = smov [#allocation10]  }
 0x6e2   : > { %s2394_s25 = sshll.u32 %s2478_s18, 4  ;;  %s2395_s25 = int_to_ptr.vmem [resolvable:$false] %s2394_s25 }
 0x6e3   : > { %s2396_s22 = scalar_lea.vmem %s2395_s25, 256 }
 0x6ee   : > { %1120 = vrot.lane.b32.xlu0 %v2809_v33, %s2473_s17  ;;  %s1826_s17 = sshll.u32 %s617_s20, 4  ;;  %s3076_s17 = int_to_ptr.vmem [resolvable:$true] %s1826_s17 }
 0x6ef   : > { %s2390_s21 = scalar_lea.vmem %s3076_s17, 128  ;;  %p2397_p8 = scmp.lt.s32.totalorder %s3076_s17, %s2395_s25 }
 0x6f0   : > { %p2391_p2 = scmp.ne.s32.totalorder %s3076_s17, %s2390_s21  ;;  %p2398_p11 = scmp.lt.s32.totalorder %s2396_s22, %s2390_s21 }
 0x6f2   : > { %p2392_p4 = pnand %p2391_p2, %p3179_p3  ;;  %p2399_p13 = por %p2398_p11, %p2397_p8 }
 0x6f4   : > { %p2393_p7 = pneg %p2392_p4 }
 0x6f6   : > { %p2400_p1 = pnand %p2399_p13, %p2393_p7 }
 0x6fd   : > { %v1450_v51 = vpop.xlane.xlu1 %1449 }
 0x6fe   : > { %v1451_v60 = vsub.f32 %v1442_v30, %v1450_v51 }
 0x700   : > { %v1452_v53 = vmul.f32 1.442695, %v1451_v60 }
 0x702   : > { %2264 = vpow2.f32 %v1452_v53 }
 0x70c   : > { %v2265_v55 = vpop.eup %2264 }
 0x70d   : > { %v1454_v54 = vsel %vm829_vm3, %v2265_v55, 0.0 }
 0x70e   : > { %1455 = vadd.xlane.f32.xlu1 %v1454_v54  ;;  %v2232_v54 = vld [vmem:[%s3133_s16] sm:$0xff]  }
 0x71f   : > { %1460 = vrot.lane.b32.xlu1 %v2809_v33, %s2474_s29 }
 0x755   : > { %v943_v24 = vpop.xlane.xlu0 %942 }
 0x756   : > { %2266 = vrcp.f32 %v943_v24 }
 0x75d   : > { %v1115_v57 = vpop.xlane.xlu1 %1114 }
 0x75e   : > { %2268 = vrcp.f32 %v1115_v57 }
 0x760   : > { %v2267_v58 = vpop.eup %2266 }
 0x761   : > { %v945_v59 = vmul.f32 %v2267_v58, %v2259_v40  ;;  %v1291_v33 = vpop.permute.xlu1 %1290 }
 0x762   : > { %v1296_v15 = vsel %vm951_vm2, %v1291_v33, 0  ;;  %v2233_v33 = vld [vmem:[%s3133_s16 + $0x8] sm:$0xff]  }
 0x763   : > { %v946_v13 = vpack.c.bf16 %v945_v59, %v945_v59 }
 0x765   : > { %v1286_v61 = vpop.xlane.xlu0 %1285  ;;  %2059 = vmatmul.mubr.msk.bf16.vlgmr.msra.gmra.mrb[12].mxu0 %vm829_vm3, %v946_v13  ;;  %v1967_v13 = vld [vmem:[%s3129_s12] ss:$0 sm:$0xff] }
 0x766   : > { %2270 = vrcp.f32 %v1286_v61  ;;  %2070 = vmatprep.mubr.msk.bf16.mxu0 %vm2471_vm1, %v2470_v8 }
 0x768   : > { %v2269_v48 = vpop.eup %2268 }
 0x769   : > { %v1117_v32 = vmul.f32 %v2269_v48, %v2261_v45  ;;  %v1121_v50 = vpop.permute.xlu0 %1120  ;;  %v1968_v48 = vld [vmem:[%s3130_s13] ss:$0 sm:$0xff] }
 0x76a   : > { %v1126_v12 = vsel %vm951_vm2, %v1121_v50, 0 }
 0x76b   : > { %2069 = vmatpush3.bf16.msra.mxu0 %v1126_v12  ;;  %v1118_v62 = vpack.c.bf16 %v1117_v32, %v1117_v32 }
 0x76c   : > { %2080 = vmatprep.subr.bf16.mxu0 %v2470_v8 }
 0x76e   : > { %2071 = vmatmul.mubr.msk.bf16.vlgmr.msra.gmra.mrb[16].mxu0 %vm829_vm3, %v1118_v62  ;;  %v2234_v62 = vld [vmem:[%s3133_s16 + $0x10] sm:$0xff]  }
 0x76f   : > { %2081 = vmatpush3.bf16.msra.mxu0 %v1296_v15  ;;  %2082 = vmatprep.mubr.msk.bf16.mxu0 %vm2471_vm1, %v2470_v8  ;;  %v2235_v15 = vld [vmem:[%s3133_s16 + $0x18] sm:$0xff]  }
 0x770   : > { %v2271_v63 = vpop.eup %2270  ;;  %2092 = vmatprep.subr.bf16.mxu0 %v2470_v8 }
 0x771   : > { %v1288_v2 = vmul.f32 %v2271_v63, %v2263_v47  ;;  %v2236_v63 = vld [vmem:[%s3133_s16 + $0x20] sm:$0xff]  }
 0x773   : > { %v1289_v3 = vpack.c.bf16 %v1288_v2, %v1288_v2  ;;  %v2237_v2 = vld [vmem:[%s3133_s16 + $0x28] sm:$0xff]  }
 0x776   : > { %2083 = vmatmul.mubr.msk.bf16.vlgmr.msra.gmra.mrb[20].mxu0 %vm829_vm3, %v1289_v3  ;;  %v2238_v3 = vld [vmem:[%s3133_s16 + $0x30] sm:$0xff]  }
 0x777   : > { %2094 = vmatprep.mubr.msk.bf16.mxu0 %vm2471_vm1, %v2470_v8 }
 0x79b   : > { %v1456_v4 = vpop.xlane.xlu1 %1455 }
 0x79c   : > { %2272 = vrcp.f32 %v1456_v4  ;;  %v2239_v4 = vld [vmem:[%s3133_s16 + $0x38] sm:$0xff]  }
 0x79f   : > { %v1461_v28 = vpop.permute.xlu1 %1460 }
 0x7a0   : > { %v1466_v16 = vsel %vm951_vm2, %v1461_v28, 0  ;;  %v1969_v28 = vld [vmem:[%s3132_s15] ss:$0 sm:$0xff] }
 0x7a1   : > { %2093 = vmatpush3.bf16.msra.mxu0 %v1466_v16 }
 0x7a2   : > { %2106 = vmatprep.subr.bf16.mxu0 %v2470_v8 }
 0x7a6   : > { %v2273_v17 = vpop.eup %2272 }
 0x7a7   : > { %v1458_v6 = vmul.f32 %v2273_v17, %v2265_v55  ;;  %v2230_v55 = vld [vmem:[%s3131_s14] sm:$0xff]  }
 0x7a9   : > { %v1459_v7 = vpack.c.bf16 %v1458_v6, %v1458_v6 }
 0x7ab   : > { %2095 = vmatmul.mubr.msk.bf16.vlgmr.msra.gmra.mrb[24].mxu0 %vm829_vm3, %v1459_v7 }
 0x7ac   : > { %2110 = vmatprep.mubr.msk.bf16.mxu0 %vm2471_vm1, %v2470_v8  ;;  %2107 = vmatpush3.bf16.msra.mxu0 %v2230_v55 }
 0x7ad   : > { %2108 = vmatprep.subr.bf16.mxu0 %v2470_v8 }
 0x838   : > { %v989_v9 = vpop.f32.mrb[12].mxu0 }
 0x839   : > { %v2060_v10 = vpop.f32.mrb[13].mxu0 }
 0x83a   : > { %v992_v11 = vpop.f32.mrb[14].mxu0 }
 0x83b   : > { %v2061_v14 = vpop.f32.mrb[15].mxu0 }
 0x841   : > { %v1162_v19 = vpop.f32.mrb[16].mxu0 }
 0x842   : > { %1509 = vrot.lane.b32.xlu0 %v1162_v19, %s2475_s2  ;;  %v2072_v20 = vpop.f32.mrb[17].mxu0 }
 0x843   : > { %v1165_v21 = vpop.f32.mrb[18].mxu0 }
 0x844   : > { %v2073_v22 = vpop.f32.mrb[19].mxu0 }
 0x849   : > { %v1332_v23 = vpop.f32.mrb[20].mxu0 }
 0x84a   : > { %1513 = vrot.lane.b32.xlu1 %v1332_v23, %s2476_s30  ;;  %v2084_v25 = vpop.f32.mrb[21].mxu0  ;;  %s3177_s30 = sld [smem:[#allocation26_spill]] }
 0x84b   : > { %v1335_v26 = vpop.f32.mrb[22].mxu0  ;;  %v1973_v25 = vld [vmem:[%s3175_s1] ss:$0 sm:$0xff] }
 0x84c   : > { %v2085_v27 = vpop.f32.mrb[23].mxu0 }
 0x850   : > { %s3074_s24 = scalar_lea.hbm %s3177_s30, %s1983_s26 }
 0x87e   : > { %v1502_v29 = vpop.f32.mrb[24].mxu0 }
 0x87f   : > { %1517 = vrot.lane.b32.xlu0 %v1502_v29, %s2477_s23  ;;  %v2096_v30 = vpop.f32.mrb[25].mxu0  ;;  %s3178_s23 = smov %s3177_s30 }
 0x880   : > { %v1505_v31 = vpop.f32.mrb[26].mxu0 }
 0x881   : > { %v2097_v34 = vpop.f32.mrb[27].mxu0 }
 0x8b4   : > { %v1510_v1 = vpop.permute.xlu0 %1509 }
 0x8b5   : > { %v1520_v35 = vsel %vm829_vm3, %v989_v9, %v1510_v1 }
 0x8bc   : > { %v1514_v56 = vpop.permute.xlu1 %1513 }
 0x8bd   : > { %v1522_v36 = vsel %vm1521_vm4, %v1520_v35, %v1514_v56 }
 0x8f1   : > { %v1518_v5 = vpop.permute.xlu0 %1517 }
 0x8f2   : > { %v1524_v37 = vsel %vm1523_vm5, %v1522_v36, %v1518_v5 }
 0x8f3   : > { %v1525_v38 = vpack.c.bf16 %v1524_v37, %v1524_v37 }
 0x8f5   : > { %2103 = vmatmul.mubr.msk.bf16.vlgmr.msra.gmra.mrb[16].mxu1 %vm626_vm0, %v1525_v38 }
 0x8f6   : > { %2130 = vmatprep.mubr.msk.bf16.mxu1 %vm2471_vm1, %v2470_v8  ;;  %2115 = vmatpush3.bf16.msra.mxu1 %v2232_v54 }
 0x8f7   : > { %2116 = vmatprep.subr.bf16.mxu1 %v2470_v8 }
 0x8fa   : > { %2117 = vmatpush3.bf16.msra.mxu1 %v2233_v33 }
 0x8fb   : > { %2118 = vmatprep.subr.bf16.mxu1 %v2470_v8 }
 0x8fe   : > { %2119 = vmatpush3.bf16.msra.mxu1 %v2234_v62 }
 0x8ff   : > { %2120 = vmatprep.subr.bf16.mxu1 %v2470_v8 }
 0x902   : > { %2121 = vmatpush3.bf16.msra.mxu1 %v2235_v15 }
 0x903   : > { %2122 = vmatprep.subr.bf16.mxu1 %v2470_v8 }
 0x906   : > { %2123 = vmatpush3.bf16.msra.mxu1 %v2236_v63 }
 0x907   : > { %2124 = vmatprep.subr.bf16.mxu1 %v2470_v8 }
 0x90a   : > { %2125 = vmatpush3.bf16.msra.mxu1 %v2237_v2 }
 0x90b   : > { %2126 = vmatprep.subr.bf16.mxu1 %v2470_v8 }
 0x90e   : > { %2127 = vmatpush3.bf16.msra.mxu1 %v2238_v3 }
 0x90f   : > { %2128 = vmatprep.subr.bf16.mxu1 %v2470_v8 }
 0x912   : > { %2129 = vmatpush3.bf16.msra.mxu1 %v2239_v4 }
 0x9c8   : > { %v1586_v40 = vpop.f32.mrb[16].mxu1 }
 0x9c9   : > { %v1587_v41 = vadd.f32 %v1963_v39, %v1586_v40  ;;  %v2104_v42 = vpop.f32.mrb[17].mxu1 }
 0x9ca   : > { %v1589_v43 = vpop.f32.mrb[18].mxu1 }
 0x9cb   : > { %v3011_v44 = vadd.f32 %v1587_v41, %v2748_v0  ;;  %v2105_v45 = vpop.f32.mrb[19].mxu1  ;;  %v2231_v0 = vld [vmem:[%s3131_s14 + $0x8] sm:$0xff]  }
 0x9cc   : > { %2109 = vmatpush3.bf16.msra.mxu0 %v2231_v0 }
 0x9cd   : > { %v1595_v46 = vsel %vm626_vm0, %v3011_v44, 0.0 }
 0x9ce   : > { %1596 = vadd.xlane.f32.xlu1 %v1595_v46 }
 0xa5b   : > { %v1597_v47 = vpop.xlane.xlu1 %1596 }
 0xa5c   : > { %v1598_v49 = vmul.f32 0.03125, %v1597_v47 }
 0xa5e   : > { %v1599_v51 = vsub.f32 %v3011_v44, %v1598_v49 }
 0xa60   : > { %v1600_v60 = vmul.f32 %v1599_v51, %v1599_v51 }
 0xa62   : > { %v1601_v53 = vsel %vm626_vm0, %v1600_v60, 0.0 }
 0xa63   : > { %1602 = vadd.xlane.f32.xlu0 %v1601_v53 }
 0xaf0   : > { %v1603_v24 = vpop.xlane.xlu0 %1602 }
 0xaf1   : > { %v1604_v57 = vmul.f32 0.03125, %v1603_v24 }
 0xaf3   : > { %v1605_v58 = vadd.f32 1e-05, %v1604_v57 }
 0xaf5   : > { %2274 = vrsqrt.f32 %v1605_v58 }
 0xaff   : > { %v2275_v59 = vpop.eup %2274 }
 0xb00   : > { %v1607_v61 = vmul.f32 %v2275_v59, %v1599_v51 }
 0xb02   : > { %v1614_v32 = vmul.f32 %v1967_v13, %v1607_v61 }
 0xb04   : > { %v1621_v50 = vadd.f32 %v1968_v48, %v1614_v32 }
 0xb06   : > { %v1622_v12 = vpack.c.bf16 %v1621_v50, %v1621_v50 }
 0xb08   : > { %2111 = vmatmul.mubr.msk.bf16.vlgmr.msra.gmra.mrb[28].mxu0 %vm626_vm0, %v1622_v12 }
 0xbdb   : > { %v1683_v16 = vpop.f32.mrb[28].mxu0 }
 0xbdc   : > { %v1684_v17 = vadd.f32 %v1969_v28, %v1683_v16  ;;  %v2112_v6 = vpop.f32.mrb[29].mxu0 }
 0xbdd   : > { %v1686_v7 = vpop.f32.mrb[30].mxu0 }
 0xbde   : > { %v1690_v9 = vmul.f32 0.044715, %v1684_v17  ;;  %v2113_v10 = vpop.f32.mrb[31].mxu0  ;;  %v1689_v8 = vmul.f32 0.5, %v1684_v17 }
 0xbe0   : > { %v1691_v11 = vmul.f32 %v1690_v9, %v1684_v17 }
 0xbe2   : > { %v1692_v14 = vmul.f32 %v1691_v11, %v1684_v17 }
 0xbe4   : > { %v1693_v18 = vadd.f32 %v1692_v14, %v1684_v17 }
 0xbe6   : > { %v1694_v19 = vmul.f32 0.7978846, %v1693_v18 }
 0xbe8   : > { %2276 = vtanh.f32 %v1694_v19 }
 0xbf2   : > { %v2277_v20 = vpop.eup %2276 }
 0xbf3   : > { %v1696_v21 = vadd.f32 1.0, %v2277_v20 }
 0xbf5   : > { %v1697_v22 = vmul.f32 %v1696_v21, %v1689_v8 }
 0xbf7   : > { %v1698_v23 = vpack.c.bf16 %v1697_v22, %v1697_v22 }
 0xbf9   : > { %2131 = vmatmul.mubr.bf16.vlgmr.msra.gmra.mrb[20].mxu1 %v1698_v23 }
 0xccc   : > { %v1804_v26 = vpop.f32.mrb[20].mxu1 }
 0xccd   : > { %v1805_v27 = vadd.f32 %v1973_v25, %v1804_v26  ;;  %v2132_v52 = vpop.f32.mrb[21].mxu1 }
 0xcce   : > { %v1807_v29 = vpop.f32.mrb[22].mxu1 }
 0xccf   : > { %v1810_v30 = vadd.f32 %v1805_v27, %v3011_v44  ;;  %v2133_v31 = vpop.f32.mrb[23].mxu1 }
 0xcd1   : > { %1811 = vst.msk [vmem:[%s617_s20] sm:$0xff] %vm626_vm0, %v1810_v30 }
 0xcd2   : > { %2403 = shalt.err (!%p2400_p1)
}
 0xcd3   : > { %s2404_s19 = scalar_lea.hbm %s3074_s24, 128  ;;  %s2408_s20 = scalar_lea.hbm %s3178_s23, 256 }
 0xcd4   : > { %p2405_p0 = scmp.ne.s32.totalorder %s3074_s24, %s2404_s19  ;;  %p2409_p9 = scmp.lt.u32.totalorder %s3074_s24, %s3178_s23 }
 0xcd5   : > { %p2410_p12 = scmp.lt.u32.totalorder %s2408_s20, %s2404_s19  ;;  %p2412_p2 = scmp.lt.u32.totalorder %s2404_s19, %s3074_s24 }
 0xcd6   : > { %p2406_p6 = pnand %p2405_p0, %p3179_p3 }
 0xcd7   : > { %p2411_p10 = por %p2410_p12, %p2409_p9 }
 0xcd8   : > { %p2407_p5 = pneg %p2406_p6 }
 0xcd9   : > { %p2413_p4 = por %p2412_p2, %p2411_p10 }
 0xcdb   : > { %p2414_p7 = pnand %p2413_p4, %p2407_p5 }
 0xcdd   : > { %2417 = shalt.err (!%p2414_p7)
}
 0xcde   : > { %2150 = dma.vmem_to_hbm [thread:$0]  (%p3179_p3), %s3076_s17, 128, %s3074_s24, %s1813_s0  }
 0xcdf PF: > { %s3180_s30 = sld [smem:[#allocation17_spill]]  ;;  %s3181_s21 = sld [smem:[#allocation15_spill]] }
 0xce0   : > { %s3182_s18 = sld [smem:[#allocation21_spill]] }
 0xce5   : > { %p2177_p8 = scmp.ge.s32.totalorder %s3180_s30, 2  ;;  %s1838_s25 = sand.u32 1, %s3181_s21  }
 0xce6   : > { %p3183_p11 = scmp.ne.s32.totalorder %s3182_s18, 0  ;;  %s1839_s22 = scalar_lea.sflag [#allocation4], %s1838_s25 }
 0xce8   : > { %p2166_p13 = pnand %p2177_p8, %p3183_p11 }
 0xcea   : > { %2447 = dma.done.wait (!%p2166_p13), %s1839_s22, 128  }
 0xceb   : > { %2449 = vsyncadd (!%p2166_p13), %s1839_s22, 4294967168  ;;  %s3184_s30 = sld [smem:[#allocation18_spill]]  ;;  %s3185_s19 = sld [smem:[#allocation16_spill]] }
 0xcec   : > { %s3186_s29 = sld [smem:[#allocation19_spill]]  ;;  %s3187_s27 = smov %s2456_s28 }
 0xcf1   : > { %p31_p1 = scmp.ge.s32.totalorder %s3184_s30, 4   ;;  %s3188_s28 = smov %s3185_s19 }
 0xcf3   :  { %33 = sbr.rel (!%p31_p1) target bundleno = 12 (0xc), region = 144 }
 0xcfa   :  { %1844 = vsyncpa [#allocation3], 1 }
 0xcfb   :  { %1846 = vsyncpa [#allocation3 + $0x1], 1 }
 0xcfc   :  { %1847 = vsyncpa [#allocation6], 1 }
 0xcfd   :  { %1848 = vsyncpa [#allocation9], 1 }
 0xcfe   :  { %1849 = vsyncpa [#allocation4], 1 }
 0xcff   :  { %1851 = vsyncpa [#allocation4 + $0x1], 1 }

</bundles_post_ra>
